<compile_context>
chip_gen: v7x
topology: tpu7x:2x2x1
jax: 0.10.0
libtpu: 0.0.40
codegen_flags: <defaults>
</compile_context>

<pallas_src>
import functools

import jax
import jax.numpy as jnp
from jax.experimental import pallas as pl
from jax.experimental.pallas import tpu as pltpu


# ----------------------------- Pallas kernels ------------------------------


def _upconv_kernel(x_ref, w_ref, b_ref, o_ref):
    """Per-batch ConvTranspose2d(k=2, s=2) as one channel-major MXU matmul.

    x_ref: (1, Cin, H*W)      input, channel-major (pixels on lanes)
    w_ref: (4*Cout, Cin)      rows ordered (di, dj, cout), compute dtype
    b_ref: (4*Cout, 1)        f32 bias (each output pixel gets it exactly once)
    o_ref: (1, 4*Cout, H*W)   o[(di*2+dj)*Cout+co, i*W+j] = up[co, 2i+di, 2j+dj]
    """
    x = x_ref[0].astype(w_ref.dtype)
    y = jnp.dot(w_ref[...], x, preferred_element_type=jnp.float32)
    y = y + b_ref[...]
    o_ref[0] = y.astype(o_ref.dtype)


def _conv_block_kernel(skip_ref, up_ref, w1_ref, b1_ref, w2_ref, b2_ref, o_ref,
                       *, width):
    """Per-batch fused [channel-concat -> conv3x3+ReLU -> conv3x3+ReLU].

    skip_ref: (1, Cs, L)           L = H*W at the post-upsample resolution
    up_ref  : (1, Cu, L)
    w1_ref  : (C1, 9*(Cs+Cu))      columns: [9 skip taps | 9 up taps], k = dh*3+dw
    b1_ref  : (C1, 1)              f32
    w2_ref  : (C2, 9*C1)
    b2_ref  : (C2, 1)              f32
    o_ref   : (1, C2, L)           f32
    """
    length = o_ref.shape[-1]
    cdt = w1_ref.dtype                        # compute dtype (bf16 or f32)

    # Edge-column masks, computed once and shared by every tap stack.
    pix = jax.lax.broadcasted_iota(jnp.int32, (1, length), 1)
    col = jax.lax.rem(pix, width)
    not_first_col = col != 0                  # taps with dw == 0
    not_last_col = col != (width - 1)         # taps with dw == 2

    def tap_stack(a):
        """(C, L) -> (9*C, L): row k*C+c holds the input shifted by tap k=dh*3+dw.

        'Same' zero padding is done entirely in VMEM: a (width+1)-wide zero halo on
        both ends of the flat pixel axis handles out-of-image rows, and the two
        edge-column masks kill the row-wraparound of the flat layout.
        """
        c = a.shape[0]
        halo = jnp.zeros((c, width + 1), a.dtype)
        ap = jnp.concatenate([halo, a, halo], axis=1)     # (C, L + 2*width + 2)
        pieces = []
        for dh in range(3):
            for dw in range(3):
                start = (width + 1) + (dh - 1) * width + (dw - 1)
                t = ap[:, start:start + length]
                if dw == 0:
                    t = jnp.where(not_first_col, t, 0)
                elif dw == 2:
                    t = jnp.where(not_last_col, t, 0)
                pieces.append(t)
        return jnp.concatenate(pieces, axis=0)            # (9*C, L)

    # conv1: a single MXU matmul with K = 9*(Cs+Cu); skip/up share one im2col RHS,
    # so the torch.cat([skip, up], 1) never materialises in HBM or VMEM.
    rhs1 = jnp.concatenate([tap_stack(skip_ref[0].astype(cdt)),
                            tap_stack(up_ref[0].astype(cdt))], axis=0)
    h = jnp.dot(w1_ref[...], rhs1, preferred_element_type=jnp.float32)
    h = jnp.maximum(h + b1_ref[...], 0.0)

    # conv2, fused in the same kernel: the intermediate activation never leaves VMEM.
    rhs2 = tap_stack(h.astype(cdt))
    h = jnp.dot(w2_ref[...], rhs2, preferred_element_type=jnp.float32)
    h = jnp.maximum(h + b2_ref[...], 0.0)
    o_ref[0] = h.astype(o_ref.dtype)


# --------------------------- UNetUpBlockRN forward ---------------------------


def unet_up_block_forward(x, skip, params, *, compute_dtype=jnp.bfloat16):
    """UNetUpBlockRN.forward.  x: (N, up_in, H, W); skip: (N, Cs, 2H, 2W), NCHW f32."""
    n, c_in, h, w = x.shape
    c_up = params["w_up"].shape[1]
    _, c_skip, h2, w2 = skip.shape
    assert (h2, w2) == (2 * h, 2 * w)
    lx, l = h * w, h2 * w2
    c1 = params["w1"].shape[0]
    c2 = params["w2"].shape[0]
    cdt = compute_dtype
    cparams = pltpu.CompilerParams(dimension_semantics=("parallel",),
                                   vmem_limit_bytes=64 * 1024 * 1024)

    # ---- 1) ConvTranspose2d(k=2, s=2): per-pixel matmul in phase space ----------
    x_flat = x.reshape(n, c_in, lx)                               # free reshape
    w4 = jnp.transpose(params["w_up"], (2, 3, 1, 0)).reshape(4 * c_up, c_in)
    b4 = jnp.tile(params["b_up"], 4).reshape(4 * c_up, 1).astype(jnp.float32)

    up4 = pl.pallas_call(
        _upconv_kernel,
        out_shape=jax.ShapeDtypeStruct((n, 4 * c_up, lx), cdt),
        grid=(n,),
        in_specs=[
            pl.BlockSpec((1, c_in, lx), lambda i: (i, 0, 0)),
            pl.BlockSpec((4 * c_up, c_in), lambda i: (0, 0)),
            pl.BlockSpec((4 * c_up, 1), lambda i: (0, 0)),
        ],
        out_specs=pl.BlockSpec((1, 4 * c_up, lx), lambda i: (i, 0, 0)),
        compiler_params=cparams,
    )(x_flat, w4.astype(cdt), b4)

    # Stride-2 phase interleave (pure relayout of the smallest activation): XLA.
    # TODO(synk): fold into VMEM to save this one HBM pass over `up`.
    up = up4.reshape(n, 2, 2, c_up, h, w)
    up = jnp.transpose(up, (0, 3, 4, 1, 5, 2)).reshape(n, c_up, l)

    # ---- 2+3) concat + Conv3x3+ReLU + Conv3x3+ReLU, fused into one kernel --------
    skip_flat = skip.reshape(n, c_skip, l)                        # free reshape
    w1 = params["w1"]                                             # (C1, Cs+Cu, 3, 3)
    w1s = jnp.transpose(w1[:, :c_skip], (0, 2, 3, 1)).reshape(c1, 9 * c_skip)
    w1u = jnp.transpose(w1[:, c_skip:], (0, 2, 3, 1)).reshape(c1, 9 * c_up)
    w1m = jnp.concatenate([w1s, w1u], axis=1).astype(cdt)
    w2m = jnp.transpose(params["w2"], (0, 2, 3, 1)).reshape(c2, 9 * c1).astype(cdt)
    b1 = params["b1"].reshape(c1, 1).astype(jnp.float32)
    b2 = params["b2"].reshape(c2, 1).astype(jnp.float32)

    out_flat = pl.pallas_call(
        functools.partial(_conv_block_kernel, width=w2),
        out_shape=jax.ShapeDtypeStruct((n, c2, l), jnp.float32),
        grid=(n,),
        in_specs=[
            pl.BlockSpec((1, c_skip, l), lambda i: (i, 0, 0)),
            pl.BlockSpec((1, c_up, l), lambda i: (i, 0, 0)),
            pl.BlockSpec((c1, 9 * (c_skip + c_up)), lambda i: (0, 0)),
            pl.BlockSpec((c1, 1), lambda i: (0, 0)),
            pl.BlockSpec((c2, 9 * c1), lambda i: (0, 0)),
            pl.BlockSpec((c2, 1), lambda i: (0, 0)),
        ],
        out_specs=pl.BlockSpec((1, c2, l), lambda i: (i, 0, 0)),
        compiler_params=cparams,
    )(skip_flat, up, w1m, b1, w2m, b2)

    return out_flat.reshape(n, c2, h2, w2)                        # free reshape


# ------------------------------ pure-JAX reference ---------------------------


def unet_up_block_ref(x, skip, params):
    n = x.shape[0]
    w_up, b_up = params["w_up"], params["b_up"]
    c_up = w_up.shape[1]
    h, w = x.shape[2], x.shape[3]
    t = jnp.einsum("nihw,iopq->nohpwq", x, w_up,
                   precision=jax.lax.Precision.HIGHEST)
    up = t.reshape(n, c_up, 2 * h, 2 * w) + b_up[None, :, None, None]
    out = jnp.concatenate([skip, up], axis=1)
    for wk, bk in (("w1", "b1"), ("w2", "b2")):
        out = jax.lax.conv_general_dilated(
            out, params[wk], window_strides=(1, 1), padding=((1, 1), (1, 1)),
            dimension_numbers=("NCHW", "OIHW", "NCHW"),
            precision=jax.lax.Precision.HIGHEST)
        out = jax.nn.relu(out + params[bk][None, :, None, None])
    return out


if __name__ == "__main__":
    key = jax.random.PRNGKey(0)
    n = 2
    up_in, up_out = 8, 4                    # ConvTranspose2d(up_in -> up_out)
    skip_c = 4
    block_in, block_out = skip_c + up_out, 8
    h = w = 16                              # low-res input; skip/output are 2h x 2w

    ks = jax.random.split(key, 8)
    x = jax.random.normal(ks[0], (n, up_in, h, w), dtype=jnp.float32)
    skip = jax.random.normal(ks[1], (n, skip_c, 2 * h, 2 * w), dtype=jnp.float32)
    params = {
        "w_up": 0.1 * jax.random.normal(ks[2], (up_in, up_out, 2, 2), jnp.float32),
        "b_up": 0.1 * jax.random.normal(ks[3], (up_out,), jnp.float32),
        "w1": 0.1 * jax.random.normal(ks[4], (block_out, block_in, 3, 3), jnp.float32),
        "b1": 0.1 * jax.random.normal(ks[5], (block_out,), jnp.float32),
        "w2": 0.1 * jax.random.normal(ks[6], (block_out, block_out, 3, 3), jnp.float32),
        "b2": 0.1 * jax.random.normal(ks[7], (block_out,), jnp.float32),
    }

    fwd = jax.jit(unet_up_block_forward, static_argnames=("compute_dtype",))
    ref = unet_up_block_ref(x, skip, params)

    # f32-operand path: tight structural/numerical gate.
    out_f32 = jax.block_until_ready(fwd(x, skip, params, compute_dtype=jnp.float32))
    assert out_f32.shape == (n, block_out, 2 * h, 2 * w), out_f32.shape
    assert out_f32.dtype == jnp.float32
    err_f32 = float(jnp.max(jnp.abs(out_f32 - ref)))
    assert err_f32 < 2e-2, f"f32 path mismatch vs reference: max abs err {err_f32}"

    # Default bf16-MXU-operand path (per perf review) with f32 accumulation; the
    # looser tolerance accounts for bf16 operand rounding over two K=72 contractions.
    out_bf16 = jax.block_until_ready(fwd(x, skip, params, compute_dtype=jnp.bfloat16))
    assert out_bf16.shape == (n, block_out, 2 * h, 2 * w), out_bf16.shape
    err_bf16 = float(jnp.max(jnp.abs(out_bf16 - ref)))
    assert err_bf16 < 6e-2, f"bf16 path mismatch vs reference: max abs err {err_bf16}"

    print("KERNEL_OK")
</pallas_src>

<mosaic_0001>
module attributes {stable_mosaic.version = 11 : i64} {
  func.func @_upconv_kernel(%arg0: i32, %arg1: memref<1x8x256xf32, #tpu.memory_space<vmem>>, %arg2: memref<16x8xf32, #tpu.memory_space<vmem>>, %arg3: memref<16x1xf32, #tpu.memory_space<vmem>>, %arg4: memref<1x16x256xf32, #tpu.memory_space<vmem>>) attributes {dimension_semantics = [#tpu.dimension_semantics<parallel>], iteration_bounds = array<i64: 2>, scalar_prefetch = 0 : i64, scratch_operands = 0 : i64, tpu.core_type = #tpu.core_type<tc>, window_params = [{transform_indices = @transform_0, window_bounds = array<i64: 1, 8, 256>}, {pipeline_mode = #tpu.pipeline_mode<synchronous>, transform_indices = @transform_1, window_bounds = array<i64: 16, 8>}, {pipeline_mode = #tpu.pipeline_mode<synchronous>, transform_indices = @transform_2, window_bounds = array<i64: 16, 1>}, {transform_indices = @transform_3, window_bounds = array<i64: 1, 16, 256>}]} {
    %c0 = arith.constant 0 : index
    %c0_0 = arith.constant 0 : index
    %c0_1 = arith.constant 0 : index
    %0 = vector.load %arg1[%c0, %c0_0, %c0_1] : memref<1x8x256xf32, #tpu.memory_space<vmem>>, vector<1x8x256xf32>
    %1 = vector.shape_cast %0 : vector<1x8x256xf32> to vector<8x256xf32>
    %c0_2 = arith.constant 0 : index
    %c0_3 = arith.constant 0 : index
    %2 = vector.load %arg2[%c0_2, %c0_3] : memref<16x8xf32, #tpu.memory_space<vmem>>, vector<16x8xf32>
    %cst = arith.constant dense<0.000000e+00> : vector<16x256xf32>
    %3 = tpu.matmul %2, %1, %cst {dimension_numbers = #tpu.dot_dimension_numbers<[1], [0], [0], [1], [0, 0, 1, 1], [], []>} : vector<16x8xf32>, vector<8x256xf32>, vector<16x256xf32> -> vector<16x256xf32>
    %c0_4 = arith.constant 0 : index
    %c0_5 = arith.constant 0 : index
    %4 = vector.load %arg3[%c0_4, %c0_5] : memref<16x1xf32, #tpu.memory_space<vmem>>, vector<16x1xf32>
    %5 = vector.broadcast %4 : vector<16x1xf32> to vector<16x256xf32>
    %6 = arith.addf %3, %5 : vector<16x256xf32>
    %c0_6 = arith.constant 0 : index
    %c0_7 = arith.constant 0 : index
    %c0_8 = arith.constant 0 : index
    %7 = vector.load %arg4[%c0_6, %c0_7, %c0_8] : memref<1x16x256xf32, #tpu.memory_space<vmem>>, vector<1x16x256xf32>
    %8 = vector.shape_cast %7 : vector<1x16x256xf32> to vector<16x256xf32>
    %9 = vector.shape_cast %6 : vector<16x256xf32> to vector<1x16x256xf32>
    tpu.vector_store %arg4[%c0_6, %c0_7, %c0_8], %9 {strides = array<i32>} : memref<1x16x256xf32, #tpu.memory_space<vmem>>, vector<1x16x256xf32>,
    return
  }
  func.func @transform_0(%arg0: i32) -> (i32, i32, i32) {
    %c0_i32 = arith.constant 0 : i32
    %c0_i32_0 = arith.constant 0 : i32
    %c0_i32_1 = arith.constant 0 : i32
    return %arg0, %c0_i32, %c0_i32_0 : i32, i32, i32
  }
  func.func @transform_1(%arg0: i32) -> (i32, i32) {
    %c0_i32 = arith.constant 0 : i32
    %c0_i32_0 = arith.constant 0 : i32
    %c0_i32_1 = arith.constant 0 : i32
    return %c0_i32, %c0_i32_0 : i32, i32
  }
  func.func @transform_2(%arg0: i32) -> (i32, i32) {
    %c0_i32 = arith.constant 0 : i32
    %c0_i32_0 = arith.constant 0 : i32
    %c0_i32_1 = arith.constant 0 : i32
    return %c0_i32, %c0_i32_0 : i32, i32
  }
  func.func @transform_3(%arg0: i32) -> (i32, i32, i32) {
    %c0_i32 = arith.constant 0 : i32
    %c0_i32_0 = arith.constant 0 : i32
    %c0_i32_1 = arith.constant 0 : i32
    return %arg0, %c0_i32, %c0_i32_0 : i32, i32, i32
  }
}

module attributes {stable_mosaic.version = 11 : i64} {
  func.func @_conv_block_kernel(%arg0: i32, %arg1: memref<1x4x1024xf32, #tpu.memory_space<vmem>>, %arg2: memref<1x4x1024xf32, #tpu.memory_space<vmem>>, %arg3: memref<8x72xf32, #tpu.memory_space<vmem>>, %arg4: memref<8x1xf32, #tpu.memory_space<vmem>>, %arg5: memref<8x72xf32, #tpu.memory_space<vmem>>, %arg6: memref<8x1xf32, #tpu.memory_space<vmem>>, %arg7: memref<1x8x1024xf32, #tpu.memory_space<vmem>>) attributes {dimension_semantics = [#tpu.dimension_semantics<parallel>], iteration_bounds = array<i64: 2>, scalar_prefetch = 0 : i64, scratch_operands = 0 : i64, tpu.core_type = #tpu.core_type<tc>, window_params = [{transform_indices = @transform_0, window_bounds = array<i64: 1, 4, 1024>}, {transform_indices = @transform_1, window_bounds = array<i64: 1, 4, 1024>}, {pipeline_mode = #tpu.pipeline_mode<synchronous>, transform_indices = @transform_2, window_bounds = array<i64: 8, 72>}, {pipeline_mode = #tpu.pipeline_mode<synchronous>, transform_indices = @transform_3, window_bounds = array<i64: 8, 1>}, {pipeline_mode = #tpu.pipeline_mode<synchronous>, transform_indices = @transform_4, window_bounds = array<i64: 8, 72>}, {pipeline_mode = #tpu.pipeline_mode<synchronous>, transform_indices = @transform_5, window_bounds = array<i64: 8, 1>}, {transform_indices = @transform_6, window_bounds = array<i64: 1, 8, 1024>}]} {
    %0 = tpu.iota {dimensions = array<i32: 1>} : vector<1x1024xi32>
    %c32_i32 = arith.constant 32 : i32
    %1 = vector.broadcast %c32_i32 : i32 to vector<1x1024xi32>
    %2 = arith.remsi %0, %1 : vector<1x1024xi32>
    %c0_i32 = arith.constant 0 : i32
    %3 = vector.broadcast %c0_i32 : i32 to vector<1x1024xi32>
    %4 = arith.cmpi ne, %2, %3 : vector<1x1024xi32>
    %c31_i32 = arith.constant 31 : i32
    %5 = vector.broadcast %c31_i32 : i32 to vector<1x1024xi32>
    %6 = arith.cmpi ne, %2, %5 : vector<1x1024xi32>
    %c0 = arith.constant 0 : index
    %c0_0 = arith.constant 0 : index
    %c0_1 = arith.constant 0 : index
    %7 = vector.load %arg1[%c0, %c0_0, %c0_1] : memref<1x4x1024xf32, #tpu.memory_space<vmem>>, vector<1x4x1024xf32>
    %8 = vector.shape_cast %7 : vector<1x4x1024xf32> to vector<4x1024xf32>
    %cst = arith.constant 0.000000e+00 : f32
    %9 = vector.broadcast %cst : f32 to vector<4x33xf32>
    %10 = tpu.concatenate %9, %8, %9 in 1 : vector<4x33xf32>, vector<4x1024xf32>, vector<4x33xf32> -> vector<4x1090xf32>
    %11 = vector.extract_strided_slice %10 {offsets = [0, 0], sizes = [4, 1024], strides = [1, 1]} : vector<4x1090xf32> to vector<4x1024xf32>
    %c0_i32_2 = arith.constant 0 : i32
    %12 = arith.sitofp %c0_i32_2 : i32 to f32
    %13 = vector.shape_cast %4 : vector<1x1024xi1> to vector<1x1024xi1>
    %14 = vector.broadcast %13 : vector<1x1024xi1> to vector<4x1024xi1>
    %15 = vector.broadcast %12 : f32 to vector<4x1024xf32>
    %16 = arith.select %14, %11, %15 : vector<4x1024xi1>, vector<4x1024xf32>
    %17 = vector.extract_strided_slice %10 {offsets = [0, 1], sizes = [4, 1024], strides = [1, 1]} : vector<4x1090xf32> to vector<4x1024xf32>
    %18 = vector.extract_strided_slice %10 {offsets = [0, 2], sizes = [4, 1024], strides = [1, 1]} : vector<4x1090xf32> to vector<4x1024xf32>
    %c0_i32_3 = arith.constant 0 : i32
    %19 = arith.sitofp %c0_i32_3 : i32 to f32
    %20 = vector.shape_cast %6 : vector<1x1024xi1> to vector<1x1024xi1>
    %21 = vector.broadcast %20 : vector<1x1024xi1> to vector<4x1024xi1>
    %22 = vector.broadcast %19 : f32 to vector<4x1024xf32>
    %23 = arith.select %21, %18, %22 : vector<4x1024xi1>, vector<4x1024xf32>
    %24 = vector.extract_strided_slice %10 {offsets = [0, 32], sizes = [4, 1024], strides = [1, 1]} : vector<4x1090xf32> to vector<4x1024xf32>
    %c0_i32_4 = arith.constant 0 : i32
    %25 = arith.sitofp %c0_i32_4 : i32 to f32
    %26 = vector.shape_cast %4 : vector<1x1024xi1> to vector<1x1024xi1>
    %27 = vector.broadcast %26 : vector<1x1024xi1> to vector<4x1024xi1>
    %28 = vector.broadcast %25 : f32 to vector<4x1024xf32>
    %29 = arith.select %27, %24, %28 : vector<4x1024xi1>, vector<4x1024xf32>
    %30 = vector.extract_strided_slice %10 {offsets = [0, 33], sizes = [4, 1024], strides = [1, 1]} : vector<4x1090xf32> to vector<4x1024xf32>
    %31 = vector.extract_strided_slice %10 {offsets = [0, 34], sizes = [4, 1024], strides = [1, 1]} : vector<4x1090xf32> to vector<4x1024xf32>
    %c0_i32_5 = arith.constant 0 : i32
    %32 = arith.sitofp %c0_i32_5 : i32 to f32
    %33 = vector.shape_cast %6 : vector<1x1024xi1> to vector<1x1024xi1>
    %34 = vector.broadcast %33 : vector<1x1024xi1> to vector<4x1024xi1>
    %35 = vector.broadcast %32 : f32 to vector<4x1024xf32>
    %36 = arith.select %34, %31, %35 : vector<4x1024xi1>, vector<4x1024xf32>
    %37 = vector.extract_strided_slice %10 {offsets = [0, 64], sizes = [4, 1024], strides = [1, 1]} : vector<4x1090xf32> to vector<4x1024xf32>
    %c0_i32_6 = arith.constant 0 : i32
    %38 = arith.sitofp %c0_i32_6 : i32 to f32
    %39 = vector.shape_cast %4 : vector<1x1024xi1> to vector<1x1024xi1>
    %40 = vector.broadcast %39 : vector<1x1024xi1> to vector<4x1024xi1>
    %41 = vector.broadcast %38 : f32 to vector<4x1024xf32>
    %42 = arith.select %40, %37, %41 : vector<4x1024xi1>, vector<4x1024xf32>
    %43 = vector.extract_strided_slice %10 {offsets = [0, 65], sizes = [4, 1024], strides = [1, 1]} : vector<4x1090xf32> to vector<4x1024xf32>
    %44 = vector.extract_strided_slice %10 {offsets = [0, 66], sizes = [4, 1024], strides = [1, 1]} : vector<4x1090xf32> to vector<4x1024xf32>
    %c0_i32_7 = arith.constant 0 : i32
    %45 = arith.sitofp %c0_i32_7 : i32 to f32
    %46 = vector.shape_cast %6 : vector<1x1024xi1> to vector<1x1024xi1>
    %47 = vector.broadcast %46 : vector<1x1024xi1> to vector<4x1024xi1>
    %48 = vector.broadcast %45 : f32 to vector<4x1024xf32>
    %49 = arith.select %47, %44, %48 : vector<4x1024xi1>, vector<4x1024xf32>
    %50 = tpu.concatenate %16, %17, %23, %29, %30, %36, %42, %43, %49 in 0 : vector<4x1024xf32>, vector<4x1024xf32>, vector<4x1024xf32>, vector<4x1024xf32>, vector<4x1024xf32>, vector<4x1024xf32>, vector<4x1024xf32>, vector<4x1024xf32>, vector<4x1024xf32> -> vector<36x1024xf32>
    %c0_8 = arith.constant 0 : index
    %c0_9 = arith.constant 0 : index
    %c0_10 = arith.constant 0 : index
    %51 = vector.load %arg2[%c0_8, %c0_9, %c0_10] : memref<1x4x1024xf32, #tpu.memory_space<vmem>>, vector<1x4x1024xf32>
    %52 = vector.shape_cast %51 : vector<1x4x1024xf32> to vector<4x1024xf32>
    %cst_11 = arith.constant 0.000000e+00 : f32
    %53 = vector.broadcast %cst_11 : f32 to vector<4x33xf32>
    %54 = tpu.concatenate %53, %52, %53 in 1 : vector<4x33xf32>, vector<4x1024xf32>, vector<4x33xf32> -> vector<4x1090xf32>
    %55 = vector.extract_strided_slice %54 {offsets = [0, 0], sizes = [4, 1024], strides = [1, 1]} : vector<4x1090xf32> to vector<4x1024xf32>
    %c0_i32_12 = arith.constant 0 : i32
    %56 = arith.sitofp %c0_i32_12 : i32 to f32
    %57 = vector.shape_cast %4 : vector<1x1024xi1> to vector<1x1024xi1>
    %58 = vector.broadcast %57 : vector<1x1024xi1> to vector<4x1024xi1>
    %59 = vector.broadcast %56 : f32 to vector<4x1024xf32>
    %60 = arith.select %58, %55, %59 : vector<4x1024xi1>, vector<4x1024xf32>
    %61 = vector.extract_strided_slice %54 {offsets = [0, 1], sizes = [4, 1024], strides = [1, 1]} : vector<4x1090xf32> to vector<4x1024xf32>
    %62 = vector.extract_strided_slice %54 {offsets = [0, 2], sizes = [4, 1024], strides = [1, 1]} : vector<4x1090xf32> to vector<4x1024xf32>
    %c0_i32_13 = arith.constant 0 : i32
    %63 = arith.sitofp %c0_i32_13 : i32 to f32
    %64 = vector.shape_cast %6 : vector<1x1024xi1> to vector<1x1024xi1>
    %65 = vector.broadcast %64 : vector<1x1024xi1> to vector<4x1024xi1>
    %66 = vector.broadcast %63 : f32 to vector<4x1024xf32>
    %67 = arith.select %65, %62, %66 : vector<4x1024xi1>, vector<4x1024xf32>
    %68 = vector.extract_strided_slice %54 {offsets = [0, 32], sizes = [4, 1024], strides = [1, 1]} : vector<4x1090xf32> to vector<4x1024xf32>
    %c0_i32_14 = arith.constant 0 : i32
    %69 = arith.sitofp %c0_i32_14 : i32 to f32
    %70 = vector.shape_cast %4 : vector<1x1024xi1> to vector<1x1024xi1>
    %71 = vector.broadcast %70 : vector<1x1024xi1> to vector<4x1024xi1>
    %72 = vector.broadcast %69 : f32 to vector<4x1024xf32>
    %73 = arith.select %71, %68, %72 : vector<4x1024xi1>, vector<4x1024xf32>
    %74 = vector.extract_strided_slice %54 {offsets = [0, 33], sizes = [4, 1024], strides = [1, 1]} : vector<4x1090xf32> to vector<4x1024xf32>
    %75 = vector.extract_strided_slice %54 {offsets = [0, 34], sizes = [4, 1024], strides = [1, 1]} : vector<4x1090xf32> to vector<4x1024xf32>
    %c0_i32_15 = arith.constant 0 : i32
    %76 = arith.sitofp %c0_i32_15 : i32 to f32
    %77 = vector.shape_cast %6 : vector<1x1024xi1> to vector<1x1024xi1>
    %78 = vector.broadcast %77 : vector<1x1024xi1> to vector<4x1024xi1>
    %79 = vector.broadcast %76 : f32 to vector<4x1024xf32>
    %80 = arith.select %78, %75, %79 : vector<4x1024xi1>, vector<4x1024xf32>
    %81 = vector.extract_strided_slice %54 {offsets = [0, 64], sizes = [4, 1024], strides = [1, 1]} : vector<4x1090xf32> to vector<4x1024xf32>
    %c0_i32_16 = arith.constant 0 : i32
    %82 = arith.sitofp %c0_i32_16 : i32 to f32
    %83 = vector.shape_cast %4 : vector<1x1024xi1> to vector<1x1024xi1>
    %84 = vector.broadcast %83 : vector<1x1024xi1> to vector<4x1024xi1>
    %85 = vector.broadcast %82 : f32 to vector<4x1024xf32>
    %86 = arith.select %84, %81, %85 : vector<4x1024xi1>, vector<4x1024xf32>
    %87 = vector.extract_strided_slice %54 {offsets = [0, 65], sizes = [4, 1024], strides = [1, 1]} : vector<4x1090xf32> to vector<4x1024xf32>
    %88 = vector.extract_strided_slice %54 {offsets = [0, 66], sizes = [4, 1024], strides = [1, 1]} : vector<4x1090xf32> to vector<4x1024xf32>
    %c0_i32_17 = arith.constant 0 : i32
    %89 = arith.sitofp %c0_i32_17 : i32 to f32
    %90 = vector.shape_cast %6 : vector<1x1024xi1> to vector<1x1024xi1>
    %91 = vector.broadcast %90 : vector<1x1024xi1> to vector<4x1024xi1>
    %92 = vector.broadcast %89 : f32 to vector<4x1024xf32>
    %93 = arith.select %91, %88, %92 : vector<4x1024xi1>, vector<4x1024xf32>
    %94 = tpu.concatenate %60, %61, %67, %73, %74, %80, %86, %87, %93 in 0 : vector<4x1024xf32>, vector<4x1024xf32>, vector<4x1024xf32>, vector<4x1024xf32>, vector<4x1024xf32>, vector<4x1024xf32>, vector<4x1024xf32>, vector<4x1024xf32>, vector<4x1024xf32> -> vector<36x1024xf32>
    %95 = tpu.concatenate %50, %94 in 0 : vector<36x1024xf32>, vector<36x1024xf32> -> vector<72x1024xf32>
    %c0_18 = arith.constant 0 : index
    %c0_19 = arith.constant 0 : index
    %96 = vector.load %arg3[%c0_18, %c0_19] : memref<8x72xf32, #tpu.memory_space<vmem>>, vector<8x72xf32>
    %cst_20 = arith.constant dense<0.000000e+00> : vector<8x1024xf32>
    %97 = tpu.matmul %96, %95, %cst_20 {dimension_numbers = #tpu.dot_dimension_numbers<[1], [0], [0], [1], [0, 0, 1, 1], [], []>} : vector<8x72xf32>, vector<72x1024xf32>, vector<8x1024xf32> -> vector<8x1024xf32>
    %c0_21 = arith.constant 0 : index
    %c0_22 = arith.constant 0 : index
    %98 = vector.load %arg4[%c0_21, %c0_22] : memref<8x1xf32, #tpu.memory_space<vmem>>, vector<8x1xf32>
    %99 = vector.broadcast %98 : vector<8x1xf32> to vector<8x1024xf32>
    %100 = arith.addf %97, %99 : vector<8x1024xf32>
    %cst_23 = arith.constant 0.000000e+00 : f32
    %101 = vector.broadcast %cst_23 : f32 to vector<8x1024xf32>
    %102 = arith.maximumf %100, %101 : vector<8x1024xf32>
    %cst_24 = arith.constant 0.000000e+00 : f32
    %103 = vector.broadcast %cst_24 : f32 to vector<8x33xf32>
    %104 = tpu.concatenate %103, %102, %103 in 1 : vector<8x33xf32>, vector<8x1024xf32>, vector<8x33xf32> -> vector<8x1090xf32>
    %105 = vector.extract_strided_slice %104 {offsets = [0, 0], sizes = [8, 1024], strides = [1, 1]} : vector<8x1090xf32> to vector<8x1024xf32>
    %c0_i32_25 = arith.constant 0 : i32
    %106 = arith.sitofp %c0_i32_25 : i32 to f32
    %107 = vector.shape_cast %4 : vector<1x1024xi1> to vector<1x1024xi1>
    %108 = vector.broadcast %107 : vector<1x1024xi1> to vector<8x1024xi1>
    %109 = vector.broadcast %106 : f32 to vector<8x1024xf32>
    %110 = arith.select %108, %105, %109 : vector<8x1024xi1>, vector<8x1024xf32>
    %111 = vector.extract_strided_slice %104 {offsets = [0, 1], sizes = [8, 1024], strides = [1, 1]} : vector<8x1090xf32> to vector<8x1024xf32>
    %112 = vector.extract_strided_slice %104 {offsets = [0, 2], sizes = [8, 1024], strides = [1, 1]} : vector<8x1090xf32> to vector<8x1024xf32>
    %c0_i32_26 = arith.constant 0 : i32
    %113 = arith.sitofp %c0_i32_26 : i32 to f32
    %114 = vector.shape_cast %6 : vector<1x1024xi1> to vector<1x1024xi1>
    %115 = vector.broadcast %114 : vector<1x1024xi1> to vector<8x1024xi1>
    %116 = vector.broadcast %113 : f32 to vector<8x1024xf32>
    %117 = arith.select %115, %112, %116 : vector<8x1024xi1>, vector<8x1024xf32>
    %118 = vector.extract_strided_slice %104 {offsets = [0, 32], sizes = [8, 1024], strides = [1, 1]} : vector<8x1090xf32> to vector<8x1024xf32>
    %c0_i32_27 = arith.constant 0 : i32
    %119 = arith.sitofp %c0_i32_27 : i32 to f32
    %120 = vector.shape_cast %4 : vector<1x1024xi1> to vector<1x1024xi1>
    %121 = vector.broadcast %120 : vector<1x1024xi1> to vector<8x1024xi1>
    %122 = vector.broadcast %119 : f32 to vector<8x1024xf32>
    %123 = arith.select %121, %118, %122 : vector<8x1024xi1>, vector<8x1024xf32>
    %124 = vector.extract_strided_slice %104 {offsets = [0, 33], sizes = [8, 1024], strides = [1, 1]} : vector<8x1090xf32> to vector<8x1024xf32>
    %125 = vector.extract_strided_slice %104 {offsets = [0, 34], sizes = [8, 1024], strides = [1, 1]} : vector<8x1090xf32> to vector<8x1024xf32>
    %c0_i32_28 = arith.constant 0 : i32
    %126 = arith.sitofp %c0_i32_28 : i32 to f32
    %127 = vector.shape_cast %6 : vector<1x1024xi1> to vector<1x1024xi1>
    %128 = vector.broadcast %127 : vector<1x1024xi1> to vector<8x1024xi1>
    %129 = vector.broadcast %126 : f32 to vector<8x1024xf32>
    %130 = arith.select %128, %125, %129 : vector<8x1024xi1>, vector<8x1024xf32>
    %131 = vector.extract_strided_slice %104 {offsets = [0, 64], sizes = [8, 1024], strides = [1, 1]} : vector<8x1090xf32> to vector<8x1024xf32>
    %c0_i32_29 = arith.constant 0 : i32
    %132 = arith.sitofp %c0_i32_29 : i32 to f32
    %133 = vector.shape_cast %4 : vector<1x1024xi1> to vector<1x1024xi1>
    %134 = vector.broadcast %133 : vector<1x1024xi1> to vector<8x1024xi1>
    %135 = vector.broadcast %132 : f32 to vector<8x1024xf32>
    %136 = arith.select %134, %131, %135 : vector<8x1024xi1>, vector<8x1024xf32>
    %137 = vector.extract_strided_slice %104 {offsets = [0, 65], sizes = [8, 1024], strides = [1, 1]} : vector<8x1090xf32> to vector<8x1024xf32>
    %138 = vector.extract_strided_slice %104 {offsets = [0, 66], sizes = [8, 1024], strides = [1, 1]} : vector<8x1090xf32> to vector<8x1024xf32>
    %c0_i32_30 = arith.constant 0 : i32
    %139 = arith.sitofp %c0_i32_30 : i32 to f32
    %140 = vector.shape_cast %6 : vector<1x1024xi1> to vector<1x1024xi1>
    %141 = vector.broadcast %140 : vector<1x1024xi1> to vector<8x1024xi1>
    %142 = vector.broadcast %139 : f32 to vector<8x1024xf32>
    %143 = arith.select %141, %138, %142 : vector<8x1024xi1>, vector<8x1024xf32>
    %144 = tpu.concatenate %110, %111, %117, %123, %124, %130, %136, %137, %143 in 0 : vector<8x1024xf32>, vector<8x1024xf32>, vector<8x1024xf32>, vector<8x1024xf32>, vector<8x1024xf32>, vector<8x1024xf32>, vector<8x1024xf32>, vector<8x1024xf32>, vector<8x1024xf32> -> vector<72x1024xf32>
    %c0_31 = arith.constant 0 : index
    %c0_32 = arith.constant 0 : index
    %145 = vector.load %arg5[%c0_31, %c0_32] : memref<8x72xf32, #tpu.memory_space<vmem>>, vector<8x72xf32>
    %cst_33 = arith.constant dense<0.000000e+00> : vector<8x1024xf32>
    %146 = tpu.matmul %145, %144, %cst_33 {dimension_numbers = #tpu.dot_dimension_numbers<[1], [0], [0], [1], [0, 0, 1, 1], [], []>} : vector<8x72xf32>, vector<72x1024xf32>, vector<8x1024xf32> -> vector<8x1024xf32>
    %c0_34 = arith.constant 0 : index
    %c0_35 = arith.constant 0 : index
    %147 = vector.load %arg6[%c0_34, %c0_35] : memref<8x1xf32, #tpu.memory_space<vmem>>, vector<8x1xf32>
    %148 = vector.broadcast %147 : vector<8x1xf32> to vector<8x1024xf32>
    %149 = arith.addf %146, %148 : vector<8x1024xf32>
    %cst_36 = arith.constant 0.000000e+00 : f32
    %150 = vector.broadcast %cst_36 : f32 to vector<8x1024xf32>
    %151 = arith.maximumf %149, %150 : vector<8x1024xf32>
    %c0_37 = arith.constant 0 : index
    %c0_38 = arith.constant 0 : index
    %c0_39 = arith.constant 0 : index
    %152 = vector.load %arg7[%c0_37, %c0_38, %c0_39] : memref<1x8x1024xf32, #tpu.memory_space<vmem>>, vector<1x8x1024xf32>
    %153 = vector.shape_cast %152 : vector<1x8x1024xf32> to vector<8x1024xf32>
    %154 = vector.shape_cast %151 : vector<8x1024xf32> to vector<1x8x1024xf32>
    tpu.vector_store %arg7[%c0_37, %c0_38, %c0_39], %154 {strides = array<i32>} : memref<1x8x1024xf32, #tpu.memory_space<vmem>>, vector<1x8x1024xf32>,
    return
  }
  func.func @transform_0(%arg0: i32) -> (i32, i32, i32) {
    %c0_i32 = arith.constant 0 : i32
    %c0_i32_0 = arith.constant 0 : i32
    %c0_i32_1 = arith.constant 0 : i32
    return %arg0, %c0_i32, %c0_i32_0 : i32, i32, i32
  }
  func.func @transform_1(%arg0: i32) -> (i32, i32, i32) {
    %c0_i32 = arith.constant 0 : i32
    %c0_i32_0 = arith.constant 0 : i32
    %c0_i32_1 = arith.constant 0 : i32
    return %arg0, %c0_i32, %c0_i32_0 : i32, i32, i32
  }
  func.func @transform_2(%arg0: i32) -> (i32, i32) {
    %c0_i32 = arith.constant 0 : i32
    %c0_i32_0 = arith.constant 0 : i32
    %c0_i32_1 = arith.constant 0 : i32
    return %c0_i32, %c0_i32_0 : i32, i32
  }
  func.func @transform_3(%arg0: i32) -> (i32, i32) {
    %c0_i32 = arith.constant 0 : i32
    %c0_i32_0 = arith.constant 0 : i32
    %c0_i32_1 = arith.constant 0 : i32
    return %c0_i32, %c0_i32_0 : i32, i32
  }
  func.func @transform_4(%arg0: i32) -> (i32, i32) {
    %c0_i32 = arith.constant 0 : i32
    %c0_i32_0 = arith.constant 0 : i32
    %c0_i32_1 = arith.constant 0 : i32
    return %c0_i32, %c0_i32_0 : i32, i32
  }
  func.func @transform_5(%arg0: i32) -> (i32, i32) {
    %c0_i32 = arith.constant 0 : i32
    %c0_i32_0 = arith.constant 0 : i32
    %c0_i32_1 = arith.constant 0 : i32
    return %c0_i32, %c0_i32_0 : i32, i32
  }
  func.func @transform_6(%arg0: i32) -> (i32, i32, i32) {
    %c0_i32 = arith.constant 0 : i32
    %c0_i32_0 = arith.constant 0 : i32
    %c0_i32_1 = arith.constant 0 : i32
    return %arg0, %c0_i32, %c0_i32_0 : i32, i32, i32
  }
}

</mosaic_0001>

<bundles_post_ra>
// kernel: tile.8
= control target key start
LH: loop header
LB: loop body
LE: loop exit
PB: predicated region body
PF: predicated region fallthrough
CT: control target
= control target key end

     0   :  { %s22_s0 = inlined_call_operand.vmem [shape: f32[4], index: 0, kind: input, shape index: {}]   ;;  %s23_s1 = inlined_call_operand.vmem [shape: f32[4,4], index: 1, kind: output, shape index: {}]  }
   0x1   :  { %v4_v0 = vld [vmem:[%s22_s0] ss:$0 sm:$0xff] }
   0x2   :  { %5 = vst [vmem:[%s23_s1] sm:$0xf] %v4_v0 }

// kernel: tile.0
= control target key start
LH: loop header
LB: loop body
LE: loop exit
PB: predicated region body
PF: predicated region fallthrough
CT: control target
= control target key end

     0   :  { %s95_s0 = inlined_call_operand.vmem [shape: f32[4,4], index: 0, kind: input, shape index: {}]   ;;  %s96_s1 = inlined_call_operand.hbm [shape: f32[16,1], index: 1, kind: output, shape index: {}]  }
   0x1   :  { %v5_v0 = vld [vmem:[%s95_s0] sm:$0xf] }
   0x2   :  { %6 = vst [vmem:[#allocation2] sm:$0xf] %v5_v0 }
   0x3   :  { %2 = vsyncpa [#allocation1], 0  ;;  %s66_s0 = smov 127   ;;  %s67_s8 = smov 125   ;;  %vm8_vm0 = vcmask 7168  }
   0x4   :  { %s68_s9 = smov 126   ;;  %s69_s10 = smov [#allocation0]  }
   0x5   :  { %s32_s11 = sshll.u32 %s69_s10, 4  ;;  %s33_s11 = int_to_ptr.vmem [resolvable:$true] %s32_s11 }
   0x6   :  { %s42_s12 = scalar_lea.vmem %s33_s11, 256  ;;  %p47_p1 = scmp.lt.s32.totalorder %s33_s11, %s33_s11 }
   0x7   :  { %p43_p0 = scmp.ne.s32.totalorder %s33_s11, %s42_s12  ;;  %p48_p2 = scmp.lt.s32.totalorder %s42_s12, %s42_s12 }
   0x9   :  { %v10_v1 = vld [vmem:[#allocation2] sm:$0xf]   ;;  %p49_p3 = por %p48_p2, %p47_p1 }
   0xa   :  { %v22_v2 = vld [vmem:[#allocation2] sm:$0xf]   ;;  %11 = vrot.lane.b32.xlu0 %v10_v1, %s66_s0 }
   0xb   :  { %23 = vrot.lane.b32.xlu1 %v22_v2, %s67_s8  ;;  %v7_v3 = vld [vmem:[#allocation2] sm:$0xf]   ;;  %p50_p4 = pnand %p49_p3, %p43_p0 }
   0xc   :  { %v16_v4 = vld [vmem:[#allocation2] sm:$0xf]   ;;  %9 = vst.msk [vmem:[#allocation0] ss:$4 sm:$0xf] %vm8_vm0, %v7_v3  }
   0xe   :  { %17 = vrot.lane.b32.xlu0 %v16_v4, %s68_s9 }
  0x7c   :  { %v12_v5 = vpop.permute.xlu0 %11  }
  0x7d   :  { %v24_v6 = vpop.permute.xlu1 %23   ;;  %15 = vst.msk [vmem:[#allocation0 + $0x1] ss:$4 sm:$0xf] %vm8_vm0, %v12_v5  }
  0x7e   :  { %27 = vst.msk [vmem:[#allocation0 + $0x3] ss:$4 sm:$0xf] %vm8_vm0, %v24_v6  }
  0x80   :  { %v18_v7 = vpop.permute.xlu0 %17  }
  0x81   :  { %21 = vst.msk [vmem:[#allocation0 + $0x2] ss:$4 sm:$0xf] %vm8_vm0, %v18_v7  }
  0x82   :  { %53 = shalt.err (!%p50_p4)
}
  0x83   :  { %s54_s15 = scalar_lea.hbm %s96_s1, 256 }
  0x84   :  { %p55_p5 = scmp.ne.s32.totalorder %s96_s1, %s54_s15  ;;  %p58_p6 = scmp.lt.u32.totalorder %s54_s15, %s96_s1 }
  0x86   :  { %p60_p7 = pnand %p58_p6, %p55_p5 }
  0x88   :  { %63 = shalt.err (!%p60_p7)
}
  0x89   :  { %35 = dma.vmem_to_hbm [thread:$0]  %s33_s11, 256, %s96_s1, [#allocation1]  }
  0x8a   :  { %64 = dma.done.wait [#allocation1], 256  }
  0x8b   :  { %65 = vsyncadd [#allocation1], 4294967040 }
  0x8c   :  { %37 = vsyncpa [#allocation1], 1 }

// kernel: unet_up_block_forward.2
= control target key start
LH: loop header
LB: loop body
LE: loop exit
PB: predicated region body
PF: predicated region fallthrough
CT: control target
= control target key end

     0   :  { %8 = vsyncpa [#allocation3], 0  ;;  %s944_s0 = inlined_call_operand.hbm [shape: f32[2,8,256], index: 0, kind: input, shape index: {}]   ;;  %s945_s1 = inlined_call_operand.hbm [shape: f32[16,8], index: 1, kind: input, shape index: {}]   ;;  %s946_s2 = inlined_call_operand.hbm [shape: f32[16,1], index: 2, kind: input, shape index: {}]   ;;  %s947_s3 = inlined_call_operand.hbm [shape: f32[2,16,256], index: 3, kind: output, shape index: {}]  }
   0x1   :  { %10 = vsyncpa [#allocation3 + $0x1], 0 }
   0x2   :  { %11 = vsyncpa [#allocation6], 0 }
   0x3   :  { %12 = vsyncpa [#allocation4], 0 }
   0x4   :  { %14 = vsyncpa [#allocation4 + $0x1], 0  ;;  %s712_s12 = smov 0   ;;  %s714_s13 = smov 0  }
   0x5   :  { %s716_s14 = smov 0   ;;  %s718_s15 = smov 0  }
   0x6 LB: > { %s733_s16 = sadd.s32 4294967295, %s680_s15   ;;  %s426_s17 = sadd.s32 4294967294, %s680_s15   ;;  %s680_s15 = sphi %s718_s15, %s967_s15   ;;  %s676_s14 = sphi %s716_s14, %s966_s14   ;;  %s672_s13 = sphi %s714_s13, %s965_s13   ;;  %s668_s12 = sphi %s712_s12, %s964_s12  }
   0x7   : > { %p40_p0 = scmp.ne.s32.totalorder %s672_s13, %s668_s12  ;;  %p948_p1 = scmp.eq.s32.totalorder %s733_s16, 0 }
   0x8   : > { %p112_p3 = scmp.eq.s32.totalorder %s426_s17, 1  ;;  %p427_p5 = scmp.ge.s32.totalorder %s680_s15, 1 }
   0x9   : > { %p742_p4 = por %p948_p1, %p40_p0  ;;  %p119_p7 = scmp.lt.s32.totalorder %s680_s15, 3 }
   0xa   : > { %p747_p6 = por %p112_p3, %p40_p0  ;;  %s682_s21 = smov [#allocation5]  }
   0xb   : > { %s951_s18 = scalar_select %p742_p4, 1, 0 }
   0xc   : > { %s952_s19 = scalar_select %p747_p6, 1, 0 }
   0xd   : > { %p752_p8 = pnand %p427_p5, %p119_p7  ;;  %s131_s22 = sshll.u32 %s682_s21, 4  ;;  %s756_s22 = int_to_ptr.vmem [resolvable:$true] %s131_s22 }
   0xe   : > { %s683_s24 = smov [#allocation7]   ;;  %s524_s28 = scalar_lea.hbm %s945_s1, 256 }
   0xf   : > { %p462_p9 = pneg %p752_p8  ;;  %s144_s25 = sshll.u32 %s683_s24, 4  ;;  %s767_s25 = int_to_ptr.vmem [resolvable:$true] %s144_s25 }
  0x10   : > { %p525_p12 = scmp.ne.s32.totalorder %s945_s1, %s524_s28  ;;  %p531_p5 = scmp.lt.u32.totalorder %s524_s28, %s945_s1 }
  0x11   : > { %p763_p11 = pnand %p462_p9, %p948_p1 }
  0x13   : > { %p526_p13 = pneg %p763_p11 }
  0x15   : > { %p527_p0 = pnand %p526_p13, %p525_p12 }
  0x17   : > { %p528_p3 = pneg %p527_p0 }
  0x19   : > { %p533_p7 = pnand %p531_p5, %p528_p3 }
  0x1b   : > { %536 = shalt.err (!%p533_p7)
}
  0x1c   : > { %s537_s6 = scalar_lea.vmem %s756_s22, 256  ;;  %p545_p2 = scmp.lt.s32.totalorder %s756_s22, %s756_s22 }
  0x1d   : > { %p538_p9 = scmp.ne.s32.totalorder %s756_s22, %s537_s6  ;;  %p546_p12 = scmp.lt.s32.totalorder %s537_s6, %s537_s6 }
  0x1f   : > { %p540_p10 = pnand %p538_p9, %p526_p13  ;;  %p547_p0 = por %p546_p12, %p545_p2 }
  0x21   : > { %p541_p1 = pneg %p540_p10 }
  0x23   : > { %p548_p6 = pnand %p547_p0, %p541_p1 }
  0x25   : > { %551 = shalt.err (!%p548_p6)
}
  0x26   : > { %s684_s7 = smov 128   ;;  %s685_s8 = smov 8  }
  0x27   : > { %465 = dma.hbm_to_vmem [thread:$0]  (!%p763_p11), %s945_s1, 256, %s756_s22, [#allocation6], %s684_s7, %s684_s7, %s685_s8  }
  0x28   : > { %s552_s21 = scalar_lea.hbm %s946_s2, 256 }
  0x29   : > { %p553_p2 = scmp.ne.s32.totalorder %s946_s2, %s552_s21  ;;  %p559_p10 = scmp.lt.u32.totalorder %s552_s21, %s946_s2 }
  0x2b   : > { %p555_p1 = pnand %p553_p2, %p526_p13 }
  0x2d   : > { %p556_p6 = pneg %p555_p1 }
  0x2f   : > { %p561_p3 = pnand %p559_p10, %p556_p6 }
  0x31   : > { %564 = shalt.err (!%p561_p3)
}
  0x32   : > { %s565_s22 = scalar_lea.vmem %s767_s25, 256  ;;  %p573_p12 = scmp.lt.s32.totalorder %s767_s25, %s767_s25 }
  0x33   : > { %p566_p5 = scmp.ne.s32.totalorder %s767_s25, %s565_s22  ;;  %p574_p0 = scmp.lt.s32.totalorder %s565_s22, %s565_s22 }
  0x35   : > { %p568_p7 = pnand %p566_p5, %p526_p13  ;;  %p575_p2 = por %p574_p0, %p573_p12 }
  0x37   : > { %p569_p9 = pneg %p568_p7 }
  0x39   : > { %p576_p1 = pnand %p575_p2, %p569_p9 }
  0x3b   : > { %579 = shalt.err (!%p576_p1)
}
  0x3c   : > { %468 = dma.hbm_to_vmem [thread:$0]  (!%p763_p11), %s946_s2, 256, %s767_s25, [#allocation6], %s684_s7, %s684_s7, %s685_s8  }
  0x3d   : > { %s822_s4 = sadd.s32 1, %s680_s15   ;;  %s27_s23 = sadd.s32 1, %s676_s14 }
  0x3e   : > { %s24_s5 = ssub.s32 %s680_s15, %s822_s4  ;;  %p34_p13 = scmp.ne.s32.totalorder %s676_s14, %s672_s13 }
  0x3f   : > { %p25_p6 = scmp.eq.s32.totalorder %s24_s5, 0  ;;  %p35_p10 = scmp.eq.s32.totalorder %s680_s15, 0 }
  0x40   : > { %p955_p3 = scmp.eq.s32.totalorder %s733_s16, 1  ;;  %p479_p7 = scmp.lt.s32.totalorder %s680_s15, 2 }
  0x41   : > { %s838_s9 = scalar_select %p25_p6, %s676_s14, %s27_s23  }
  0x42   : > { %p832_p5 = por %p955_p3, %p34_p13  ;;  %p36_p9 = por %p35_p10, %p34_p13 }
  0x43   : > { %s158_s10 = sand.u32 1, %s676_s14   ;;  %s446_s25 = sshll.u32 %s680_s15, 8 }
  0x44   : > { %s956_s6 = scalar_select %p832_p5, 1, 0 }
  0x45   : > { %s431_s11 = sshll.u32 %s158_s10, 4  ;;  %s845_s17 = scalar_lea.hbm %s944_s0, %s446_s25 }
  0x46   : > { %s162_s21 = scalar_lea.vmem [#allocation2], %s431_s11  ;;  %p849_p11 = pnand %p479_p7, %p36_p9 }
  0x47   : > { %s170_s24 = sshll.u32 %s162_s21, 4  ;;  %s159_s27 = scalar_lea.sflag [#allocation3], %s158_s10  ;;  %s847_s24 = int_to_ptr.vmem [resolvable:$true] %s170_s24 }
  0x48   : > { %s580_s28 = scalar_lea.hbm %s845_s17, 256  ;;  %p582_p0 = pneg %p849_p11 }
  0x49   : > { %p581_p12 = scmp.ne.s32.totalorder %s845_s17, %s580_s28  ;;  %s585_s30 = scalar_lea.hbm %s944_s0, 512 }
  0x4a   : > { %p586_p13 = scmp.lt.u32.totalorder %s845_s17, %s944_s0  ;;  %p587_p6 = scmp.lt.u32.totalorder %s585_s30, %s580_s28 }
  0x4b   : > { %p583_p2 = pnand %p582_p0, %p581_p12  ;;  %p589_p3 = scmp.lt.u32.totalorder %s580_s28, %s845_s17 }
  0x4c   : > { %p588_p10 = por %p587_p6, %p586_p13 }
  0x4d   : > { %p584_p1 = pneg %p583_p2 }
  0x4e   : > { %p590_p7 = por %p589_p3, %p588_p10 }
  0x50   : > { %p591_p9 = pnand %p590_p7, %p584_p1 }
  0x52   : > { %594 = shalt.err (!%p591_p9)
}
  0x53   : > { %s595_s10 = scalar_lea.vmem %s847_s24, 256  ;;  %s686_s11 = smov [#allocation2]  }
  0x54   : > { %p596_p12 = scmp.ne.s32.totalorder %s847_s24, %s595_s10  ;;  %s600_s25 = sshll.u32 %s686_s11, 4  ;;  %s601_s25 = int_to_ptr.vmem [resolvable:$false] %s600_s25 }
  0x55   : > { %s602_s7 = scalar_lea.vmem %s601_s25, 512  ;;  %p603_p4 = scmp.lt.s32.totalorder %s847_s24, %s601_s25 }
  0x56   : > { %p598_p2 = pnand %p596_p12, %p582_p0  ;;  %p604_p13 = scmp.lt.s32.totalorder %s602_s7, %s595_s10 }
  0x58   : > { %p599_p5 = pneg %p598_p2  ;;  %p605_p6 = por %p604_p13, %p603_p4 }
  0x5a   : > { %p606_p10 = pnand %p605_p6, %p599_p5 }
  0x5c   : > { %609 = shalt.err (!%p606_p10)
}
  0x5d   : > { %472 = dma.hbm_to_vmem [thread:$0]  (!%p849_p11), %s845_s17, 256, %s847_s24, %s159_s27  }
  0x5e   : > { %179 = sbr.rel (%p752_p8) target bundleno = 340 (0x154), region = 32  ;;  %s881_s8 = sand.u32 (!%p752_p8), 1, %s672_s13  }
  0x5f   : > { %s435_s21 = sshll.u32 (!%p752_p8), %s881_s8, 4  ;;  %s182_s28 = scalar_lea.sflag (!%p752_p8), [#allocation3], %s881_s8 }
  0x60   : > { %s185_s22 = scalar_lea.vmem (!%p752_p8), [#allocation2], %s435_s21  ;;  %p958_p4 = scmp.ne.s32.totalorder (!%p752_p8), %s951_s18, 0 }
  0x65   : > { %655 = dma.done.wait (%p958_p4), %s182_s28, 256  }
  0x66   : > { %657 = vsyncadd (%p958_p4), %s182_s28, 4294967040  ;;  %p959_p5 = scmp.eq.s32.totalorder %s733_s16, 0 }
  0x68   : > { %659 = dma.done.wait (%p959_p5), [#allocation6], 512   ;;  %p960_p11 = pmov %p959_p5 }
  0x69   : > { %v687_v0 = vmov 0.0   ;;  %v688_v1 = vmov 0   ;;  %v217_v2 = vld [vmem:[%s185_s22 + $0x8] sm:$0xff]  ;;  %v216_v3 = vld [vmem:[%s185_s22] sm:$0xff]  ;;  %vm232_vm0 = vcmask 64512   ;;  %s438_s18 = sshll.u32 %s881_s8, 5 }
  0x6a   : > { %661 = vsyncadd (%p960_p11), [#allocation6], 4294966784  ;;  %303 = vmatprep.mubr.f32.mxu0 %v687_v0  ;;  %309 = vmatprep.mubr.f32.mxu1 %v687_v0  ;;  %v218_v4 = vld [vmem:[#allocation5] sm:$0xff]  ;;  %v219_v5 = vld [vmem:[#allocation5 + $0x8] sm:$0xff]  ;;  %s215_s20 = scalar_lea.vmem [#allocation8], %s438_s18  ;;  %s447_s24 = sshll.u32 %s733_s16, 9 }
  0x6b   : > { %523 = vset.pattern.permute.xlu0 %v688_v1  ;;  %239 = vmatprep.subr.mxu0 %v217_v2  ;;  %v220_v6 = vld [vmem:[#allocation7] sm:$0xff]  ;;  %v221_v7 = vld [vmem:[#allocation7 + $0x8] sm:$0xff]  ;;  %s334_s17 = sshll.u32 %s215_s20, 4  ;;  %s900_s29 = scalar_lea.hbm %s947_s3, %s447_s24  ;;  %s895_s17 = int_to_ptr.vmem [resolvable:$true] %s334_s17 }
  0x6c   : > { %448 = vmatprep.subr.mxu1 %v217_v2  ;;  %240 = vmatpush1.msra.mxu0 %v216_v3  ;;  %s321_s16 = scalar_lea.sflag [#allocation4], %s881_s8  ;;  %s610_s30 = scalar_lea.vmem %s895_s17, 512 }
  0x6d   : > { %449 = vmatpush1.msra.mxu1 %v216_v3  ;;  %439 = vmatmul.mubr.msk.f32.vlgmr.msra.gmra.mrb[0].mxu0 %vm232_vm0, %v218_v4  ;;  %p611_p8 = scmp.ne.s32.totalorder %s895_s17, %s610_s30  ;;  %p961_p0 = scmp.ne.s32.totalorder %s956_s6, 0 }
  0x6e   : > { %440 = vmatmul.mubr.msk.f32.vlgmr.msra.gmra.mrb[0].mxu1 %vm232_vm0, %v219_v5  ;;  %224 = vperm.xlu0 %523, %v220_v6   ;;  %s689_s23 = smov [#allocation8]  }
  0x6f   : > { %p612_p1 = pnand %p611_p8, %p961_p0  ;;  %s614_s5 = sshll.u32 %s689_s23, 4  ;;  %s615_s5 = int_to_ptr.vmem [resolvable:$false] %s614_s5 }
  0x70   : > { %s616_s10 = scalar_lea.vmem %s615_s5, 1024  ;;  %p617_p7 = scmp.lt.s32.totalorder %s895_s17, %s615_s5 }
  0x71   : > { %p613_p3 = pneg %p612_p1  ;;  %p618_p9 = scmp.lt.s32.totalorder %s616_s10, %s610_s30 }
  0x72   : > { %229 = vperm.xlu0 %523, %v221_v7  }
  0x73   : > { %p619_p12 = por %p618_p9, %p617_p7 }
  0x75   : > { %p620_p2 = pnand %p619_p12, %p613_p3 }
  0xed   : > { %v225_v8 = vpop.permute.xlu0 %224 }
  0xf1   : > { %v230_v9 = vpop.permute.xlu0 %229 }
 0x140   : > { %v305_v10 = vpop.f32.mrb[0].mxu0 }
 0x141   : > { %v311_v11 = vpop.f32.mrb[0].mxu1  ;;  %v306_v12 = vadd.f32 %v305_v10, %v225_v8  ;;  %v307_v14 = vpop.f32.mrb[1].mxu0 }
 0x142   : > { %v312_v13 = vadd.f32 %v311_v11, %v230_v9  ;;  %v313_v15 = vpop.f32.mrb[1].mxu1  ;;  %v308_v16 = vadd.f32 %v307_v14, %v225_v8 }
 0x143   : > { %v314_v17 = vadd.f32 %v313_v15, %v230_v9  ;;  %316 = vst [vmem:[%s215_s20] sm:$0xff] %v306_v12 }
 0x144   : > { %318 = vst [vmem:[%s215_s20 + $0x10] sm:$0xff] %v312_v13  ;;  %317 = vst [vmem:[%s215_s20 + $0x8] sm:$0xff] %v308_v16 }
 0x145   : > { %319 = vst [vmem:[%s215_s20 + $0x18] sm:$0xff] %v314_v17 }
 0x146   : > { %623 = shalt.err (!%p620_p2)
}
 0x147   : > { %s624_s11 = scalar_lea.hbm %s900_s29, 512  ;;  %s628_s21 = scalar_lea.hbm %s947_s3, 1024 }
 0x148   : > { %p625_p13 = scmp.ne.s32.totalorder %s900_s29, %s624_s11  ;;  %p629_p4 = scmp.lt.u32.totalorder %s900_s29, %s947_s3 }
 0x149   : > { %p630_p5 = scmp.lt.u32.totalorder %s628_s21, %s624_s11  ;;  %p632_p8 = scmp.lt.u32.totalorder %s624_s11, %s900_s29 }
 0x14a   : > { %p626_p6 = pnand %p625_p13, %p961_p0 }
 0x14b   : > { %p631_p11 = por %p630_p5, %p629_p4 }
 0x14c   : > { %p627_p10 = pneg %p626_p6 }
 0x14d   : > { %p633_p1 = por %p632_p8, %p631_p11 }
 0x14f   : > { %p634_p3 = pnand %p633_p1, %p627_p10 }
 0x151   : > { %637 = shalt.err (!%p634_p3)
}
 0x152   : > { %s690_s18 = smov 256   ;;  %s691_s20 = smov 16  }
 0x153   : > { %460 = dma.vmem_to_hbm [thread:$0]  (%p961_p0), %s895_s17, 512, %s900_s29, %s321_s16, %s690_s18, %s690_s18, %s691_s20  }
 0x154 PF: > { %s349_s24 = sand.u32 1, %s668_s12   ;;  %p962_p7 = scmp.ne.s32.totalorder %s952_s19, 0 }
 0x155   : > { %p963_p9 = scmp.ge.s32.totalorder %s680_s15, 2  ;;  %s350_s26 = scalar_lea.sflag [#allocation4], %s349_s24 }
 0x157   : > { %p474_p12 = pnand %p963_p9, %p962_p7 }
 0x159   : > { %663 = dma.done.wait (!%p474_p12), %s350_s26, 512  }
 0x15a   : > { %665 = vsyncadd (!%p474_p12), %s350_s26, 4294966784  ;;  %p17_p2 = scmp.ge.s32.totalorder %s822_s4, 4   ;;  %s964_s12 = smov %s672_s13 }
 0x15b   : > { %s965_s13 = smov %s676_s14  ;;  %s966_s14 = smov %s838_s9 }
 0x15c   : > { %s967_s15 = smov %s822_s4  ;;  %19 = sbr.rel (!%p17_p2) target bundleno = 6 (0x6), region = 85 }
 0x163   :  { %355 = vsyncpa [#allocation3], 1 }
 0x164   :  { %357 = vsyncpa [#allocation3 + $0x1], 1 }
 0x165   :  { %358 = vsyncpa [#allocation6], 1 }
 0x166   :  { %359 = vsyncpa [#allocation4], 1 }
 0x167   :  { %361 = vsyncpa [#allocation4 + $0x1], 1 }

// kernel: unet_up_block_forward.3
= control target key start
LH: loop header
LB: loop body
LE: loop exit
PB: predicated region body
PF: predicated region fallthrough
CT: control target
= control target key end

     0   :  { %s6160_s0 = inlined_call_operand.hbm [shape: f32[2,4,1024], index: 0, kind: input, shape index: {}]   ;;  %s6161_s1 = inlined_call_operand.hbm [shape: f32[2,4,1024], index: 1, kind: input, shape index: {}]   ;;  %s6162_s2 = inlined_call_operand.hbm [shape: f32[8,72], index: 2, kind: input, shape index: {}]   ;;  %s6163_s3 = inlined_call_operand.hbm [shape: f32[8,1], index: 3, kind: input, shape index: {}]   ;;  %s6164_s4 = inlined_call_operand.hbm [shape: f32[8,72], index: 4, kind: input, shape index: {}]   ;;  %s6165_s5 = inlined_call_operand.hbm [shape: f32[8,1], index: 5, kind: input, shape index: {}]   ;;  %s6166_s6 = inlined_call_operand.hbm [shape: f32[2,8,1024], index: 6, kind: output, shape index: {}]  }
   0x1   :  { %6287 = sst [smem:[#allocation62_spill]] %s6162_s2 }
   0x2   :  { %6288 = sst [smem:[#allocation63_spill]] %s6163_s3 }
   0x3   :  { %6289 = sst [smem:[#allocation64_spill]] %s6164_s4 }
   0x4   :  { %11 = vsyncpa [#allocation3], 0 }
   0x5   :  { %13 = vsyncpa [#allocation3 + $0x1], 0 }
   0x6   :  { %14 = vsyncpa [#allocation6], 0 }
   0x7   :  { %16 = vsyncpa [#allocation6 + $0x1], 0 }
   0x8   :  { %17 = vsyncpa [#allocation9], 0 }
   0x9   :  { %18 = vsyncpa [#allocation12], 0 }
   0xa   :  { %19 = vsyncpa [#allocation4], 0 }
   0xb   :  { %21 = vsyncpa [#allocation4 + $0x1], 0  ;;  %s3790_s21 = smov 0   ;;  %s3792_s22 = smov 0  }
   0xc   :  { %s3794_s23 = smov 0   ;;  %s3796_s24 = smov 0  }
   0xd LB: > { %s3736_s25 = smov [#allocation7]   ;;  %s3811_s27 = sadd.s32 4294967295, %s3734_s24   ;;  %s3734_s24 = sphi %s3796_s24, %s6823_s24   ;;  %s3730_s23 = sphi %s3794_s23, %s6822_s23   ;;  %s3726_s22 = sphi %s3792_s22, %s6821_s22   ;;  %s3722_s21 = sphi %s3790_s21, %s6820_s21  }
   0xe   : > { %s207_s26 = sshll.u32 %s3736_s25, 4  ;;  %p2677_p0 = scmp.ge.s32.totalorder %s3734_s24, 1  ;;  %s3816_s26 = int_to_ptr.vmem [resolvable:$true] %s207_s26 }
   0xf   : > { %p6167_p1 = scmp.eq.s32.totalorder %s3811_s27, 0  ;;  %p194_p2 = scmp.lt.s32.totalorder %s3734_s24, 3 }
  0x10   : > { %s3737_s29 = smov [#allocation8]   ;;  %s3738_s7 = smov [#allocation10]  }
  0x11   : > { %p3818_p3 = pnand %p2677_p0, %p194_p2  ;;  %s218_s30 = sshll.u32 %s3737_s29, 4  ;;  %s3825_s30 = int_to_ptr.vmem [resolvable:$true] %s218_s30 }
  0x12   : > { %s229_s8 = sshll.u32 %s3738_s7, 4  ;;  %s3739_s10 = smov [#allocation11]   ;;  %s3833_s8 = int_to_ptr.vmem [resolvable:$true] %s229_s8 }
  0x13   : > { %s6290_s28 = scalar_select %p3818_p3, 1, 0 }
  0x14   : > { %p2943_p5 = pneg %p3818_p3  ;;  %s3835_s11 = sshll.u32 %s3739_s10, 4  ;;  %s241_s11 = int_to_ptr.vmem [resolvable:$true] %s3835_s11 }
  0x15   : > { %s6292_s2 = sld [smem:[#allocation62_spill]] }
  0x16   : > { %p3829_p6 = pnand %p2943_p5, %p6167_p1 }
  0x18   : > { %p3845_p8 = pneg %p3829_p6 }
  0x1b   : > { %s3480_s14 = scalar_lea.hbm %s6292_s2, 128 }
  0x1c   : > { %p3481_p7 = scmp.ne.s32.totalorder %s6292_s2, %s3480_s14  ;;  %p3487_p11 = scmp.lt.u32.totalorder %s3480_s14, %s6292_s2 }
  0x1e   : > { %p3483_p9 = pnand %p3845_p8, %p3481_p7 }
  0x20   : > { %p3484_p10 = pneg %p3483_p9 }
  0x22   : > { %p3489_p12 = pnand %p3487_p11, %p3484_p10 }
  0x24   : > { %3492 = shalt.err (!%p3489_p12)
}
  0x25   : > { %s3493_s20 = scalar_lea.vmem %s3816_s26, 128  ;;  %p3501_p5 = scmp.lt.s32.totalorder %s3816_s26, %s3816_s26 }
  0x26   : > { %p3494_p13 = scmp.ne.s32.totalorder %s3816_s26, %s3493_s20  ;;  %p3502_p4 = scmp.lt.s32.totalorder %s3493_s20, %s3493_s20 }
  0x28   : > { %p3496_p0 = pnand %p3494_p13, %p3845_p8  ;;  %p3503_p7 = por %p3502_p4, %p3501_p5 }
  0x2a   : > { %p3497_p2 = pneg %p3496_p0 }
  0x2c   : > { %p3504_p9 = pnand %p3503_p7, %p3497_p2 }
  0x2e   : > { %3507 = shalt.err (!%p3504_p9)
}
  0x2f   : > { %2946 = dma.hbm_to_vmem [thread:$0]  (!%p3829_p6), %s6292_s2, 128, %s3816_s26, [#allocation6]  }
  0x30   : > { %s6294_s3 = sld [smem:[#allocation63_spill]] }
  0x36   : > { %s3508_s12 = scalar_lea.hbm %s6294_s3, 128 }
  0x37   : > { %p3509_p10 = scmp.ne.s32.totalorder %s6294_s3, %s3508_s12  ;;  %p3515_p12 = scmp.lt.u32.totalorder %s3508_s12, %s6294_s3 }
  0x39   : > { %p3511_p4 = pnand %p3509_p10, %p3845_p8 }
  0x3b   : > { %p3512_p11 = pneg %p3511_p4 }
  0x3d   : > { %p3517_p13 = pnand %p3515_p12, %p3512_p11 }
  0x3f   : > { %3520 = shalt.err (!%p3517_p13)
}
  0x40   : > { %s3521_s26 = scalar_lea.vmem %s3825_s30, 128  ;;  %p3529_p7 = scmp.lt.s32.totalorder %s3825_s30, %s3825_s30 }
  0x41   : > { %p3522_p0 = scmp.ne.s32.totalorder %s3825_s30, %s3521_s26  ;;  %p3530_p9 = scmp.lt.s32.totalorder %s3521_s26, %s3521_s26 }
  0x43   : > { %p3524_p2 = pnand %p3522_p0, %p3845_p8  ;;  %p3531_p10 = por %p3530_p9, %p3529_p7 }
  0x45   : > { %p3525_p5 = pneg %p3524_p2 }
  0x47   : > { %p3532_p4 = pnand %p3531_p10, %p3525_p5 }
  0x49   : > { %3535 = shalt.err (!%p3532_p4)
}
  0x4a   : > { %2949 = dma.hbm_to_vmem [thread:$0]  (!%p3829_p6), %s6294_s3, 128, %s3825_s30, [#allocation9]  }
  0x4b   : > { %s6295_s4 = sld [smem:[#allocation64_spill]] }
  0x51   : > { %s3536_s29 = scalar_lea.hbm %s6295_s4, 128 }
  0x52   : > { %p3537_p11 = scmp.ne.s32.totalorder %s6295_s4, %s3536_s29  ;;  %p3543_p0 = scmp.lt.u32.totalorder %s3536_s29, %s6295_s4 }
  0x54   : > { %p3539_p12 = pnand %p3537_p11, %p3845_p8 }
  0x56   : > { %p3540_p13 = pneg %p3539_p12 }
  0x58   : > { %p3545_p2 = pnand %p3543_p0, %p3540_p13 }
  0x5a   : > { %3548 = shalt.err (!%p3545_p2)
}
  0x5b   : > { %s3549_s30 = scalar_lea.vmem %s3833_s8, 128  ;;  %p3557_p10 = scmp.lt.s32.totalorder %s3833_s8, %s3833_s8 }
  0x5c   : > { %p3550_p5 = scmp.ne.s32.totalorder %s3833_s8, %s3549_s30  ;;  %p3558_p4 = scmp.lt.s32.totalorder %s3549_s30, %s3549_s30 }
  0x5e   : > { %p3552_p7 = pnand %p3550_p5, %p3845_p8  ;;  %p3559_p11 = por %p3558_p4, %p3557_p10 }
  0x60   : > { %p3553_p9 = pneg %p3552_p7 }
  0x62   : > { %p3560_p12 = pnand %p3559_p11, %p3553_p9 }
  0x64   : > { %3563 = shalt.err (!%p3560_p12)
}
  0x65   : > { %2952 = dma.hbm_to_vmem [thread:$0]  (!%p3829_p6), %s6295_s4, 128, %s3833_s8, [#allocation9]  }
  0x66   : > { %s3564_s18 = scalar_lea.hbm %s6165_s5, 128 }
  0x67   : > { %p3565_p13 = scmp.ne.s32.totalorder %s6165_s5, %s3564_s18  ;;  %p3571_p5 = scmp.lt.u32.totalorder %s3564_s18, %s6165_s5 }
  0x69   : > { %p3567_p0 = pnand %p3565_p13, %p3845_p8 }
  0x6b   : > { %p3568_p2 = pneg %p3567_p0 }
  0x6d   : > { %p3573_p7 = pnand %p3571_p5, %p3568_p2 }
  0x6f   : > { %3576 = shalt.err (!%p3573_p7)
}
  0x70   : > { %s3577_s7 = scalar_lea.vmem %s241_s11, 128  ;;  %p3585_p11 = scmp.lt.s32.totalorder %s241_s11, %s241_s11 }
  0x71   : > { %p3578_p9 = scmp.ne.s32.totalorder %s241_s11, %s3577_s7  ;;  %p3586_p12 = scmp.lt.s32.totalorder %s3577_s7, %s3577_s7 }
  0x73   : > { %p3580_p10 = pnand %p3578_p9, %p3845_p8  ;;  %p3587_p1 = por %p3586_p12, %p3585_p11 }
  0x75   : > { %p3581_p4 = pneg %p3580_p10 }
  0x77   : > { %p3588_p3 = pnand %p3587_p1, %p3581_p4 }
  0x79   : > { %3591 = shalt.err (!%p3588_p3)
}
  0x7a   : > { %2955 = dma.hbm_to_vmem [thread:$0]  (!%p3829_p6), %s6165_s5, 128, %s241_s11, [#allocation12]  }
  0x7b   : > { %s2676_s17 = sadd.s32 4294967294, %s3734_s24   ;;  %s3933_s9 = sadd.s32 1, %s3734_s24  }
  0x7c   : > { %s31_s12 = ssub.s32 %s3734_s24, %s3933_s9  ;;  %s34_s13 = sadd.s32 1, %s3730_s23 }
  0x7d   : > { %p32_p1 = scmp.eq.s32.totalorder %s31_s12, 0  ;;  %p41_p3 = scmp.ne.s32.totalorder %s3730_s23, %s3726_s22 }
  0x7e   : > { %p42_p8 = scmp.eq.s32.totalorder %s3734_s24, 0  ;;  %p47_p13 = scmp.ne.s32.totalorder %s3726_s22, %s3722_s21 }
  0x7f   : > { %s3944_s30 = scalar_select %p32_p1, %s3730_s23, %s34_s13  }
  0x80   : > { %p3946_p0 = por %p42_p8, %p41_p3  ;;  %p6297_p2 = scmp.eq.s32.totalorder %s3811_s27, 0 }
  0x81   : > { %p181_p5 = scmp.eq.s32.totalorder %s3811_s27, 1  ;;  %p187_p7 = scmp.eq.s32.totalorder %s2676_s17, 1 }
  0x82   : > { %p3952_p6 = por %p6297_p2, %p47_p13  ;;  %p2971_p9 = scmp.lt.s32.totalorder %s3734_s24, 2 }
  0x83   : > { %s251_s15 = sand.u32 1, %s3730_s23   ;;  %p3959_p10 = por %p181_p5, %p41_p3 }
  0x84   : > { %s6298_s11 = scalar_select %p3952_p6, 1, 0 }
  0x85   : > { %s6299_s16 = scalar_select %p3959_p10, 1, 0 }
  0x86   : > { %p3963_p4 = por %p187_p7, %p47_p13  ;;  %s3967_s18 = sshll.u32 %s251_s15, 5 }
  0x87   : > { %s2758_s19 = sshll.u32 %s3734_s24, 9  ;;  %s255_s7 = scalar_lea.vmem [#allocation2], %s3967_s18 }
  0x88   : > { %s6300_s26 = scalar_select %p3963_p4, 1, 0 }
  0x89   : > { %s3973_s29 = scalar_lea.hbm %s6160_s0, %s2758_s19  ;;  %s263_s8 = sshll.u32 %s255_s7, 4  ;;  %s3976_s8 = int_to_ptr.vmem [resolvable:$true] %s263_s8 }
  0x8a   : > { %p3980_p11 = pnand %p2971_p9, %p3946_p0  ;;  %s3987_s13 = scalar_lea.hbm %s6161_s1, %s2758_s19 }
  0x8b   : > { %s270_s20 = sand.u32 1, %s3734_s24   ;;  %s252_s25 = scalar_lea.sflag [#allocation3], %s251_s15 }
  0x8c   : > { %s3592_s2 = scalar_lea.hbm %s3973_s29, 512  ;;  %p3594_p1 = pneg %p3980_p11 }
  0x8d   : > { %p3593_p12 = scmp.ne.s32.totalorder %s3973_s29, %s3592_s2  ;;  %s3597_s3 = scalar_lea.hbm %s6160_s0, 1024 }
  0x8e   : > { %p3598_p13 = scmp.lt.u32.totalorder %s3973_s29, %s6160_s0  ;;  %p3599_p0 = scmp.lt.u32.totalorder %s3597_s3, %s3592_s2 }
  0x8f   : > { %p3595_p3 = pnand %p3594_p1, %p3593_p12  ;;  %p3601_p5 = scmp.lt.u32.totalorder %s3592_s2, %s3973_s29 }
  0x90   : > { %p3600_p2 = por %p3599_p0, %p3598_p13 }
  0x91   : > { %p3596_p8 = pneg %p3595_p3 }
  0x92   : > { %p3602_p7 = por %p3601_p5, %p3600_p2 }
  0x94   : > { %p3603_p9 = pnand %p3602_p7, %p3596_p8 }
  0x96   : > { %3606 = shalt.err (!%p3603_p9)
}
  0x97   : > { %s3607_s15 = scalar_lea.vmem %s3976_s8, 512  ;;  %s3740_s19 = smov [#allocation2]  }
  0x98   : > { %p3608_p12 = scmp.ne.s32.totalorder %s3976_s8, %s3607_s15  ;;  %s3612_s12 = sshll.u32 %s3740_s19, 4  ;;  %s3613_s12 = int_to_ptr.vmem [resolvable:$false] %s3612_s12 }
  0x99   : > { %s3614_s4 = scalar_lea.vmem %s3613_s12, 1024  ;;  %p3615_p10 = scmp.lt.s32.totalorder %s3976_s8, %s3613_s12 }
  0x9a   : > { %p3610_p3 = pnand %p3608_p12, %p3594_p1  ;;  %p3616_p13 = scmp.lt.s32.totalorder %s3614_s4, %s3607_s15 }
  0x9c   : > { %p3611_p4 = pneg %p3610_p3  ;;  %p3617_p0 = por %p3616_p13, %p3615_p10 }
  0x9e   : > { %p3618_p2 = pnand %p3617_p0, %p3611_p4 }
  0xa0   : > { %3621 = shalt.err (!%p3618_p2)
}
  0xa1   : > { %2959 = dma.hbm_to_vmem [thread:$0]  (!%p3980_p11), %s3973_s29, 512, %s3976_s8, %s252_s25  }
  0xa2   : > { %s274_s2 = scalar_lea.vmem [#allocation5], %s3967_s18  ;;  %s271_s14 = scalar_lea.sflag [#allocation6], %s270_s20 }
  0xa3   : > { %s282_s3 = sshll.u32 %s274_s2, 4  ;;  %s3622_s7 = scalar_lea.hbm %s3987_s13, 512  ;;  %s283_s3 = int_to_ptr.vmem [resolvable:$true] %s282_s3 }
  0xa4   : > { %p3623_p10 = scmp.ne.s32.totalorder %s3987_s13, %s3622_s7  ;;  %s3627_s19 = scalar_lea.hbm %s6161_s1, 1024 }
  0xa5   : > { %p3628_p5 = scmp.lt.u32.totalorder %s3987_s13, %s6161_s1  ;;  %p3629_p7 = scmp.lt.u32.totalorder %s3627_s19, %s3622_s7 }
  0xa6   : > { %p3625_p4 = pnand %p3623_p10, %p3594_p1  ;;  %p3631_p12 = scmp.lt.u32.totalorder %s3622_s7, %s3987_s13 }
  0xa7   : > { %p3630_p9 = por %p3629_p7, %p3628_p5 }
  0xa8   : > { %p3626_p8 = pneg %p3625_p4 }
  0xa9   : > { %p3632_p3 = por %p3631_p12, %p3630_p9 }
  0xab   : > { %p3633_p13 = pnand %p3632_p3, %p3626_p8 }
  0xad   : > { %3636 = shalt.err (!%p3633_p13)
}
  0xae   : > { %s3637_s18 = scalar_lea.vmem %s283_s3, 512  ;;  %s3741_s29 = smov [#allocation5]  }
  0xaf   : > { %p3638_p0 = scmp.ne.s32.totalorder %s283_s3, %s3637_s18  ;;  %s3642_s8 = sshll.u32 %s3741_s29, 4  ;;  %s3643_s8 = int_to_ptr.vmem [resolvable:$false] %s3642_s8 }
  0xb0   : > { %s3644_s20 = scalar_lea.vmem %s3643_s8, 1024  ;;  %p3645_p4 = scmp.lt.s32.totalorder %s283_s3, %s3643_s8 }
  0xb1   : > { %p3640_p2 = pnand %p3638_p0, %p3594_p1  ;;  %p3646_p6 = scmp.lt.s32.totalorder %s3644_s20, %s3637_s18 }
  0xb3   : > { %p3641_p10 = pneg %p3640_p2  ;;  %p3647_p5 = por %p3646_p6, %p3645_p4 }
  0xb5   : > { %p3648_p7 = pnand %p3647_p5, %p3641_p10 }
  0xb7   : > { %3651 = shalt.err (!%p3648_p7)
}
  0xb8   : > { %2962 = dma.hbm_to_vmem [thread:$0]  (!%p3980_p11), %s3987_s13, 512, %s283_s3, %s271_s14  }
  0xb9   : > { %p6302_p8 = scmp.ne.s32.totalorder %s6290_s28, 0 }
  0xbb   : > { %291 = sbr.rel (%p6302_p8) target bundleno = 1382 (0x566), region = 44 }
  0xc2   : > { %s4040_s25 = sand.u32 1, %s3726_s22   ;;  %p6303_p1 = scmp.ne.s32.totalorder %s6298_s11, 0 }
  0xc3   : > { %s2690_s2 = sshll.u32 %s4040_s25, 5  ;;  %s294_s7 = scalar_lea.sflag [#allocation3], %s4040_s25 }
  0xc4   : > { %s297_s17 = scalar_lea.vmem [#allocation2], %s2690_s2 }
  0xc5   : > { %3697 = dma.done.wait (%p6303_p1), %s294_s7, 512  }
  0xc6   : > { %3699 = vsyncadd (%p6303_p1), %s294_s7, 4294966784  ;;  %s302_s10 = sand.u32 1, %s3811_s27   ;;  %s4049_s28 = scalar_lea.vmem [#allocation5], %s2690_s2 }
  0xc7   : > { %s303_s13 = scalar_lea.sflag [#allocation6], %s302_s10 }
  0xc8   : > { %3701 = dma.done.wait (%p6303_p1), %s303_s13, 512  }
  0xc9   : > { %3703 = vsyncadd (%p6303_p1), %s303_s13, 4294966784  ;;  %p6304_p6 = scmp.eq.s32.totalorder %s3811_s27, 0 }
  0xcb   : > { %3705 = dma.done.wait (%p6304_p6), [#allocation6], 128   ;;  %p6305_p11 = pmov %p6304_p6 }
  0xcc   : > { %p6306_p9 = pmov %p6304_p6 }
  0xcd   : > { %3707 = vsyncadd (%p6305_p11), [#allocation6], 4294967168 }
  0xce   : > { %3709 = dma.done.wait (%p6306_p9), [#allocation9], 256   ;;  %p6307_p12 = pmov %p6304_p6 }
  0xcf   : > { %p6308_p3 = pmov %p6304_p6 }
  0xd0   : > { %3711 = vsyncadd (%p6307_p12), [#allocation9], 4294967040 }
  0xd1   : > { %3713 = dma.done.wait (%p6308_p3), [#allocation12], 128   ;;  %p6309_p13 = pmov %p6308_p3 }
  0xd2   : > { %v937_v0 = vld [vmem:[%s4049_s28 + $0x8] sm:$0xff]  ;;  %v936_v1 = vld [vmem:[%s4049_s28] sm:$0xff]  ;;  %s3742_s11 = smov 33   ;;  %v439_v5 = vld [vmem:[%s297_s17 + $0x10] sm:$0xff]  ;;  %vm6195_vm0 = vcmask 269312   ;;  %s3743_s3 = smov 64  }
  0xd3   : > { %3715 = vsyncadd (%p6309_p13), [#allocation12], 4294967168  ;;  %v437_v2 = vld [vmem:[%s297_s17] sm:$0xff]  ;;  %952 = vrot.lane.b32.xlu0 %v937_v0, %s3742_s11  ;;  %948 = vrot.lane.b32.xlu1 %v936_v1, %s3742_s11  ;;  %v944_v3 = vcombine.high %v936_v1, %v936_v1  ;;  %v438_v6 = vld [vmem:[%s297_s17 + $0x8] sm:$0xff]  ;;  %v447_v7 = vcombine.high %v439_v5, %v439_v5  ;;  %v945_v14 = vcombine.high %v937_v0, %v937_v0  ;;  %s3744_s14 = smov 62   ;;  %s3745_s15 = smov 96  }
  0xd4   : > { %v445_v4 = vcombine.high %v437_v2, %v437_v2  ;;  %v446_v8 = vcombine.high %v438_v6, %v438_v6  ;;  %v440_v9 = vld [vmem:[%s297_s17 + $0x18] sm:$0xff]  ;;  %v938_v16 = vld [vmem:[%s4049_s28 + $0x10] sm:$0xff]  ;;  %s3746_s19 = smov 126   ;;  %s3747_s12 = smov 94   ;;  %vm6209_vm5 = vcmask 785408   ;;  %vm6203_vm9 = vcmask 769024  }
  0xd5   : > { %v3035_v11 = vpack.i.bf16 %v447_v7, %v439_v5  ;;  %v448_v13 = vcombine.high %v440_v9, %v440_v9  ;;  %v946_v17 = vcombine.high %v938_v16, %v938_v16  ;;  %v939_v18 = vld [vmem:[%s4049_s28 + $0x18] sm:$0xff]  ;;  %s3748_s4 = smov 95   ;;  %s3749_s18 = smov 63   ;;  %vm6219_vm11 = vcmask 1031168  }
  0xd6   : > { %v3025_v10 = vpack.i.bf16 %v445_v4, %v437_v2  ;;  %v3030_v12 = vpack.i.bf16 %v446_v8, %v438_v6  ;;  %v947_v19 = vcombine.high %v939_v18, %v939_v18  ;;  %s3750_s29 = smov 127   ;;  %vm6202_vm12 = vcmask 523264   ;;  %s2696_s8 = sshll.u32 %s4040_s25, 6 }
  0xd7   : > { %950 = vrot.lane.b32.xlu1 %v944_v3, %s3742_s11  ;;  %v3040_v15 = vpack.i.bf16 %v448_v13, %v440_v9  ;;  %vm6220_vm13 = vcmask 1043456   ;;  %vm6218_vm14 = vcmask 777216   ;;  %vm6210_vm15 = vcmask 506880   ;;  %s355_s20 = scalar_lea.vmem [#allocation13], %s2696_s8  ;;  %s2760_s2 = sshll.u32 %s3811_s27, 10 }
  0xd8   : > { %3026 = vrot.lane.b32.xlu0 %v3025_v10, %s3742_s11  ;;  %s2545_s7 = sshll.u32 %s355_s20, 4  ;;  %s6116_s13 = scalar_lea.hbm %s6166_s6, %s2760_s2  ;;  %s6118_s7 = int_to_ptr.vmem [resolvable:$true] %s2545_s7 }
  0xd9   : > { %s2531_s27 = scalar_lea.sflag [#allocation4], %s4040_s25  ;;  %s3652_s28 = scalar_lea.vmem %s6118_s7, 1024 }
  0xda   : > { %p3653_p0 = scmp.ne.s32.totalorder %s6118_s7, %s3652_s28  ;;  %p6817_p2 = scmp.ne.s32.totalorder %s6299_s16, 0 }
  0xdb   : > { %3036 = vrot.lane.b32.xlu1 %v3035_v11, %s3742_s11 }
  0xdc   : > { %3031 = vrot.lane.b32.xlu0 %v3030_v12, %s3742_s11  ;;  %p3654_p10 = pnand %p3653_p0, %p6817_p2 }
  0xde   : > { %p3655_p4 = pneg %p3654_p10 }
  0xdf   : > { %954 = vrot.lane.b32.xlu1 %v945_v14, %s3742_s11 }
  0xe0   : > { %3041 = vrot.lane.b32.xlu0 %v3040_v15, %s3742_s11 }
  0xe3   : > { %958 = vrot.lane.b32.xlu1 %v946_v17, %s3742_s11 }
  0xe4   : > { %956 = vrot.lane.b32.xlu0 %v938_v16, %s3742_s11 }
  0xe7   : > { %962 = vrot.lane.b32.xlu1 %v947_v19, %s3742_s11 }
  0xe8   : > { %960 = vrot.lane.b32.xlu0 %v939_v18, %s3742_s11 }
 0x145   : > { %v4083_v20 = vpop.permute.xlu0 %952  ;;  %v949_v21 = vpop.permute.xlu1 %948 }
 0x146   : > { %v4086_v22 = vsel %vm6195_vm0, 0.0, %v949_v21 }
 0x147   : > { %6310 = vst [vmem:[#allocation20_spill] sm:$0xff] %v4086_v22  ;;  %1118 = vrot.lane.b32.xlu0 %v4086_v22, %s3743_s3  ;;  %v1202_v51 = vrot.slane %v4086_v22, 4 }
 0x149   : > { %v951_v23 = vpop.permute.xlu1 %950 }
 0x14a   : > { %v3027_v24 = vpop.permute.xlu0 %3026  ;;  %v4093_v26 = vsel %vm6195_vm0, %v949_v21, %v951_v23  ;;  %v4117_v38 = vsel %vm6195_vm0, %v951_v23, %v4083_v20 }
 0x14b   : > { %v3028_v25 = vunpack.i.l.bf16 %v3027_v24  ;;  %1160 = vrot.lane.b32.xlu0 %v4086_v22, %s3744_s14  ;;  %v3029_v27 = vunpack.i.h.bf16 %v3027_v24  ;;  %6313 = vst [vmem:[#allocation23_spill] sm:$0xff] %v4117_v38  ;;  %v1203_v39 = vrot.slane %v4093_v26, 4  ;;  %v3075_v42 = vpack.i.bf16 %v4086_v22, %v4117_v38 }
 0x14c   : > { %v1204_v9 = vrot.slane %v4117_v38, 4 }
 0x14d   : > { %v4096_v28 = vsel %vm6195_vm0, 0.0, %v3028_v25  ;;  %v4102_v32 = vsel %vm6195_vm0, %v3028_v25, %v3029_v27  ;;  %v3037_v45 = vpop.permute.xlu1 %3036 }
 0x14e   : > { %v3032_v29 = vpop.permute.xlu0 %3031  ;;  %v3050_v30 = vpack.i.bf16 %v4093_v26, %v4096_v28  ;;  %v741_v36 = vrot.slane %v4096_v28, 4  ;;  %v3039_v48 = vunpack.i.h.bf16 %v3037_v45  ;;  %v3038_v49 = vunpack.i.l.bf16 %v3037_v45 }
 0x14f   : > { %v3033_v31 = vunpack.i.l.bf16 %v3032_v29  ;;  %v3034_v34 = vunpack.i.h.bf16 %v3032_v29  ;;  %v742_v3 = vrot.slane %v4102_v32, 4  ;;  %v3230_v10 = vpack.i.bf16 %v1202_v51, %v1204_v9 }
 0x150   : > { %3051 = vrot.lane.b32.xlu1 %v3050_v30, %s3745_s15  ;;  %v4124_v40 = vpack.i.bf16 %v1203_v39, %v741_v36  ;;  %v4154_v52 = vsel %vm6195_vm0, %v3038_v49, %v3039_v48 }
 0x151   : > { %v4105_v33 = vsel %vm6195_vm0, %v3029_v27, %v3033_v31  ;;  %v4113_v37 = vsel %vm6195_vm0, %v3033_v31, %v3034_v34  ;;  %6315 = vst [vmem:[#allocation25_spill] sm:$0xff] %v4154_v52  ;;  %v955_v54 = vpop.permute.xlu1 %954  ;;  %v4164_v56 = vsel %vm6195_vm0, %v3034_v34, %v3038_v49  ;;  %v746_v14 = vrot.slane %v4154_v52, 4 }
 0x152   : > { %6311 = vst [vmem:[#allocation21_spill] sm:$0xff] %v4105_v33  ;;  %v3045_v35 = vpack.i.bf16 %v4105_v33, %v4102_v32  ;;  %6312 = vst [vmem:[#allocation22_spill] sm:$0xff] %v4113_v37  ;;  %v744_v41 = vrot.slane %v4113_v37, 4  ;;  %v3085_v44 = vpack.i.bf16 %v4113_v37, %v4096_v28  ;;  %v4141_v46 = vpop.permute.xlu0 %3041  ;;  %v4176_v60 = vsel %vm6195_vm0, %v4083_v20, %v955_v54 }
 0x153   : > { %v3043_v47 = vunpack.i.l.bf16 %v4141_v46  ;;  %6316 = vst [vmem:[#allocation26_spill] sm:$0xff] %v4164_v56  ;;  %6318 = vst [vmem:[#allocation28_spill] sm:$0xff] %v4176_v60  ;;  %v3125_v61 = vpack.i.bf16 %v4164_v56, %v4113_v37  ;;  %v743_v2 = vrot.slane %v4105_v33, 4  ;;  %v3044_v5 = vunpack.i.h.bf16 %v4141_v46 }
 0x154   : > { %3061 = vrot.lane.b32.xlu1 %v3050_v30, %s3746_s19  ;;  %3046 = vrot.lane.b32.xlu0 %v3045_v35, %s3745_s15  ;;  %v4133_v43 = vpack.i.bf16 %v744_v41, %v741_v36  ;;  %v3160_v6 = vpack.i.bf16 %v4154_v52, %v4164_v56  ;;  %v745_v11 = vrot.slane %v4164_v56, 4  ;;  %v1205_v19 = vrot.slane %v4176_v60, 4 }
 0x155   : > { %v4150_v50 = vsel %vm6195_vm0, %v3039_v48, %v3043_v47  ;;  %v959_v58 = vpop.permute.xlu1 %958  ;;  %v3210_v4 = vpack.i.bf16 %v743_v2, %v742_v3  ;;  %v4218_v7 = vsel %vm6195_vm0, %v3043_v47, %v3044_v5  ;;  %v6171_v27 = vmov 0.0  }
 0x156   : > { %6314 = vst [vmem:[#allocation24_spill] sm:$0xff] %v4150_v50  ;;  %v3130_v53 = vpack.i.bf16 %v4150_v50, %v4154_v52  ;;  %v957_v55 = vpop.permute.xlu0 %956  ;;  %6321 = vst [vmem:[#allocation31_spill] sm:$0xff] %v4218_v7  ;;  %v3170_v8 = vpack.i.bf16 %v4218_v7, %v4150_v50  ;;  %v3235_v12 = vpack.i.bf16 %v745_v11, %v744_v41  ;;  %v747_v13 = vrot.slane %v4150_v50, 4 }
 0x157   : > { %v4167_v57 = vsel %vm6195_vm0, %v955_v54, %v957_v55  ;;  %v4185_v63 = vsel %vm6195_vm0, %v957_v55, %v959_v58  ;;  %v748_v16 = vrot.slane %v4218_v7, 4  ;;  %v3245_v25 = vpack.i.bf16 %v746_v14, %v745_v11  ;;  %1628 = vmatprep.mubr.f32.mxu0 %v6171_v27  ;;  %1699 = vmatprep.mubr.f32.mxu1 %v6171_v27 }
 0x158   : > { %3066 = vrot.lane.b32.xlu1 %v3045_v35, %s3747_s12  ;;  %3056 = vrot.lane.b32.xlu0 %v3045_v35, %s3746_s19  ;;  %6317 = vst [vmem:[#allocation27_spill] sm:$0xff] %v4167_v57  ;;  %v4182_v62 = vpack.i.bf16 %v4167_v57, %v4176_v60  ;;  %6319 = vst [vmem:[#allocation29_spill] sm:$0xff] %v4185_v63  ;;  %v3240_v15 = vpack.i.bf16 %v747_v13, %v746_v14  ;;  %v1206_v18 = vrot.slane %v4167_v57, 4  ;;  %v6324_v11 = vmov 0 }
 0x159   : > { %v3250_v17 = vpack.i.bf16 %v748_v16, %v747_v13  ;;  %v1207_v21 = vrot.slane %v4185_v63, 4  ;;  %v6358_v37 = vmov 0 }
 0x15a   : > { %v4169_v59 = vpop.permute.xlu0 %960  ;;  %v3255_v20 = vpack.i.bf16 %v1206_v18, %v1205_v19 }
 0x15b   : > { %v4189_v0 = vsel %vm6195_vm0, %v959_v58, %v4169_v59 }
 0x15c   : > { %3071 = vrot.lane.b32.xlu1 %v3050_v30, %s3747_s12  ;;  %3076 = vrot.lane.b32.xlu0 %v3075_v42, %s3745_s15  ;;  %6320 = vst [vmem:[#allocation30_spill] sm:$0xff] %v4189_v0  ;;  %v4196_v1 = vpack.i.bf16 %v4189_v0, %v4185_v63  ;;  %v1208_v23 = vrot.slane %v4189_v0, 4 }
 0x15e   : > { %v3260_v24 = vpack.i.bf16 %v1208_v23, %v1207_v21 }
 0x160   : > { %3081 = vrot.lane.b32.xlu1 %v3045_v35, %s3743_s3  ;;  %3086 = vrot.lane.b32.xlu0 %v3085_v44, %s3743_s3 }
 0x164   : > { %3091 = vrot.lane.b32.xlu1 %v3045_v35, %s3748_s4  ;;  %3101 = vrot.lane.b32.xlu0 %v3050_v30, %s3748_s4  ;;  %v963_v30 = vpop.permute.xlu1 %962 }
 0x168   : > { %3096 = vrot.lane.b32.xlu1 %v3075_v42, %s3746_s19  ;;  %3111 = vrot.lane.b32.xlu0 %v3045_v35, %s3744_s14 }
 0x16c   : > { %3106 = vrot.lane.b32.xlu1 %v3075_v42, %s3747_s12  ;;  %1120 = vrot.lane.b32.xlu0 %v4093_v26, %s3743_s3 }
 0x170   : > { %3116 = vrot.lane.b32.xlu1 %v3085_v44, %s3744_s14  ;;  %1327 = vrot.lane.b32.xlu0 %v1202_v51, %s3749_s18 }
 0x174   : > { %1122 = vrot.lane.b32.xlu1 %v4117_v38, %s3743_s3  ;;  %3131 = vrot.lane.b32.xlu0 %v3130_v53, %s3745_s15 }
 0x178   : > { %3121 = vrot.lane.b32.xlu1 %v3075_v42, %s3748_s4  ;;  %1164 = vrot.lane.b32.xlu0 %v4117_v38, %s3744_s14 }
 0x17c   : > { %3126 = vrot.lane.b32.xlu1 %v3125_v61, %s3745_s15  ;;  %3156 = vrot.lane.b32.xlu0 %v4182_v62, %s3745_s15 }
 0x180   : > { %1162 = vrot.lane.b32.xlu1 %v4093_v26, %s3744_s14  ;;  %3166 = vrot.lane.b32.xlu0 %v4196_v1, %s3745_s15 }
 0x184   : > { %3136 = vrot.lane.b32.xlu1 %v3125_v61, %s3746_s19  ;;  %3176 = vrot.lane.b32.xlu0 %v3125_v61, %s3748_s4 }
 0x188   : > { %3141 = vrot.lane.b32.xlu1 %v3130_v53, %s3746_s19  ;;  %3181 = vrot.lane.b32.xlu0 %v4182_v62, %s3746_s19 }
 0x18c   : > { %3146 = vrot.lane.b32.xlu1 %v3125_v61, %s3747_s12  ;;  %3206 = vrot.lane.b32.xlu0 %v4196_v1, %s3747_s12 }
 0x190   : > { %3151 = vrot.lane.b32.xlu1 %v3130_v53, %s3747_s12  ;;  %3211 = vrot.lane.b32.xlu0 %v3210_v4, %s3750_s29 }
 0x194   : > { %3161 = vrot.lane.b32.xlu1 %v3160_v6, %s3743_s3  ;;  %3216 = vrot.lane.b32.xlu0 %v4124_v40, %s3750_s29  ;;  %v356_v40 = vlaneseq }
 0x196   : > { %v4302_v44 = vand.u32 127, %v356_v40  ;;  %v6343_v40 = vmov 0 }
 0x198   : > { %3171 = vrot.lane.b32.xlu1 %v3170_v8, %s3743_s3  ;;  %3221 = vrot.lane.b32.xlu0 %v3210_v4, %s3749_s18  ;;  %6322 = vst [vmem:[#allocation32_spill] sm:$0xff] %v4302_v44  ;;  %v358_v47 = vadd.s32 128, %v4302_v44  ;;  %v4314_v48 = vadd.s32 256, %v4302_v44  ;;  %v4317_v49 = vadd.s32 384, %v4302_v44  ;;  %v4325_v55 = vadd.s32 640, %v4302_v44 }
 0x199   : > { %v4328_v58 = vadd.s32 512, %v4302_v44  ;;  %v369_v61 = vand.u32 31, %v4302_v44  ;;  %v4350_v8 = vsel %vm6195_vm0, %v963_v30, 0.0 }
 0x19a   : > { %v6175_v2 = vand.u32 31, %v4317_v49 }
 0x19b   : > { %vm4354_vm1 = vcmp.ne.s32.totalorder %v369_v61, 0  ;;  %vm4415_vm10 = vcmp.ne.s32.totalorder %v369_v61, 31 }
 0x19c   : > { %3186 = vrot.lane.b32.xlu1 %v3130_v53, %s3748_s4  ;;  %3231 = vrot.lane.b32.xlu0 %v3230_v10, %s3750_s29  ;;  %v6173_v10 = vand.u32 31, %v4328_v58  ;;  %v6325_v11 = vsel %vm4354_vm1, 4294967295, %v6324_v11  ;;  %vm4373_vm4 = vcmp.ne.s32.totalorder %v6175_v2, 0  ;;  %v6344_v40 = vsel %vm4415_vm10, 4294967295, %v6343_v40 }
 0x19d   : > { %6326 = vst [vmem:[#allocation34_spill] sm:$0xff] %v6325_v11  ;;  %6345 = vst [vmem:[#allocation39_spill] sm:$0xff] %v6344_v40 }
 0x19e   : > { %vm4395_vm7 = vcmp.ne.s32.totalorder %v6173_v10, 0 }
 0x1a0   : > { %3191 = vrot.lane.b32.xlu1 %v4196_v1, %s3746_s19  ;;  %1329 = vrot.lane.b32.xlu0 %v1203_v39, %s3749_s18  ;;  %v4286_v39 = vsel %vm6195_vm0, %v3044_v5, 0.0 }
 0x1a1   : > { %v6178_v54 = vrot.slane %v4286_v39, 4 }
 0x1a3   : > { %v3285_v5 = vpack.i.bf16 %v6178_v54, %v748_v16 }
 0x1a4   : > { %3196 = vrot.lane.b32.xlu1 %v4182_v62, %s3747_s12  ;;  %3236 = vrot.lane.b32.xlu0 %v3235_v12, %s3750_s29  ;;  %v6327_v12 = vmov 0 }
 0x1a8   : > { %3201 = vrot.lane.b32.xlu1 %v3160_v6, %s3744_s14  ;;  %3241 = vrot.lane.b32.xlu0 %v3240_v15, %s3750_s29  ;;  %v4347_v6 = vsel %vm6195_vm0, %v4169_v59, %v963_v30  ;;  %v6330_v59 = vmov 0  ;;  %v6179_v30 = vrot.slane %v4350_v8, 4 }
 0x1a9   : > { %6323 = vst [vmem:[#allocation33_spill] sm:$0xff] %v4347_v6  ;;  %v6363_v22 = vrot.slane %v4347_v6, 4 }
 0x1ac   : > { %710 = vrot.lane.b32.xlu1 %v4150_v50, %s3744_s14  ;;  %3251 = vrot.lane.b32.xlu0 %v3250_v17, %s3749_s18 }
 0x1b0   : > { %3226 = vrot.lane.b32.xlu1 %v4133_v43, %s3749_s18  ;;  %3256 = vrot.lane.b32.xlu0 %v3255_v20, %s3750_s29  ;;  %v4297_v43 = vpack.i.bf16 %v4286_v39, %v4218_v7  ;;  %v6337_v20 = vmov 0 }
 0x1b1   : > { %v6338_v20 = vsel %vm4395_vm7, 4294967295, %v6337_v20 }
 0x1b4   : > { %1331 = vrot.lane.b32.xlu1 %v1204_v9, %s3749_s18  ;;  %3261 = vrot.lane.b32.xlu0 %v3260_v24, %s3750_s29  ;;  %v6174_v9 = vand.u32 31, %v4325_v55  ;;  %v6340_v24 = vmov 0 }
 0x1b6   : > { %vm4389_vm6 = vcmp.ne.s32.totalorder %v6174_v9, 0 }
 0x1b8   : > { %3246 = vrot.lane.b32.xlu1 %v3245_v25, %s3749_s18  ;;  %1124 = vrot.lane.b32.xlu0 %v4176_v60, %s3743_s3  ;;  %v6180_v25 = vrot.slane %v4347_v6, 4 }
 0x1b9   : > { %v4265_v29 = vpop.permute.xlu0 %1118 }
 0x1bc   : > { %1126 = vrot.lane.b32.xlu1 %v4167_v57, %s3743_s3  ;;  %1128 = vrot.lane.b32.xlu0 %v4185_v63, %s3743_s3 }
 0x1bd   : > { %v4275_v31 = vpop.permute.xlu0 %1160 }
 0x1c0   : > { %1130 = vrot.lane.b32.xlu1 %v4189_v0, %s3743_s3  ;;  %3266 = vrot.lane.b32.xlu0 %v4182_v62, %s3748_s4  ;;  %v376_v62 = vand.u32 31, %v358_v47 }
 0x1c2   : > { %v4277_v34 = vpop.permute.xlu1 %3051  ;;  %vm4361_vm2 = vcmp.ne.s32.totalorder %v376_v62, 0  ;;  %vm4405_vm8 = vcmp.ne.s32.totalorder %v376_v62, 31 }
 0x1c3   : > { %v6328_v12 = vsel %vm4361_vm2, 4294967295, %v6327_v12  ;;  %v6341_v24 = vsel %vm4405_vm8, 4294967295, %v6340_v24  ;;  %v3053_v47 = vunpack.i.l.bf16 %v4277_v34 }
 0x1c4   : > { %1333 = vrot.lane.b32.xlu1 %v1205_v19, %s3749_s18  ;;  %1335 = vrot.lane.b32.xlu0 %v1206_v18, %s3749_s18  ;;  %6329 = vst [vmem:[#allocation35_spill] sm:$0xff] %v6328_v12  ;;  %v4385_v18 = vpack.i.bf16 %v4350_v8, %v4347_v6  ;;  %v6335_v19 = vmov 0  ;;  %6342 = vst [vmem:[#allocation38_spill] sm:$0xff] %v6341_v24 }
 0x1c5   : > { %v6336_v19 = vsel %vm4389_vm6, 4294967295, %v6335_v19 }
 0x1c6   : > { %v4281_v35 = vpop.permute.xlu1 %3061  ;;  %v4283_v36 = vpop.permute.xlu0 %3046 }
 0x1c7   : > { %v6176_v14 = vunpack.i.h.bf16 %v4283_v36  ;;  %v3048_v15 = vunpack.i.l.bf16 %v4283_v36  ;;  %v3063_v61 = vunpack.i.l.bf16 %v4281_v35 }
 0x1c8   : > { %3271 = vrot.lane.b32.xlu1 %v4196_v1, %s3748_s4  ;;  %1337 = vrot.lane.b32.xlu0 %v1207_v21, %s3749_s18  ;;  %v6177_v1 = vand.u32 31, %v4314_v48 }
 0x1c9   : > { %v589_v27 = vsel %vm6209_vm5, %v3048_v15, %v6176_v14  ;;  %v588_v2 = vsel %vm6209_vm5, %v3053_v47, %v3048_v15  ;;  %v3310_v14 = vpack.i.bf16 %v6179_v30, %v6180_v25  ;;  %v6349_v47 = vrot.slane %v4286_v39, 4 }
 0x1ca   : > { %v4291_v41 = vpop.permute.xlu1 %3066  ;;  %v4293_v42 = vpop.permute.xlu0 %3056  ;;  %vm4367_vm3 = vcmp.ne.s32.totalorder %v6177_v1, 0  ;;  %v605_v1 = vsel %vm4361_vm2, %v589_v27, 0.0  ;;  %v604_v27 = vsel %vm4354_vm1, %v588_v2, 0.0 }
 0x1cb   : > { %v6331_v59 = vsel %vm4367_vm3, 4294967295, %v6330_v59  ;;  %v6184_v21 = vunpack.i.h.bf16 %v4291_v41  ;;  %v3068_v10 = vunpack.i.l.bf16 %v4291_v41  ;;  %v3058_v9 = vunpack.i.l.bf16 %v4293_v42 }
 0x1cc   : > { %1339 = vrot.lane.b32.xlu1 %v1208_v23, %s3749_s18  ;;  %3276 = vrot.lane.b32.xlu0 %v4297_v43, %s3745_s15  ;;  %6332 = vst [vmem:[#allocation36_spill] sm:$0xff] %v6331_v59  ;;  %v4403_v23 = vadd.s32 896, %v4302_v44  ;;  %v6348_v50 = vunpack.i.h.bf16 %v4293_v42  ;;  %v3054_v44 = vunpack.i.h.bf16 %v4277_v34  ;;  %v794_v2 = vrot.slane %v605_v1, 4 }
 0x1cd   : > { %v632_v54 = vsel %vm6203_vm9, %v3068_v10, %v6184_v21  ;;  %v545_v21 = vsel %vm6219_vm11, %v3063_v61, %v3058_v9  ;;  %v793_v15 = vrot.slane %v604_v27, 4 }
 0x1ce   : > { %v4304_v45 = vpop.permute.xlu1 %3071  ;;  %v4306_v46 = vpop.permute.xlu0 %3076  ;;  %6339 = vst [vmem:[#allocation37_spill] sm:$0xff] %v4403_v23  ;;  %v546_v7 = vsel %vm6219_vm11, %v3058_v9, %v6348_v50  ;;  %v648_v9 = vsel %vm4405_vm8, %v632_v54, 0.0 }
 0x1cf   : > { %v3079_v23 = vunpack.i.h.bf16 %v4306_v46  ;;  %v562_v50 = vsel %vm4405_vm8, %v546_v7, 0.0  ;;  %v6352_v52 = vunpack.i.l.bf16 %v4306_v46 }
 0x1d0   : > { %1166 = vrot.lane.b32.xlu1 %v4176_v60, %s3744_s14  ;;  %1168 = vrot.lane.b32.xlu0 %v4167_v57, %s3744_s14 }
 0x1d1   : > { %v1052_v54 = vsel %vm6209_vm5, %v3079_v23, %v3054_v44  ;;  %v1053_v38 = vsel %vm6209_vm5, %v3054_v44, %v6352_v52  ;;  %v3074_v52 = vunpack.i.h.bf16 %v4304_v45 }
 0x1d2   : > { %v4319_v51 = vpop.permute.xlu1 %3081  ;;  %v4321_v53 = vpop.permute.xlu0 %3086 }
 0x1d3   : > { %v6191_v60 = vunpack.i.h.bf16 %v4321_v53  ;;  %v3088_v1 = vunpack.i.l.bf16 %v4321_v53 }
 0x1d4   : > { %1170 = vrot.lane.b32.xlu1 %v4185_v63, %s3744_s14  ;;  %1172 = vrot.lane.b32.xlu0 %v4189_v0, %s3744_s14  ;;  %v3073_v0 = vunpack.i.l.bf16 %v4304_v45  ;;  %v3083_v63 = vunpack.i.l.bf16 %v4319_v51  ;;  %v1069_v45 = vsel %vm4361_vm2, %v1053_v38, 0.0 }
 0x1d6   : > { %v4337_v3 = vpop.permute.xlu1 %3091  ;;  %v4339_v4 = vpop.permute.xlu0 %3101  ;;  %v631_v57 = vsel %vm6203_vm9, %v3073_v0, %v3068_v10  ;;  %v3064_v0 = vunpack.i.h.bf16 %v4281_v35  ;;  %v4558_v38 = vsel %vm6202_vm12, %v3088_v1, %v3083_v63  ;;  %v1254_v1 = vrot.slane %v1069_v45, 4 }
 0x1d7   : > { %v647_v27 = vsel %vm4415_vm10, %v631_v57, 0.0  ;;  %6356 = vst [vmem:[#allocation47_spill] sm:$0xff] %v4558_v38 }
 0x1d8   : > { %3281 = vrot.lane.b32.xlu1 %v4297_v43, %s3746_s19  ;;  %3286 = vrot.lane.b32.xlu0 %v3285_v5, %s3750_s29 }
 0x1da   : > { %v4379_v16 = vpop.permute.xlu1 %3096  ;;  %v4381_v17 = vpop.permute.xlu0 %3111 }
 0x1db   : > { %v6193_v7 = vunpack.i.l.bf16 %v4379_v16  ;;  %v3099_v44 = vunpack.i.h.bf16 %v4379_v16 }
 0x1dc   : > { %3291 = vrot.lane.b32.xlu1 %v4297_v43, %s3747_s12  ;;  %3296 = vrot.lane.b32.xlu0 %v4385_v18, %s3745_s15 }
 0x1dd   : > { %v1011_v57 = vsel %vm6219_vm11, %v3064_v0, %v6193_v7  ;;  %v1010_v56 = vsel %vm6219_vm11, %v3099_v44, %v3064_v0  ;;  %v6360_v44 = vunpack.i.h.bf16 %v4337_v3 }
 0x1de   : > { %v4420_v62 = vpop.permute.xlu1 %3106  ;;  %v4422_v5 = vpop.permute.xlu0 %1120  ;;  %v1026_v45 = vsel %vm4415_vm10, %v1010_v56, 0.0 }
 0x1df   : > { %v3109_v7 = vunpack.i.h.bf16 %v4420_v62 }
 0x1e0   : > { %671 = vrot.lane.b32.xlu1 %v4286_v39, %s3743_s3  ;;  %3301 = vrot.lane.b32.xlu0 %v4297_v43, %s3748_s4  ;;  %v3084_v39 = vunpack.i.h.bf16 %v4319_v51  ;;  %v853_v51 = vrot.slane %v648_v9, 4  ;;  %v1068_v9 = vsel %vm4354_vm1, %v1052_v54, 0.0  ;;  %v3113_v54 = vunpack.i.l.bf16 %v4381_v17 }
 0x1e2   : > { %v4453_v30 = vpop.permute.xlu1 %3116  ;;  %v4455_v25 = vpop.permute.xlu0 %1327  ;;  %v4541_v10 = vsel %vm6202_vm12, %v3083_v63, %v3084_v39 }
 0x1e3   : > { %6346 = vst [vmem:[#allocation40_spill] sm:$0xff] %v4453_v30  ;;  %6347 = vst [vmem:[#allocation41_spill] sm:$0xff] %v4455_v25  ;;  %v3104_v25 = vunpack.i.h.bf16 %v4339_v4 }
 0x1e4   : > { %884 = vrot.lane.b32.xlu1 %v6349_v47, %s3749_s18  ;;  %3306 = vrot.lane.b32.xlu0 %v4385_v18, %s3746_s19  ;;  %v561_v47 = vsel %vm4415_vm10, %v545_v21, 0.0 }
 0x1e5   : > { %v4532_v35 = vsel %vm6220_vm13, %v561_v47, %v793_v15  ;;  %v3114_v47 = vunpack.i.h.bf16 %v4381_v17  ;;  %v1253_v15 = vrot.slane %v1068_v9, 4  ;;  %v1027_v17 = vsel %vm4405_vm8, %v1011_v57, 0.0 }
 0x1e6   : > { %v4497_v61 = vpop.permute.xlu1 %1122  ;;  %v4499_v34 = vpop.permute.xlu0 %3131  ;;  %v4603_v57 = vsel %vm6202_vm12, %v4265_v29, %v4422_v5  ;;  %v4612_v56 = vsel %vm6220_vm13, %v1027_v17, %v1254_v1  ;;  %v6364_v1 = vrot.slane %v4350_v8, 4 }
 0x1e7   : > { %6350 = vst [vmem:[#allocation42_spill] sm:$0xff] %v4497_v61  ;;  %6351 = vst [vmem:[#allocation43_spill] sm:$0xff] %v4499_v34  ;;  %v6200_v29 = vunpack.i.h.bf16 %v4499_v34 }
 0x1e8   : > { %3311 = vrot.lane.b32.xlu1 %v3310_v14, %s3750_s29  ;;  %3316 = vrot.lane.b32.xlu0 %v4385_v18, %s3747_s12  ;;  %v4529_v14 = vsel %vm6220_vm13, %v562_v50, %v794_v2  ;;  %v4546_v50 = vsel %vm6202_vm12, %v3084_v39, %v6191_v60  ;;  %v3093_v2 = vunpack.i.l.bf16 %v4337_v3  ;;  %v3103_v39 = vunpack.i.l.bf16 %v4339_v4 }
 0x1e9   : > { %6355 = vst [vmem:[#allocation46_spill] sm:$0xff] %v4546_v50  ;;  %v852_v60 = vrot.slane %v647_v27, 4  ;;  %v6362_v50 = vunpack.i.l.bf16 %v4420_v62 }
 0x1ea   : > { %v4524_v21 = vpop.permute.xlu1 %3121  ;;  %v4526_v23 = vpop.permute.xlu0 %1164  ;;  %v829_v27 = vsel %vm6218_vm14, %v3093_v2, %v6360_v44  ;;  %v1094_v44 = vsel %vm6203_vm9, %v3109_v7, %v3074_v52 }
 0x1eb   : > { %6353 = vst [vmem:[#allocation44_spill] sm:$0xff] %v4524_v21  ;;  %6354 = vst [vmem:[#allocation45_spill] sm:$0xff] %v4526_v23  ;;  %v1095_v38 = vsel %vm6203_vm9, %v3074_v52, %v6362_v50  ;;  %v4620_v7 = vsel %vm6220_vm13, %v829_v27, %v853_v51  ;;  %v1110_v50 = vsel %vm4415_vm10, %v1094_v44, 0.0  ;;  %v4643_v27 = vsel %vm6220_vm13, %v1026_v45, %v1253_v15 }
 0x1ec   : > { %3321 = vrot.lane.b32.xlu1 %v4297_v43, %s3744_s14  ;;  %1132 = vrot.lane.b32.xlu0 %v4347_v6, %s3743_s3  ;;  %v6357_v43 = vand.u32 31, %v4314_v48  ;;  %v3118_v48 = vunpack.i.l.bf16 %v4453_v30  ;;  %v4663_v15 = vsel %vm6202_vm12, %v4422_v5, %v4497_v61  ;;  %vm6232_vm9 = vcmask 1039360  }
 0x1ed   : > { %6368 = vst [vmem:[#allocation51_spill] sm:$0xff] %v4663_v15 }
 0x1ee   : > { %v4565_v33 = vpop.permute.xlu1 %3126  ;;  %vm4569_vm0 = vcmp.ne.s32.totalorder %v6357_v43, 31  ;;  %v4573_v63 = vpop.permute.xlu0 %3156  ;;  %v828_v43 = vsel %vm6218_vm14, %v3103_v39, %v3093_v2  ;;  %v3133_v2 = vunpack.i.l.bf16 %v4499_v34  ;;  %v3124_v39 = vunpack.i.h.bf16 %v4524_v21 }
 0x1ef   : > { %v6359_v37 = vsel %vm4569_vm0, 4294967295, %v6358_v37  ;;  %v4631_v52 = vsel %vm6220_vm13, %v828_v43, %v852_v60  ;;  %v1111_v60 = vsel %vm4405_vm8, %v1095_v38, 0.0  ;;  %v4648_v43 = vsel %vm6210_vm15, %v3118_v48, %v3113_v54 }
 0x1f0   : > { %1134 = vrot.lane.b32.xlu1 %v4350_v8, %s3743_s3  ;;  %3326 = vrot.lane.b32.xlu0 %v4385_v18, %s3748_s4  ;;  %v4598_v18 = vsel %vm6210_vm15, %v3113_v54, %v3114_v47  ;;  %6365 = vst [vmem:[#allocation49_spill] sm:$0xff] %v4631_v52  ;;  %v3129_v44 = vunpack.i.h.bf16 %v4565_v33  ;;  %v593_v38 = vsel %vm6209_vm5, %v3133_v2, %v6200_v29  ;;  %v3159_v54 = vunpack.i.h.bf16 %v4573_v63 }
 0x1f1   : > { %v1311_v48 = vrot.slane %v1110_v50, 4  ;;  %v1287_v45 = vsel %vm6218_vm14, %v3124_v39, %v3104_v25  ;;  %v1312_v29 = vrot.slane %v1111_v60, 4  ;;  %v3128_v34 = vunpack.i.l.bf16 %v4565_v33 }
 0x1f2   : > { %v1163_v9 = vpop.permute.xlu1 %1162  ;;  %v4609_v0 = vpop.permute.xlu0 %3166  ;;  %v6371_v50 = vmov 0  ;;  %v609_v33 = vsel %vm4389_vm6, %v593_v38, 0.0 }
 0x1f3   : > { %6361 = vst [vmem:[#allocation48_spill] sm:$0xff] %v4609_v0  ;;  %v3168_v60 = vunpack.i.l.bf16 %v4609_v0  ;;  %v4711_v38 = vsel %vm6220_vm13, %v1287_v45, %v1311_v48  ;;  %v3752_v48 = vmov 0   ;;  %v4723_v45 = vrot.slane %v609_v33, 4 }
 0x1f4   : > { %1341 = vrot.lane.b32.xlu1 %v6363_v22, %s3749_s18  ;;  %1343 = vrot.lane.b32.xlu0 %v6364_v1, %s3749_s18  ;;  %v6366_v1 = vunpack.i.h.bf16 %v4453_v30  ;;  %v6394_v30 = vrot.slane %v4643_v27, 4 }
 0x1f5   : > { %3330 = vset.pattern.permute.xlu1 %v3752_v48  ;;  %3471 = vset.pattern.permute.xlu0 %v3752_v48 }
 0x1f6   : > { %v4653_v51 = vsel %vm6210_vm15, %v3114_v47, %v6366_v1  ;;  %v4656_v4 = vpop.permute.xlu1 %3136  ;;  %v4658_v17 = vpop.permute.xlu0 %3176  ;;  %v3158_v47 = vunpack.i.l.bf16 %v4573_v63  ;;  %v6369_v1 = vunpack.i.l.bf16 %v4524_v21  ;;  %v6370_v63 = vand.u32 31, %v4317_v49 }
 0x1f7   : > { %6367 = vst [vmem:[#allocation50_spill] sm:$0xff] %v4653_v51  ;;  %v592_v49 = vsel %vm6209_vm5, %v3129_v44, %v3133_v2  ;;  %v1554_v2 = vld [vmem:[#allocation8] sm:$0xff]  ;;  %v1179_v21 = vsel %vm6210_vm15, %v1163_v9, %v4526_v23 }
 0x1f8   : > { %v1288_v22 = vsel %vm6218_vm14, %v3104_v25, %v6369_v1  ;;  %1174 = vrot.lane.b32.xlu1 %v4347_v6, %s3744_s14  ;;  %1176 = vrot.lane.b32.xlu0 %v4350_v8, %s3744_s14  ;;  %vm4682_vm12 = vcmp.ne.s32.totalorder %v6370_v63, 31  ;;  %v6374_v25 = vunpack.i.l.bf16 %v4306_v46  ;;  %v1055_v39 = vsel %vm6209_vm5, %v3158_v47, %v3159_v54 }
 0x1f9   : > { %v6372_v50 = vsel %vm4682_vm12, 4294967295, %v6371_v50  ;;  %v4708_v8 = vsel %vm6220_vm13, %v1288_v22, %v1312_v29  ;;  %v1178_v6 = vsel %vm6210_vm15, %v4275_v31, %v1163_v9  ;;  %v3138_v29 = vunpack.i.l.bf16 %v4656_v4 }
 0x1fa   : > { %v4699_v1 = vpop.permute.xlu1 %3141  ;;  %v4701_v63 = vpop.permute.xlu0 %3181  ;;  %v1054_v5 = vsel %vm6209_vm5, %v6374_v25, %v3158_v47  ;;  %6375 = vst [vmem:[#allocation53_spill] sm:$0xff] %v4708_v8  ;;  %v608_v25 = vsel %vm4395_vm7, %v592_v49, 0.0  ;;  %v3139_v47 = vunpack.i.h.bf16 %v4656_v4  ;;  %v591_v22 = vsel %vm6209_vm5, %v3128_v34, %v3129_v44 }
 0x1fb   : > { %6373 = vst [vmem:[#allocation52_spill] sm:$0xff] %v4699_v1  ;;  %v1070_v31 = vsel %vm4367_vm3, %v1054_v5, 0.0  ;;  %v1071_v9 = vsel %vm4373_vm4, %v1055_v39, 0.0  ;;  %v1056_v46 = vsel %vm6209_vm5, %v3159_v54, %v3168_v60  ;;  %v6376_v4 = vunpack.i.h.bf16 %v4283_v36 }
 0x1fc   : > { %1557 = vperm.xlu1 %3330, %v1554_v2   ;;  %v1194_v33 = vsel %vm4415_vm10, %v1178_v6, 0.0  ;;  %v1195_v5 = vsel %vm4405_vm8, %v1179_v21, 0.0  ;;  %v4742_v51 = vrot.slane %v608_v25, 4  ;;  %v6377_v54 = vunpack.i.h.bf16 %v4609_v0 }
 0x1fd   : > { %v590_v44 = vsel %vm6209_vm5, %v6376_v4, %v3128_v34  ;;  %v607_v2 = vsel %vm4373_vm4, %v591_v22, 0.0  ;;  %v4750_v34 = vrot.slane %v1070_v31, 4  ;;  %v4752_v48 = vrot.slane %v1071_v9, 4 }
 0x1fe   : > { %v4730_v23 = vpop.permute.xlu1 %3146  ;;  %v4732_v49 = vpop.permute.xlu0 %3206  ;;  %v1057_v61 = vsel %vm6209_vm5, %v3168_v60, %v6377_v54  ;;  %v1072_v6 = vsel %vm4395_vm7, %v1056_v46, 0.0  ;;  %v548_v21 = vsel %vm6219_vm11, %v3138_v29, %v3139_v47  ;;  %v4757_v25 = vrot.slane %v1194_v33, 4 }
 0x1ff   : > { %v4759_v4 = vrot.slane %v1195_v5, 4  ;;  %v6381_v22 = vunpack.i.h.bf16 %v4293_v42  ;;  %v606_v9 = vsel %vm4367_vm3, %v590_v44, 0.0  ;;  %v1073_v46 = vsel %vm4389_vm6, %v1057_v61, 0.0 }
 0x200   : > { %6378 = vst [vmem:[#allocation54_spill] sm:$0xff] %v4757_v25  ;;  %v3178_v5 = vunpack.i.l.bf16 %v4658_v17  ;;  %v796_v54 = vrot.slane %v607_v2, 4  ;;  %v6382_v36 = vand.u32 31, %v4325_v55  ;;  %v6383_v0 = vmov 0 }
 0x201   : > { %6379 = vst [vmem:[#allocation55_spill] sm:$0xff] %v4759_v4  ;;  %v547_v31 = vsel %vm6219_vm11, %v6381_v22, %v3138_v29  ;;  %v6385_v42 = vand.u32 31, %v4328_v58  ;;  %v6386_v29 = vmov 0  ;;  %v4786_v44 = vrot.slane %v1072_v6, 4 }
 0x202   : > { %v4761_v39 = vpop.permute.xlu1 %3151  ;;  %v4763_v60 = vpop.permute.xlu0 %3211  ;;  %vm4776_vm15 = vcmp.ne.s32.totalorder %v6382_v36, 31  ;;  %v564_v2 = vsel %vm4682_vm12, %v548_v21, 0.0  ;;  %v3143_v55 = vunpack.i.l.bf16 %v4699_v1  ;;  %v3183_v33 = vunpack.i.l.bf16 %v4701_v63 }
 0x203   : > { %6380 = vst [vmem:[#allocation56_spill] sm:$0xff] %v4761_v39  ;;  %v6384_v0 = vsel %vm4776_vm15, 4294967295, %v6383_v0  ;;  %vm4782_vm5 = vcmp.ne.s32.totalorder %v6385_v42, 31  ;;  %v6216_v61 = vunpack.i.h.bf16 %v4763_v60  ;;  %v3213_v22 = vunpack.i.l.bf16 %v4763_v60 }
 0x204   : > { %v6387_v29 = vsel %vm4782_vm5, 4294967295, %v6386_v29  ;;  %v563_v58 = vsel %vm4569_vm0, %v547_v31, 0.0  ;;  %v4797_v42 = vrot.slane %v1073_v46, 4  ;;  %v795_v21 = vrot.slane %v606_v9, 4 }
 0x205   : > { %6388 = vst [vmem:[#allocation57_spill] sm:$0xff] %v6387_v29  ;;  %v770_v52 = vsel %vm6232_vm9, %v3213_v22, %v6216_v61  ;;  %v6390_v15 = vrot.slane %v4708_v8, 4  ;;  %v6391_v36 = vrot.slane %v4612_v56, 4  ;;  %v3149_v31 = vunpack.i.h.bf16 %v4730_v23 }
 0x206   : > { %6389 = vst [vmem:[#allocation58_spill] sm:$0xff] %v4797_v42  ;;  %v4799_v6 = vpop.permute.xlu1 %3161  ;;  %v4801_v4 = vpop.permute.xlu0 %3216  ;;  %v3148_v46 = vunpack.i.l.bf16 %v4730_v23  ;;  %v6393_v42 = vrot.slane %v4711_v38, 4  ;;  %v6396_v9 = vunpack.i.h.bf16 %v4658_v17  ;;  %v4833_v23 = vsel %vm6220_vm13, %v563_v58, %v795_v21 }
 0x207   : > { %v4811_v25 = vsel %vm6220_vm13, %v6391_v36, %v6390_v15  ;;  %v3218_v15 = vunpack.i.l.bf16 %v4801_v4  ;;  %v4830_v36 = vsel %vm6220_vm13, %v564_v2, %v796_v54  ;;  %v6399_v8 = vsel %vm4361_vm2, %v4102_v32, 0.0 }
 0x208   : > { %6392 = vst [vmem:[#allocation59_spill] sm:$0xff] %v4811_v25  ;;  %v4820_v59 = vsel %vm6220_vm13, %v6394_v30, %v6393_v42  ;;  %v4825_v61 = vsel %vm6218_vm14, %v3178_v5, %v6396_v9  ;;  %v549_v25 = vsel %vm6219_vm11, %v3139_v47, %v3143_v55  ;;  %v6397_v30 = vunpack.i.l.bf16 %v4379_v16 }
 0x209   : > { %6395 = vst [vmem:[#allocation60_spill] sm:$0xff] %v4820_v59  ;;  %v6398_v59 = vunpack.i.h.bf16 %v4701_v63  ;;  %v905_v54 = vsel %vm6220_vm13, %v6399_v8, %v770_v52  ;;  %vm6402_vm14 = vcmask 769024   ;;  %v6404_v58 = vunpack.i.h.bf16 %v4699_v1 }
 0x20a   : > { %v1012_v42 = vsel %vm6219_vm11, %v6397_v30, %v3183_v33  ;;  %v2761_v47 = vpack.c.bf16 %v4529_v14, %v905_v54  ;;  %v4850_v21 = vpop.permute.xlu1 %3171  ;;  %v4852_v16 = vpop.permute.xlu0 %3221  ;;  %v769_v30 = vsel %vm6232_vm9, %v3218_v15, %v3213_v22  ;;  %vm6405_vm13 = vcmask 1031168  }
 0x20b   : > { %v1013_v9 = vsel %vm6219_vm11, %v3183_v33, %v6398_v59  ;;  %6400 = vst [vmem:[#allocation61_spill] sm:$0xff] %v4850_v21  ;;  %v6401_v59 = vunpack.i.h.bf16 %v4291_v41  ;;  %vm6403_vm11 = vmmov %vm6402_vm14  ;;  %v6221_v52 = vunpack.i.h.bf16 %v4852_v16  ;;  %v6227_v8 = vunpack.i.l.bf16 %v4852_v16 }
 0x20c   : > { %v634_v32 = vsel %vm6403_vm11, %v3148_v46, %v3149_v31  ;;  %v550_v14 = vsel %vm6405_vm13, %v3143_v55, %v6404_v58  ;;  %v1029_v54 = vsel %vm4682_vm12, %v1013_v9, 0.0  ;;  %v3153_v2 = vunpack.i.l.bf16 %v4761_v39  ;;  %2762 = vmatprep.subr.bf16.mxu0 %v2761_v47 }
 0x20d   : > { %v633_v33 = vsel %vm6402_vm14, %v6401_v59, %v3148_v46  ;;  %v6406_v41 = vsel %vm4354_vm1, %v4096_v28, 0.0  ;;  %vm6407_vm14 = vcmask 1043456   ;;  %v1028_v46 = vsel %vm4569_vm0, %v1012_v42, 0.0 }
 0x20e   : > { %v904_v22 = vsel %vm6407_vm14, %v6406_v41, %v769_v30  ;;  %vm6408_vm11 = vcmask 515072   ;;  %v6409_v9 = vunpack.i.h.bf16 %v4337_v3  ;;  %vm6410_vm13 = vcmask 777216   ;;  %v4892_v59 = vpop.permute.xlu1 %3186  ;;  %v4894_v41 = vpop.permute.xlu0 %3231 }
 0x20f   : > { %v2763_v15 = vpack.c.bf16 %v4532_v35, %v904_v22  ;;  %v888_v55 = vsel %vm6408_vm11, %v6227_v8, %v6221_v52  ;;  %v649_v28 = vsel %vm4569_vm0, %v633_v33, 0.0  ;;  %v650_v47 = vsel %vm4682_vm12, %v634_v32, 0.0  ;;  %v6430_v8 = vld [vmem:[#allocation41_spill] sm:$0xff] }
 0x210   : > { %v830_v58 = vsel %vm6410_vm13, %v6409_v9, %v3178_v5  ;;  %v6411_v42 = vunpack.i.h.bf16 %v4732_v49  ;;  %v6412_v35 = vunpack.i.l.bf16 %v4732_v49  ;;  %vm6413_vm14 = vcmask 769024  }
 0x211   : > { %v6414_v3 = vsel %vm4361_vm2, %v4541_v10, 0.0  ;;  %vm6415_vm11 = vcmask 1043456   ;;  %v565_v33 = vsel %vm4782_vm5, %v549_v25, 0.0  ;;  %v6222_v32 = vunpack.i.h.bf16 %v4761_v39  ;;  %2764 = vmatpush1.bf16.msra.mxu0 %v2763_v15 }
 0x212   : > { %v1099_v30 = vsel %vm6413_vm14, %v6412_v35, %v6411_v42  ;;  %v929_v5 = vsel %vm6415_vm11, %v6414_v3, %v888_v55  ;;  %vm6416_vm13 = vmmov %vm6415_vm11  ;;  %v566_v9 = vsel %vm4776_vm15, %v550_v14, 0.0  ;;  %v635_v42 = vsel %vm6413_vm14, %v3149_v31, %v3153_v2  ;;  %v4923_v52 = vpop.permute.xlu1 %3191 }
 0x213   : > { %v4906_v22 = vsel %vm6416_vm13, %v1029_v54, %v4752_v48  ;;  %v6226_v35 = vunpack.i.l.bf16 %v4894_v41  ;;  %v2765_v10 = vpack.c.bf16 %v929_v5, %v4620_v7  ;;  %v4915_v55 = vsel %vm6415_vm11, %v1028_v46, %v4750_v34  ;;  %v4925_v7 = vpop.permute.xlu0 %1329  ;;  %vm6417_vm13 = vmmov %vm6415_vm11 }
 0x214   : > { %v854_v25 = vrot.slane %v649_v28, 4  ;;  %v855_v3 = vrot.slane %v650_v47, 4  ;;  %v1115_v15 = vsel %vm4776_vm15, %v1099_v30, 0.0  ;;  %v3234_v48 = vunpack.i.h.bf16 %v4894_v41 }
 0x215   : > { %v3164_v54 = vunpack.i.h.bf16 %v4799_v6  ;;  %v3163_v14 = vunpack.i.l.bf16 %v4799_v6  ;;  %v3219_v31 = vunpack.i.h.bf16 %v4801_v4  ;;  %2766 = vmatprep.subr.bf16.mxu0 %v2765_v10  ;;  %v4929_v34 = vsel %vm6417_vm13, %v566_v9, %v4723_v45  ;;  %vm6418_vm13 = vmmov %vm6415_vm11 }
 0x216   : > { %v636_v46 = vsel %vm6413_vm14, %v3153_v2, %v6222_v32  ;;  %v651_v28 = vsel %vm4782_vm5, %v635_v42, 0.0  ;;  %v6225_v6 = vunpack.i.l.bf16 %v4850_v21  ;;  %v4939_v4 = vsel %vm6415_vm11, %v565_v33, %v4742_v51  ;;  %vm6419_vm14 = vmmov %vm6415_vm11 }
 0x217   : > { %v4941_v47 = vrot.slane %v1115_v15, 4  ;;  %v1230_v45 = vsel %vm6232_vm9, %v3219_v31, %v6226_v35  ;;  %v1229_v2 = vsel %vm6232_vm9, %v3234_v48, %v3219_v31  ;;  %v3193_v9 = vunpack.i.l.bf16 %v4923_v52  ;;  %v3197_v31 = vpop.permute.xlu1 %3196  ;;  %v4967_v5 = vpop.permute.xlu0 %3236 }
 0x218   : > { %v4952_v42 = vsel %vm6418_vm13, %v4825_v61, %v855_v3  ;;  %v4955_v51 = vsel %vm6419_vm14, %v830_v58, %v854_v25  ;;  %v652_v33 = vsel %vm4776_vm15, %v636_v46, 0.0  ;;  %v856_v10 = vrot.slane %v651_v28, 4 }
 0x219   : > { %v6420_v15 = vunpack.i.h.bf16 %v4321_v53  ;;  %vm6421_vm11 = vcmask 523264   ;;  %v3188_v58 = vunpack.i.l.bf16 %v4892_v59  ;;  %v6424_v53 = vsel %vm4361_vm2, %v4093_v26, 0.0 }
 0x21a   : > { %vm6422_vm12 = vmmov %vm6421_vm11  ;;  %v1362_v3 = vsel %vm6419_vm14, %v6424_v53, %v1230_v45  ;;  %v3198_v46 = vunpack.i.l.bf16 %v3197_v31  ;;  %v3238_v28 = vunpack.i.l.bf16 %v4967_v5  ;;  %v857_v30 = vrot.slane %v652_v33, 4 }
 0x21b   : > { %v4962_v32 = vsel %vm6421_vm11, %v6420_v15, %v3163_v14  ;;  %v4965_v48 = vsel %vm6422_vm12, %v3163_v14, %v3164_v54  ;;  %vm6423_vm13 = vmmov %vm6421_vm11  ;;  %v6425_v15 = vld [vmem:[#allocation20_spill] sm:$0xff]  ;;  %v6428_v45 = vunpack.i.h.bf16 %v4701_v63  ;;  %vm6429_vm11 = vcmask 1031168   ;;  %v4998_v39 = vpop.permute.xlu1 %3201 }
 0x21c   : > { %v4972_v61 = vsel %vm6423_vm13, %v3164_v54, %v6225_v6  ;;  %v6426_v54 = vsel %vm4354_vm1, %v6425_v15, 0.0  ;;  %vm6427_vm12 = vmmov %vm6419_vm14  ;;  %vm6431_vm13 = vcmask 515072   ;;  %v3199_v25 = vunpack.i.h.bf16 %v3197_v31  ;;  %v5000_v15 = vpop.permute.xlu0 %3241 }
 0x21d   : > { %v1361_v6 = vsel %vm6427_vm12, %v6426_v54, %v1229_v2  ;;  %v1014_v53 = vsel %vm6429_vm11, %v6428_v45, %v3193_v9  ;;  %v1345_v14 = vsel %vm6431_vm13, %v6430_v8, %v4925_v7  ;;  %v6432_v2 = vunpack.i.h.bf16 %v4967_v5 }
 0x21e   : > { %v1434_v54 = vrot.slane %v1362_v3, 4  ;;  %v6433_v35 = vunpack.i.h.bf16 %v4658_v17  ;;  %vm6434_vm14 = vcmask 777216   ;;  %v1433_v26 = vrot.slane %v1361_v6, 4  ;;  %v6437_v17 = vld [vmem:[#allocation22_spill] sm:$0xff] }
 0x21f   : > { %v772_v33 = vsel %vm6232_vm9, %v3238_v28, %v6432_v2  ;;  %v1030_v31 = vsel %vm4782_vm5, %v1014_v53, 0.0  ;;  %v6435_v1 = vunpack.i.l.bf16 %v4420_v62  ;;  %vm6436_vm12 = vcmask 769024   ;;  %vm6441_vm13 = vmmov %vm6434_vm14 }
 0x220   : > { %v832_v63 = vsel %vm6434_vm14, %v6433_v35, %v3188_v58  ;;  %v6438_v35 = vsel %vm4373_vm4, %v6437_v17, 0.0  ;;  %vm6439_vm11 = vcmask 1043456   ;;  %v6440_v2 = vunpack.i.h.bf16 %v4892_v59 }
 0x221   : > { %v1096_v3 = vsel %vm6436_vm12, %v6435_v1, %v3198_v46  ;;  %v907_v6 = vsel %vm6439_vm11, %v6438_v35, %v772_v33  ;;  %v6442_v21 = vunpack.i.h.bf16 %v4923_v52  ;;  %vm6443_vm14 = vcmask 1031168   ;;  %vm6445_vm12 = vmmov %vm6439_vm11 }
 0x222   : > { %v833_v45 = vsel %vm6441_vm13, %v3188_v58, %v6440_v2  ;;  %v6444_v62 = vsel %vm4354_vm1, %v4603_v57, 0.0  ;;  %v2777_v53 = vpack.c.bf16 %v4830_v36, %v907_v6  ;;  %v6446_v17 = vunpack.i.h.bf16 %v4763_v60 }
 0x223   : > { %v5030_v8 = vsel %vm6443_vm14, %v3193_v9, %v6442_v21  ;;  %v1385_v1 = vsel %vm6445_vm12, %v6444_v62, %v1345_v14  ;;  %vm6447_vm11 = vcmask 769024   ;;  %v6448_v58 = vunpack.i.l.bf16 %v4732_v49  ;;  %v5045_v21 = vpop.permute.xlu1 %710  ;;  %v5047_v9 = vpop.permute.xlu0 %3251  ;;  %vm6452_vm14 = vmmov %vm6445_vm12 }
 0x224   : > { %v771_v33 = vsel %vm6232_vm9, %v6446_v17, %v3238_v28  ;;  %v1097_v35 = vsel %vm6447_vm11, %v3198_v46, %v3199_v25  ;;  %vm6449_vm13 = vmmov %vm6447_vm11  ;;  %6450 = vst [vmem:[#allocation20_spill] sm:$0xff] %v5045_v21  ;;  %v6451_v57 = vrot.slane %v4612_v56, 4  ;;  %v6453_v60 = vsel %vm4405_vm8, %v4598_v18, 0.0  ;;  %2778 = vmatprep.subr.bf16.mxu1 %v2777_v53 }
 0x225   : > { %v1098_v2 = vsel %vm6449_vm13, %v3199_v25, %v6448_v58  ;;  %v1546_v36 = vsel %vm6445_vm12, %v6453_v60, %v1434_v54  ;;  %vm6454_vm11 = vmmov %vm6445_vm12  ;;  %v1112_v25 = vsel %vm4569_vm0, %v1096_v3, 0.0  ;;  %v6455_v28 = vrot.slane %v4643_v27, 4 }
 0x226   : > { %v1444_v14 = vsel %vm6452_vm14, %v1434_v54, %v6451_v57  ;;  %v5059_v46 = vsel %vm6454_vm11, %v1030_v31, %v4786_v44  ;;  %vm6456_vm13 = vmmov %vm6454_vm11  ;;  %v6457_v6 = vsel %vm4415_vm10, %v4648_v43, 0.0  ;;  %v1473_v54 = vrot.slane %v1385_v1, 4  ;;  %v6460_v44 = vld [vmem:[#allocation21_spill] sm:$0xff] }
 0x227   : > { %v5066_v56 = vsel %vm6456_vm13, %v1433_v26, %v6455_v28  ;;  %vm6458_vm14 = vmmov %vm6454_vm11  ;;  %v6461_v31 = vsel %vm4367_vm3, %v6460_v44, 0.0  ;;  %v5081_v53 = vsel %vm6454_vm11, %v833_v45, %v857_v30  ;;  %vm6464_vm13 = vnez %v6372_v50  ;;  %v3227_v30 = vpop.permute.xlu1 %3226  ;;  %v3257_v45 = vpop.permute.xlu0 %3256  ;;  %v6487_v43 = vld [vmem:[#allocation49_spill] sm:$0xff]  ;;  %v5943_v50 = vld [vmem:[#allocation10] sm:$0xff] }
 0x228   : > { %v5073_v18 = vsel %vm6458_vm14, %v6457_v6, %v1433_v26  ;;  %vm6462_vm12 = vmmov %vm6454_vm11  ;;  %v1113_v26 = vsel %vm6464_vm13, %v1097_v35, 0.0  ;;  %v1114_v1 = vsel %vm4782_vm5, %v1098_v2, 0.0  ;;  %v5095_v58 = vrot.slane %v1112_v25, 4 }
 0x229   : > { %v906_v3 = vsel %vm6462_vm12, %v6461_v31, %v771_v33  ;;  %vm6463_vm9 = vmmov %vm6454_vm11  ;;  %v3203_v57 = vunpack.i.l.bf16 %v4998_v39  ;;  %v3228_v60 = vunpack.i.l.bf16 %v3227_v30  ;;  %v3259_v35 = vunpack.i.h.bf16 %v3257_v45 }
 0x22a   : > { %v5084_v27 = vsel %vm6463_vm9, %v832_v63, %v856_v10  ;;  %v2779_v17 = vpack.c.bf16 %v4833_v23, %v906_v3  ;;  %v2769_v10 = vpack.c.bf16 %v1444_v14, %v1546_v36  ;;  %v2771_v63 = vpack.c.bf16 %v5066_v56, %v5073_v18  ;;  %vm6469_vm12 = vmmov %vm6454_vm11 }
 0x22b   : > { %v3258_v28 = vunpack.i.l.bf16 %v3257_v45  ;;  %v5100_v6 = vrot.slane %v1113_v26, 4  ;;  %v5102_v2 = vrot.slane %v1114_v1, 4  ;;  %v3204_v23 = vunpack.i.h.bf16 %v4998_v39  ;;  %v6472_v1 = vld [vmem:[#allocation28_spill] sm:$0xff]  ;;  %vm6474_vm10 = vmmov %vm6469_vm12  ;;  %v5124_v33 = vpop.permute.xlu1 %1331 }
 0x22c   : > { %2780 = vmatpush1.bf16.msra.mxu1 %v2779_v17  ;;  %v3243_v44 = vunpack.i.l.bf16 %v5000_v15  ;;  %v6465_v14 = vunpack.i.l.bf16 %v4852_v16  ;;  %vm6466_vm9 = vcmask 515072   ;;  %vm6467_vm14 = vcmask 1039360  }
 0x22d   : > { %v1232_v56 = vsel %vm6467_vm14, %v3258_v28, %v3259_v35  ;;  %v6468_v18 = vrot.slane %v4711_v38, 4  ;;  %v3229_v3 = vunpack.i.h.bf16 %v3227_v30  ;;  %v6470_v26 = vunpack.i.l.bf16 %v4894_v41  ;;  %vm6471_vm11 = vmmov %vm6467_vm14  ;;  %v6475_v38 = vld [vmem:[#allocation47_spill] sm:$0xff] }
 0x22e   : > { %v887_v36 = vsel %vm6466_vm9, %v3228_v60, %v6465_v14  ;;  %v6473_v17 = vsel %vm4373_vm4, %v6472_v1, 0.0  ;;  %v5126_v60 = vpop.permute.xlu0 %3261  ;;  %v6476_v14 = vsel %vm4354_vm1, %v6475_v38, 0.0  ;;  %vm6477_vm9 = vmmov %vm6474_vm10  ;;  %vm6480_vm14 = vcmask 506880   ;;  %v6483_v1 = vld [vmem:[#allocation54_spill] sm:$0xff]  ;;  %v6485_v38 = vld [vmem:[#allocation51_spill] sm:$0xff] }
 0x22f   : > { %v5114_v31 = vsel %vm6469_vm12, %v6468_v18, %v1473_v54  ;;  %v1231_v39 = vsel %vm6471_vm11, %v6470_v26, %v3258_v28  ;;  %v1364_v45 = vsel %vm6474_vm10, %v6473_v17, %v1232_v56  ;;  %v928_v30 = vsel %vm6477_vm9, %v6476_v14, %v887_v36  ;;  %v6478_v18 = vld [vmem:[#allocation40_spill] sm:$0xff]  ;;  %vm6481_vm12 = vmmov %vm6480_vm14 }
 0x230   : > { %v6479_v41 = vunpack.i.h.bf16 %v6478_v18  ;;  %v5138_v26 = vsel %vm6481_vm12, %v3204_v23, %v5045_v21  ;;  %vm6482_vm10 = vcmask 515072   ;;  %vm6484_vm11 = vmmov %vm6477_vm9  ;;  %v6486_v36 = vsel %vm4361_vm2, %v6485_v38, 0.0 }
 0x231   : > { %v1346_v56 = vsel %vm6482_vm10, %v4925_v7, %v5124_v33  ;;  %v5145_v17 = vsel %vm6484_vm11, %v1473_v54, %v6483_v1  ;;  %v2767_v25 = vpack.c.bf16 %v928_v30, %v6487_v43  ;;  %v6489_v7 = vld [vmem:[#allocation23_spill] sm:$0xff]  ;;  %v1436_v24 = vrot.slane %v1364_v45, 4  ;;  %v3247_v30 = vpop.permute.xlu1 %3246 }
 0x232   : > { %v720_v28 = vsel %vm6480_vm14, %v6479_v41, %v3203_v57  ;;  %v1386_v14 = vsel %vm6477_vm9, %v6486_v36, %v1346_v56  ;;  %v3263_v41 = vunpack.i.l.bf16 %v5126_v60  ;;  %vm6488_vm14 = vmmov %vm6481_vm12  ;;  %v6490_v54 = vsel %vm4367_vm3, %v6489_v7, 0.0  ;;  %v1125_v7 = vpop.permute.xlu0 %1124 }
 0x233   : > { %v5156_v40 = vsel %vm6488_vm14, %v3203_v57, %v3204_v23  ;;  %vm6491_vm12 = vmmov %vm6477_vm9  ;;  %v1475_v11 = vrot.slane %v1386_v14, 4  ;;  %v6492_v38 = vunpack.i.h.bf16 %v4967_v5  ;;  %vm6493_vm10 = vcmask 1039360   ;;  %2768 = vmatpush1.bf16.msra.mxu0 %v2767_v25  ;;  %v6498_v14 = vld [vmem:[#allocation60_spill] sm:$0xff] }
 0x234   : > { %v1363_v1 = vsel %vm6491_vm12, %v6490_v54, %v1231_v39  ;;  %v6494_v36 = vunpack.i.h.bf16 %v5000_v15  ;;  %vm6495_vm11 = vmmov %vm6493_vm10  ;;  %v6496_v57 = vunpack.i.h.bf16 %v4852_v16  ;;  %vm6497_vm9 = vcmask 515072   ;;  %2770 = vmatprep.subr.bf16.mxu0 %v2769_v10  ;;  %v6504_v10 = vld [vmem:[#allocation46_spill] sm:$0xff] }
 0x235   : > { %v773_v56 = vsel %vm6493_vm10, %v6492_v38, %v3243_v44  ;;  %v3249_v5 = vunpack.i.h.bf16 %v3247_v30  ;;  %v3248_v45 = vunpack.i.l.bf16 %v3247_v30  ;;  %v2775_v54 = vpack.c.bf16 %v5114_v31, %v6498_v14  ;;  %vm6500_vm14 = vmmov %vm6493_vm10 }
 0x236   : > { %v774_v18 = vsel %vm6495_vm11, %v3243_v44, %v6494_v36  ;;  %v889_v23 = vsel %vm6497_vm9, %v6496_v57, %v3229_v3  ;;  %v1435_v44 = vrot.slane %v1363_v1, 4  ;;  %v6499_v38 = vunpack.i.h.bf16 %v5126_v60  ;;  %v6501_v36 = vld [vmem:[#allocation53_spill] sm:$0xff]  ;;  %vm6503_vm11 = vmmov %vm6497_vm9  ;;  %v5203_v12 = vpop.permute.xlu0 %1128 }
 0x237   : > { %v6502_v57 = vrot.slane %v6501_v36, 4  ;;  %v736_v43 = vsel %vm6464_vm13, %v720_v28, 0.0  ;;  %vm6246_vm10 = vcmask 588800   ;;  %v890_v39 = vsel %vm6503_vm11, %v3229_v3, %v3248_v45  ;;  %vm6506_vm9 = vmmov %vm6491_vm12  ;;  %2772 = vmatpush1.bf16.msra.mxu0 %v2771_v63  ;;  %v5201_v3 = vpop.permute.xlu1 %1126 }
 0x238   : > { %v1234_v16 = vsel %vm6500_vm14, %v3263_v41, %v6499_v38  ;;  %v6505_v30 = vsel %vm4367_vm3, %v6504_v10, 0.0  ;;  %v6507_v1 = vrot.slane %v4906_v22, 4  ;;  %vm6508_vm8 = vmmov %vm6506_vm9  ;;  %v6509_v38 = vld [vmem:[#allocation25_spill] sm:$0xff]  ;;  %v6513_v10 = vld [vmem:[#allocation59_spill] sm:$0xff] }
 0x239   : > { %v1476_v25 = vsel %vm6491_vm12, %v6502_v57, %v1475_v11  ;;  %v930_v31 = vsel %vm6506_vm9, %v6505_v30, %v889_v23  ;;  %v6510_v36 = vsel %vm4389_vm6, %v6509_v38, 0.0  ;;  %vm6511_vm14 = vmmov %vm6508_vm8  ;;  %vm6512_vm12 = vcmask 1039360  }
 0x23a   : > { %v1448_v14 = vsel %vm6508_vm8, %v1436_v24, %v6507_v1  ;;  %v909_v57 = vsel %vm6511_vm14, %v6510_v36, %v774_v18  ;;  %v1233_v28 = vsel %vm6512_vm12, %v3259_v35, %v3263_v41  ;;  %v2773_v21 = vpack.c.bf16 %v1476_v25, %v6513_v10  ;;  %vm6515_vm11 = vmmov %vm6508_vm8  ;;  %v6516_v18 = vld [vmem:[#allocation29_spill] sm:$0xff]  ;;  %v6521_v36 = vld [vmem:[#allocation26_spill] sm:$0xff] }
 0x23b   : > { %v6514_v23 = vsel %vm4373_vm4, %v4962_v32, 0.0  ;;  %v1548_v1 = vsel %vm6515_vm11, %v736_v43, %v1436_v24  ;;  %v6517_v38 = vsel %vm4389_vm6, %v6516_v18, 0.0  ;;  %vm6518_vm9 = vmmov %vm6508_vm8  ;;  %v6519_v35 = vunpack.i.l.bf16 %v5047_v9 }
 0x23c   : > { %v931_v30 = vsel %vm6508_vm8, %v6514_v23, %v890_v39  ;;  %v1366_v63 = vsel %vm6518_vm9, %v6517_v38, %v1234_v16  ;;  %vm6520_vm14 = vcmask 515072   ;;  %v6522_v32 = vsel %vm4395_vm7, %v6521_v36, 0.0  ;;  %vm6523_vm12 = vmmov %vm6508_vm8  ;;  %2774 = vmatprep.subr.bf16.mxu0 %v2773_v21  ;;  %v6525_v23 = vld [vmem:[#allocation58_spill] sm:$0xff] }
 0x23d   : > { %v892_v41 = vsel %vm6520_vm14, %v3249_v5, %v6519_v35  ;;  %v2781_v25 = vpack.c.bf16 %v931_v30, %v4952_v42  ;;  %v908_v39 = vsel %vm6523_vm12, %v6522_v32, %v773_v56  ;;  %v2783_v24 = vpack.c.bf16 %v930_v31, %v4955_v51  ;;  %vm6527_vm11 = vmmov %vm6508_vm8  ;;  %v6528_v56 = vld [vmem:[#allocation27_spill] sm:$0xff]  ;;  %v6531_v31 = vld [vmem:[#allocation42_spill] sm:$0xff]  ;;  %2776 = vmatpush1.bf16.msra.mxu0 %v2775_v54  ;;  %v5252_v32 = vpop.permute.xlu1 %1130 }
 0x23e   : > { %v6524_v43 = vrot.slane %v4915_v55, 4  ;;  %v2793_v16 = vpack.c.bf16 %v4929_v34, %v909_v57  ;;  %v6526_v42 = vsel %vm4776_vm15, %v5030_v8, 0.0  ;;  %v6529_v21 = vsel %vm4395_vm7, %v6528_v56, 0.0  ;;  %vm6530_vm9 = vmmov %vm6508_vm8  ;;  %v6533_v34 = vld [vmem:[#allocation50_spill] sm:$0xff] }
 0x23f   : > { %v5237_v30 = vsel %vm6527_vm11, %v6526_v42, %v6525_v23  ;;  %v1365_v51 = vsel %vm6530_vm9, %v6529_v21, %v1233_v28  ;;  %vm6532_vm14 = vcmask 523264   ;;  %2782 = vmatprep.subr.bf16.mxu1 %v2781_v25  ;;  %v2785_v38 = vpack.c.bf16 %v1448_v14, %v1548_v1  ;;  %vm6535_vm12 = vmmov %vm6508_vm8  ;;  %v6537_v23 = vld [vmem:[#allocation55_spill] sm:$0xff]  ;;  %v6540_v42 = vld [vmem:[#allocation44_spill] sm:$0xff] }
 0x240   : > { %v1446_v10 = vsel %vm6508_vm8, %v1435_v44, %v6524_v43  ;;  %v1138_v18 = vsel %vm6532_vm14, %v6531_v31, %v1125_v7  ;;  %v6534_v57 = vsel %vm4569_vm0, %v6533_v34, 0.0  ;;  %v1438_v35 = vrot.slane %v1366_v63, 4  ;;  %v3267_v43 = vpop.permute.xlu0 %3266  ;;  %vm6538_vm11 = vmmov %vm6530_vm9  ;;  %2784 = vmatpush1.bf16.msra.mxu1 %v2783_v24  ;;  %v5266_v24 = vld [vmem:[#allocation7] sm:$0xff] }
 0x241   : > { %v1547_v8 = vsel %vm6535_vm12, %v6534_v57, %v1435_v44  ;;  %vm6536_vm8 = vcmask 515072   ;;  %v1492_v28 = vsel %vm6538_vm11, %v1475_v11, %v6537_v23  ;;  %v6539_v14 = vsel %vm4389_vm6, %v4972_v61, 0.0  ;;  %2786 = vmatprep.subr.bf16.mxu1 %v2785_v38  ;;  %vm6545_vm11 = vmmov %vm6530_vm9 }
 0x242   : > { %v891_v36 = vsel %vm6536_vm8, %v3248_v45, %v3249_v5  ;;  %v933_v1 = vsel %vm6530_vm9, %v6539_v14, %v892_v41  ;;  %v1139_v44 = vsel %vm6532_vm14, %v1125_v7, %v5201_v3  ;;  %v3269_v63 = vunpack.i.h.bf16 %v3267_v43  ;;  %1580 = vmatprep.subr.mxu0 %v1492_v28  ;;  %vm6546_vm14 = vmmov %vm6530_vm9 }
 0x243   : > { %v3268_v25 = vunpack.i.l.bf16 %v3267_v43  ;;  %v2795_v5 = vpack.c.bf16 %v4939_v4, %v908_v39  ;;  %v1437_v45 = vrot.slane %v1365_v51, 4  ;;  %v1154_v11 = vsel %vm4367_vm3, %v1138_v18, 0.0  ;;  %1581 = vmatpush1.msra.mxu0 %v5145_v17  ;;  %v1334_v18 = vpop.permute.xlu1 %1333 }
 0x244   : > { %v2787_v54 = vpack.c.bf16 %v1446_v10, %v1547_v8  ;;  %v1451_v61 = vrot.slane %v5237_v30, 4  ;;  %v6541_v41 = vunpack.i.l.bf16 %v6540_v42  ;;  %vm6542_vm12 = vcmask 777216   ;;  %v1336_v38 = vpop.permute.xlu0 %1335  ;;  %2794 = vmatprep.subr.bf16.mxu0 %v2793_v16  ;;  %2697 = vmatmul.mubr.msk.f32.vlgmr.msra.gmra.mrb[0].mxu0 %vm6246_vm10, %v5266_v24 }
 0x245   : > { %vm6543_vm8 = vmmov %vm6542_vm12  ;;  %v2797_v21 = vpack.c.bf16 %v933_v1, %v5081_v53  ;;  %v6544_v4 = vsel %vm4395_vm7, %v4965_v48, 0.0  ;;  %v1155_v10 = vsel %vm4373_vm4, %v1139_v44, 0.0  ;;  %v737_v17 = vsel %vm4782_vm5, %v5156_v40, 0.0  ;;  %2796 = vmatpush1.bf16.msra.mxu0 %v2795_v5 }
 0x246   : > { %v1289_v56 = vsel %vm6542_vm12, %v6541_v41, %v3268_v25  ;;  %v1290_v7 = vsel %vm6543_vm8, %v3268_v25, %v3269_v63  ;;  %v932_v39 = vsel %vm6545_vm11, %v6544_v4, %v891_v36  ;;  %2788 = vmatpush1.bf16.msra.mxu1 %v2787_v54  ;;  %vm6547_vm12 = vmmov %vm6530_vm9  ;;  %vm6548_vm8 = vcmask 515072  }
 0x247   : > { %v1379_v51 = vsel %vm6530_vm9, %v1289_v56, %v5095_v58  ;;  %v1380_v31 = vsel %vm6546_vm14, %v1290_v7, %v5100_v6  ;;  %v1452_v48 = vsel %vm6547_vm12, %v1438_v35, %v1451_v61  ;;  %v1347_v34 = vsel %vm6548_vm8, %v5124_v33, %v1334_v18  ;;  %vm6549_vm11 = vmmov %vm6548_vm8  ;;  %2798 = vmatprep.subr.bf16.mxu0 %v2797_v21  ;;  %v5315_v23 = vpop.permute.xlu1 %3271 }
 0x248   : > { %v1463_v53 = vrot.slane %v1380_v31, 4  ;;  %v1348_v57 = vsel %vm6549_vm11, %v1334_v18, %v1336_v38  ;;  %v6550_v58 = vsel %vm4776_vm15, %v5138_v26, 0.0  ;;  %v1461_v8 = vrot.slane %v1379_v51, 4  ;;  %vm6551_vm14 = vmmov %vm6530_vm9  ;;  %v1338_v28 = vpop.permute.xlu0 %1337 }
 0x249   : > { %v1550_v6 = vsel %vm6530_vm9, %v6550_v58, %v1438_v35  ;;  %v5303_v36 = vsel %vm6551_vm14, %v1154_v11, %v1347_v34  ;;  %vm6552_vm12 = vmmov %vm6530_vm9  ;;  %v6553_v16 = vmov 0.0   ;;  %vm6554_vm8 = vcmask 523264  }
 0x24a   : > { %v5306_v33 = vsel %vm6552_vm12, %v1155_v10, %v1348_v57  ;;  %1770 = vmatprep.mubr.f32.mxu0 %v6553_v16  ;;  %v1140_v26 = vsel %vm6554_vm8, %v5201_v3, %v5203_v12  ;;  %v1477_v35 = vrot.slane %v5303_v36, 4  ;;  %v2799_v40 = vpack.c.bf16 %v932_v39, %v5084_v27  ;;  %vm6556_vm11 = vmmov %vm6530_vm9 }
 0x24b   : > { %v1479_v43 = vrot.slane %v5306_v33, 4  ;;  %v2801_v14 = vpack.c.bf16 %v1452_v48, %v1550_v6  ;;  %v6555_v1 = vrot.slane %v4906_v22, 4  ;;  %v6557_v25 = vrot.slane %v5059_v46, 4  ;;  %vm6558_vm14 = vmmov %vm6530_vm9  ;;  %v5352_v31 = vpop.permute.xlu1 %1339 }
 0x24c   : > { %v1549_v3 = vsel %vm6558_vm14, %v737_v17, %v1437_v45  ;;  %v3274_v11 = vunpack.i.h.bf16 %v5315_v23  ;;  %v3273_v54 = vunpack.i.l.bf16 %v5315_v23  ;;  %vm6559_vm12 = vcmask 515072   ;;  %vm6560_vm8 = vmmov %vm6530_vm9  ;;  %2800 = vmatpush1.bf16.msra.mxu0 %v2799_v40  ;;  %v3277_v18 = vpop.permute.xlu0 %3276  ;;  %v6572_v17 = vld [vmem:[#allocation37_spill] sm:$0xff] }
 0x24d   : > { %v1464_v44 = vsel %vm6556_vm11, %v6555_v1, %v1463_v53  ;;  %v1450_v5 = vsel %vm6530_vm9, %v1437_v45, %v6557_v25  ;;  %v1349_v27 = vsel %vm6559_vm12, %v1336_v38, %v1338_v28  ;;  %v1480_v42 = vsel %vm6560_vm8, %v1463_v53, %v1479_v43  ;;  %vm6563_vm11 = vmmov %vm6560_vm8  ;;  %2802 = vmatprep.subr.bf16.mxu0 %v2801_v14 }
 0x24e   : > { %vm6561_vm10 = vcmask 523264   ;;  %v2789_v41 = vpack.c.bf16 %v1480_v42, %v1464_v44  ;;  %v6562_v56 = vrot.slane %v4915_v55, 4  ;;  %vm6564_vm9 = vmmov %vm6560_vm8  ;;  %v1156_v21 = vsel %vm4395_vm7, %v1140_v26, 0.0  ;;  %v6573_v44 = vld [vmem:[#allocation45_spill] sm:$0xff] }
 0x24f   : > { %v1141_v22 = vsel %vm6561_vm10, %v5203_v12, %v5252_v32  ;;  %v1478_v7 = vsel %vm6564_vm9, %v1461_v8, %v1477_v35  ;;  %vm6565_vm14 = vcmask 777216   ;;  %vm6567_vm10 = vmmov %vm6560_vm8  ;;  %vm6569_vm9 = vcmask 515072   ;;  %v1167_v14 = vpop.permute.xlu1 %1166 }
 0x250   : > { %v1462_v45 = vsel %vm6563_vm11, %v6562_v56, %v1461_v8  ;;  %v1291_v4 = vsel %vm6565_vm14, %v3269_v63, %v3273_v54  ;;  %vm6566_vm12 = vmmov %vm6565_vm14  ;;  %2790 = vmatprep.subr.bf16.mxu1 %v2789_v41  ;;  %v2803_v63 = vpack.c.bf16 %v1450_v5, %v1549_v3  ;;  %v1157_v38 = vsel %vm4389_vm6, %v1141_v22, 0.0  ;;  %v1169_v1 = vpop.permute.xlu0 %1168 }
 0x251   : > { %v1292_v39 = vsel %vm6566_vm12, %v3273_v54, %v3274_v11  ;;  %v2791_v12 = vpack.c.bf16 %v1478_v7, %v1462_v45  ;;  %v1381_v55 = vsel %vm6567_vm10, %v1291_v4, %v5102_v2  ;;  %vm6568_vm11 = vmmov %vm6560_vm8  ;;  %v1350_v53 = vsel %vm6569_vm9, %v1338_v28, %v5352_v31  ;;  %v6570_v2 = vld [vmem:[#allocation32_spill] sm:$0xff] }
 0x252   : > { %v1382_v10 = vsel %vm6560_vm8, %v1292_v39, %v4941_v47  ;;  %v5350_v51 = vsel %vm6568_vm11, %v1156_v21, %v1349_v27  ;;  %v1465_v48 = vrot.slane %v1381_v55, 4  ;;  %v363_v34 = vadd.s32 768, %v6570_v2  ;;  %vm6571_vm14 = vmmov %vm6560_vm8  ;;  %2804 = vmatpush1.bf16.msra.mxu0 %v2803_v63 }
 0x253   : > { %2792 = vmatpush1.bf16.msra.mxu1 %v2791_v12  ;;  %v1390_v47 = vsel %vm6571_vm14, %v1157_v38, %v1350_v53  ;;  %v1467_v57 = vrot.slane %v1382_v10, 4  ;;  %v1481_v58 = vrot.slane %v5350_v51, 4  ;;  %v418_v8 = vand.u32 31, %v6572_v17  ;;  %vm6577_vm11 = vmmov %vm6560_vm8  ;;  %v1171_v4 = vpop.permute.xlu1 %1170 }
 0x254   : > { %v1483_v6 = vrot.slane %v1390_v47, 4  ;;  %v3279_v26 = vunpack.i.h.bf16 %v3277_v18  ;;  %v3278_v40 = vunpack.i.l.bf16 %v3277_v18  ;;  %vm6574_vm12 = vcmask 506880   ;;  %vm6578_vm9 = vmmov %vm6560_vm8  ;;  %v5382_v39 = vpop.permute.xlu0 %1172 }
 0x255   : > { %v1180_v25 = vsel %vm6574_vm12, %v6573_v44, %v1167_v14  ;;  %vm6575_vm10 = vmmov %vm6574_vm12  ;;  %v6576_v5 = vrot.slane %v5059_v46, 4  ;;  %v1482_v54 = vsel %vm6577_vm11, %v1465_v48, %v1481_v58  ;;  %v411_v27 = vand.u32 31, %v363_v34  ;;  %v6595_v44 = vld [vmem:[#allocation61_spill] sm:$0xff] }
 0x256   : > { %v1181_v28 = vsel %vm6575_vm10, %v1167_v14, %v1169_v1  ;;  %v1196_v42 = vsel %vm4569_vm0, %v1180_v25, 0.0  ;;  %v1468_v45 = vsel %vm6578_vm9, %v1451_v61, %v1467_v57  ;;  %vm6579_vm14 = vmmov %vm6560_vm8  ;;  %vm5377_vm12 = vcmp.ne.s32.totalorder %v418_v8, 0 }
 0x257   : > { %v1466_v3 = vsel %vm6560_vm8, %v6576_v5, %v1465_v48  ;;  %v1197_v22 = vsel %vm6464_vm13, %v1181_v28, 0.0  ;;  %v1493_v41 = vrot.slane %v1196_v42, 4  ;;  %v1484_v7 = vsel %vm6579_vm14, %v1467_v57, %v1483_v6  ;;  %vm6585_vm14 = vmmov %vm6578_vm9  ;;  %v3282_v34 = vpop.permute.xlu1 %3281  ;;  %v6594_v57 = vld [vmem:[#allocation31_spill] sm:$0xff] }
 0x258   : > { %v1495_v56 = vrot.slane %v1197_v22, 4  ;;  %v6580_v46 = vmov 0  ;;  %vm6582_vm10 = vcmask 785408   ;;  %v2805_v12 = vpack.c.bf16 %v1484_v7, %v1468_v45  ;;  %v3287_v47 = vpop.permute.xlu0 %3286 }
 0x259   : > { %v6581_v46 = vsel %vm5377_vm12, 4294967295, %v6580_v46  ;;  %v595_v21 = vsel %vm6582_vm10, %v3278_v40, %v3279_v26  ;;  %v2807_v55 = vpack.c.bf16 %v1482_v54, %v1466_v3  ;;  %vm6583_vm8 = vcmask 506880   ;;  %v6600_v54 = vld [vmem:[#allocation52_spill] sm:$0xff] }
 0x25a   : > { %v1182_v10 = vsel %vm6583_vm8, %v1169_v1, %v1171_v4  ;;  %vm6584_vm11 = vmmov %vm6583_vm8  ;;  %v1496_v61 = vsel %vm6578_vm9, %v1479_v43, %v1495_v56  ;;  %v1494_v51 = vsel %vm6585_vm14, %v1477_v35, %v1493_v41  ;;  %2806 = vmatprep.subr.bf16.mxu0 %v2805_v12  ;;  %vm5397_vm10 = vcmp.ne.s32.totalorder %v411_v27, 0  ;;  %v6590_v35 = vld [vmem:[#allocation43_spill] sm:$0xff] }
 0x25b   : > { %v1183_v30 = vsel %vm6584_vm11, %v1171_v4, %v5382_v39  ;;  %v1198_v18 = vsel %vm4782_vm5, %v1182_v10, 0.0  ;;  %1651 = vmatprep.subr.mxu1 %v1496_v61  ;;  %v6586_v38 = vmov 0  ;;  %2808 = vmatpush1.bf16.msra.mxu0 %v2807_v55  ;;  %vm5401_vm8 = vcmp.ne.s32.totalorder %v418_v8, 31  ;;  %v6607_v4 = vld [vmem:[#allocation24_spill] sm:$0xff] }
 0x25c   : > { %v1199_v63 = vsel %vm4776_vm15, %v1183_v30, 0.0  ;;  %v6587_v38 = vsel %vm5397_vm10, 4294967295, %v6586_v38  ;;  %v1497_v48 = vrot.slane %v1198_v18, 4  ;;  %1652 = vmatpush1.msra.mxu1 %v1494_v51  ;;  %v6588_v36 = vmov 0 }
 0x25d   : > { %v1499_v33 = vrot.slane %v1199_v63, 4  ;;  %v6589_v36 = vsel %vm5401_vm8, 4294967295, %v6588_v36  ;;  %v6591_v43 = vunpack.i.h.bf16 %v6590_v35  ;;  %vm6592_vm11 = vcmask 785408  }
 0x25e   : > { %v611_v2 = vsel %vm5377_vm12, %v595_v21, 0.0  ;;  %vm6593_vm9 = vcmask 588800   ;;  %v507_v17 = vsel %vm5377_vm12, %v6594_v57, 0.0  ;;  %v3284_v8 = vunpack.i.h.bf16 %v3282_v34 }
 0x25f   : > { %v594_v53 = vsel %vm6592_vm11, %v6591_v43, %v3278_v40  ;;  %2698 = vmatmul.mubr.msk.f32.vlgmr.msra.gmra.mrb[0].mxu1 %vm6593_vm9, %v5266_v24  ;;  %v3283_v26 = vunpack.i.l.bf16 %v3282_v34  ;;  %v3289_v14 = vunpack.i.h.bf16 %v3287_v47  ;;  %v3288_v1 = vunpack.i.l.bf16 %v3287_v47 }
 0x260   : > { %1841 = vmatprep.mubr.f32.mxu1 %v6553_v16  ;;  %v3174_v40 = vunpack.i.h.bf16 %v6595_v44  ;;  %vm5417_vm14 = vcmp.ne.s32.totalorder %v411_v27, 31  ;;  %v6596_v25 = vmov 0  ;;  %vm6598_vm11 = vcmask 1043456  }
 0x261   : > { %v6597_v25 = vsel %vm5417_vm14, 4294967295, %v6596_v25  ;;  %v1500_v28 = vsel %vm6598_vm11, %v1483_v6, %v1499_v33  ;;  %vm6599_vm5 = vmmov %vm6598_vm11  ;;  %v610_v3 = vsel %vm5397_vm10, %v594_v53, 0.0  ;;  %v6601_v42 = vunpack.i.h.bf16 %v6600_v54  ;;  %v3292_v6 = vpop.permute.xlu1 %3291  ;;  %v6612_v33 = vld [vmem:[#allocation56_spill] sm:$0xff] }
 0x262   : > { %v1498_v5 = vsel %vm6599_vm5, %v1481_v58, %v1497_v48  ;;  %vm6602_vm9 = vcmask 1031168   ;;  %vm6604_vm7 = vcmask 1039360   ;;  %1722 = vmatprep.subr.mxu0 %v1500_v28  ;;  %v800_v27 = vrot.slane %v611_v2, 4  ;;  %v3297_v58 = vpop.permute.xlu0 %3296  ;;  %v6619_v28 = vld [vmem:[#allocation48_spill] sm:$0xff] }
 0x263   : > { %v551_v22 = vsel %vm6602_vm9, %v6601_v42, %v3283_v26  ;;  %vm6603_vm15 = vmmov %vm6602_vm9  ;;  %v776_v56 = vsel %vm6604_vm7, %v3288_v1, %v3289_v14  ;;  %v6605_v45 = vunpack.i.h.bf16 %v5000_v15  ;;  %1723 = vmatpush1.msra.mxu0 %v1498_v5  ;;  %v506_v12 = vsel %vm5397_vm10, %v6607_v4, 0.0 }
 0x264   : > { %v552_v41 = vsel %vm6603_vm15, %v3283_v26, %v3284_v8  ;;  %vm6606_vm6 = vmmov %vm6604_vm7  ;;  %v567_v55 = vsel %vm5417_vm14, %v551_v22, 0.0  ;;  %v3294_v10 = vunpack.i.h.bf16 %v3292_v6  ;;  %v3293_v30 = vunpack.i.l.bf16 %v3292_v6 }
 0x265   : > { %v775_v7 = vsel %vm6606_vm6, %v6605_v45, %v3288_v1  ;;  %v568_v21 = vsel %vm5401_vm8, %v552_v41, 0.0  ;;  %v3298_v61 = vunpack.i.l.bf16 %v3297_v58  ;;  %vm6608_vm5 = vcmask 588800   ;;  %vm6611_vm7 = vmmov %vm6598_vm11  ;;  %v672_v8 = vpop.permute.xlu1 %671 }
 0x266   : > { %2699 = vmatmul.mubr.msk.f32.vlgmr.msra.gmra.mrb[2].mxu0 %vm6608_vm5, %v5266_v24  ;;  %v6609_v15 = vunpack.i.l.bf16 %v6595_v44  ;;  %vm6610_vm6 = vcmask 523264   ;;  %v3254_v18 = vunpack.i.h.bf16 %v5047_v9  ;;  %v799_v63 = vrot.slane %v610_v3, 4  ;;  %vm6616_vm9 = vmmov %vm6611_vm7  ;;  %v3302_v26 = vpop.permute.xlu0 %3301 }
 0x267   : > { %v911_v48 = vsel %vm6611_vm7, %v507_v17, %v776_v56  ;;  %2294 = vmatprep.mubr.f32.mxu0 %v6553_v16  ;;  %v6613_v35 = vunpack.i.h.bf16 %v6612_v33  ;;  %vm6614_vm15 = vcmask 769024   ;;  %v3299_v2 = vunpack.i.h.bf16 %v3297_v58  ;;  %vm6617_vm5 = vmmov %vm6611_vm7 }
 0x268   : > { %v680_v51 = vsel %vm6610_vm6, %v6609_v15, %v3174_v40  ;;  %vm6615_vm11 = vmmov %vm6614_vm15  ;;  %v919_v34 = vsel %vm6616_vm9, %v568_v21, %v800_v27  ;;  %v910_v17 = vsel %vm6617_vm5, %v506_v12, %v775_v7  ;;  %v6620_v5 = vunpack.i.h.bf16 %v6619_v28 }
 0x269   : > { %v637_v43 = vsel %vm6614_vm15, %v6613_v35, %v3293_v30  ;;  %v638_v53 = vsel %vm6615_vm11, %v3293_v30, %v3294_v10  ;;  %vm6618_vm6 = vmmov %vm6617_vm5  ;;  %vm6621_vm7 = vcmask 785408   ;;  %vm6622_vm15 = vcmask 523264   ;;  %v885_v12 = vpop.permute.xlu1 %884 }
 0x26a   : > { %v653_v47 = vsel %vm5417_vm14, %v637_v43, 0.0  ;;  %v654_v57 = vsel %vm5401_vm8, %v638_v53, 0.0  ;;  %v918_v14 = vsel %vm6618_vm6, %v567_v55, %v799_v63  ;;  %v1058_v3 = vsel %vm6621_vm7, %v6620_v5, %v3298_v61  ;;  %vm6623_vm11 = vmmov %vm6621_vm7  ;;  %v3307_v55 = vpop.permute.xlu0 %3306 }
 0x26b   : > { %v858_v1 = vrot.slane %v653_v47, 4  ;;  %v859_v44 = vrot.slane %v654_v57, 4  ;;  %v681_v54 = vsel %vm6622_vm15, %v3174_v40, %v672_v8  ;;  %v3304_v42 = vunpack.i.h.bf16 %v3302_v26 }
 0x26c   : > { %v3303_v22 = vunpack.i.l.bf16 %v3302_v26  ;;  %v2809_v41 = vpack.c.bf16 %v919_v34, %v911_v48  ;;  %v696_v56 = vsel %vm5397_vm10, %v680_v51, 0.0  ;;  %v1059_v27 = vsel %vm6623_vm11, %v3298_v61, %v3299_v2 }
 0x26d   : > { %v2811_v45 = vpack.c.bf16 %v918_v14, %v910_v17  ;;  %v6624_v7 = vunpack.i.l.bf16 %v5047_v9  ;;  %vm6625_vm9 = vcmask 515072   ;;  %v1074_v58 = vsel %vm5397_vm10, %v1058_v3, 0.0  ;;  %v3312_v34 = vpop.permute.xlu1 %3311  ;;  %v6637_v14 = vld [vmem:[#allocation30_spill] sm:$0xff] }
 0x26e   : > { %v6626_v21 = vunpack.i.h.bf16 %v4892_v59  ;;  %vm6627_vm5 = vcmask 777216   ;;  %2810 = vmatprep.subr.bf16.mxu1 %v2809_v41  ;;  %v697_v10 = vsel %vm5377_vm12, %v681_v54, 0.0  ;;  %vm6629_vm7 = vmmov %vm6625_vm9  ;;  %v3309_v30 = vunpack.i.h.bf16 %v3307_v55  ;;  %v3317_v47 = vpop.permute.xlu0 %3316 }
 0x26f   : > { %v893_v6 = vsel %vm6625_vm9, %v6624_v7, %v3254_v18  ;;  %vm6628_vm6 = vmmov %vm6627_vm5  ;;  %2812 = vmatpush1.bf16.msra.mxu1 %v2811_v45  ;;  %v894_v9 = vsel %vm6629_vm7, %v3254_v18, %v885_v12  ;;  %v3308_v61 = vunpack.i.l.bf16 %v3307_v55  ;;  %v1075_v15 = vsel %vm5377_vm12, %v1059_v27, 0.0 }
 0x270   : > { %v834_v40 = vsel %vm6627_vm5, %v6626_v21, %v3303_v22  ;;  %v835_v4 = vsel %vm6628_vm6, %v3303_v22, %v3304_v42  ;;  %vm6630_vm15 = vcmask 1043456   ;;  %v6633_v48 = vunpack.i.h.bf16 %v4923_v52 }
 0x271   : > { %v935_v59 = vsel %vm6630_vm15, %v697_v10, %v894_v9  ;;  %vm6631_vm11 = vmmov %vm6630_vm15  ;;  %vm6634_vm5 = vcmask 1031168   ;;  %v1259_v8 = vrot.slane %v1074_v58, 4  ;;  %v1260_v26 = vrot.slane %v1075_v15, 4  ;;  %v3322_v21 = vpop.permute.xlu1 %3321 }
 0x272   : > { %v927_v51 = vsel %vm6631_vm11, %v835_v4, %v859_v44  ;;  %vm6632_vm9 = vmmov %vm6631_vm11  ;;  %v1016_v33 = vsel %vm6634_vm5, %v6633_v48, %v3308_v61  ;;  %v3314_v17 = vunpack.i.h.bf16 %v3312_v34  ;;  %v3313_v52 = vunpack.i.l.bf16 %v3312_v34  ;;  %v6638_v44 = vld [vmem:[#allocation33_spill] sm:$0xff] }
 0x273   : > { %v926_v63 = vsel %vm6632_vm9, %v834_v40, %v858_v1  ;;  %vm6635_vm6 = vmmov %vm6634_vm5  ;;  %v2813_v43 = vpack.c.bf16 %v935_v59, %v927_v51  ;;  %v1032_v53 = vsel %vm5417_vm14, %v1016_v33, 0.0  ;;  %v988_v1 = vsel %vm5397_vm10, %v6637_v14, 0.0  ;;  %v1133_v40 = vpop.permute.xlu0 %1132  ;;  %v6649_v51 = vld [vmem:[#allocation20_spill] sm:$0xff] }
 0x274   : > { %v1017_v35 = vsel %vm6635_vm6, %v3308_v61, %v3309_v30  ;;  %vm6636_vm0 = vmmov %vm6632_vm9  ;;  %v989_v28 = vsel %vm5377_vm12, %v6638_v44, 0.0  ;;  %v3319_v5 = vunpack.i.h.bf16 %v3317_v47  ;;  %v3318_v3 = vunpack.i.l.bf16 %v3317_v47 }
 0x275   : > { %v934_v18 = vsel %vm6636_vm0, %v696_v56, %v893_v6  ;;  %v1033_v2 = vsel %vm5401_vm8, %v1017_v35, 0.0  ;;  %2814 = vmatprep.subr.bf16.mxu1 %v2813_v43  ;;  %v1375_v54 = vsel %vm6636_vm0, %v1032_v53, %v1259_v8  ;;  %vm6639_vm7 = vmmov %vm6636_vm0  ;;  %v6640_v22 = vunpack.i.h.bf16 %v5126_v60  ;;  %v1135_v33 = vpop.permute.xlu1 %1134 }
 0x276   : > { %v2815_v57 = vpack.c.bf16 %v934_v18, %v926_v63  ;;  %v1376_v42 = vsel %vm6639_vm7, %v1033_v2, %v1260_v26  ;;  %vm6641_vm15 = vcmask 1039360   ;;  %vm6643_vm9 = vmmov %vm6636_vm0  ;;  %v6645_v7 = vunpack.i.h.bf16 %v4732_v49 }
 0x277   : > { %v1235_v41 = vsel %vm6641_vm15, %v6640_v22, %v3313_v52  ;;  %vm6642_vm11 = vmmov %vm6641_vm15  ;;  %vm6646_vm6 = vcmask 769024   ;;  %v3324_v10 = vunpack.i.h.bf16 %v3322_v21  ;;  %v3323_v9 = vunpack.i.l.bf16 %v3322_v21  ;;  %v3327_v35 = vpop.permute.xlu0 %3326 }
 0x278   : > { %2816 = vmatpush1.bf16.msra.mxu1 %v2815_v57  ;;  %v1236_v56 = vsel %vm6642_vm11, %v3313_v52, %v3314_v17  ;;  %v1367_v27 = vsel %vm6643_vm9, %v988_v1, %v1235_v41  ;;  %vm6644_vm5 = vmmov %vm6636_vm0  ;;  %v1100_v6 = vsel %vm6646_vm6, %v6645_v7, %v3318_v3  ;;  %v1455_v30 = vrot.slane %v1376_v42, 4 }
 0x279   : > { %v1368_v45 = vsel %vm6644_vm5, %v989_v28, %v1236_v56  ;;  %vm6647_vm1 = vmmov %vm6646_vm6  ;;  %v1116_v60 = vsel %vm5417_vm14, %v1100_v6, 0.0  ;;  %v1439_v55 = vrot.slane %v1367_v27, 4  ;;  %v1453_v61 = vrot.slane %v1375_v54, 4 }
 0x27a   : > { %v1101_v58 = vsel %vm6647_vm1, %v3318_v3, %v3319_v5  ;;  %v1440_v4 = vrot.slane %v1368_v45, 4  ;;  %v1317_v15 = vrot.slane %v1116_v60, 4  ;;  %vm6648_vm0 = vcmask 523264   ;;  %vm6652_vm15 = vmmov %vm6644_vm5  ;;  %v1342_v5 = vpop.permute.xlu1 %1341 }
 0x27b   : > { %v1117_v12 = vsel %vm5401_vm8, %v1101_v58, 0.0  ;;  %v1142_v49 = vsel %vm6648_vm0, %v5252_v32, %v1133_v40  ;;  %vm6650_vm1 = vcmask 506880   ;;  %vm6653_vm11 = vmmov %vm6648_vm0  ;;  %v3329_v2 = vunpack.i.h.bf16 %v3327_v35  ;;  %v1344_v3 = vpop.permute.xlu0 %1343 }
 0x27c   : > { %v1318_v59 = vrot.slane %v1117_v12, 4  ;;  %v723_v63 = vsel %vm6650_vm1, %v6649_v51, %v3323_v9  ;;  %vm6651_vm7 = vmmov %vm6650_vm1  ;;  %v1456_v43 = vsel %vm6652_vm15, %v1440_v4, %v1455_v30  ;;  %v1143_v53 = vsel %vm6653_vm11, %v1133_v40, %v1135_v33 }
 0x27d   : > { %v724_v48 = vsel %vm6651_vm7, %v3323_v9, %v3324_v10  ;;  %v739_v18 = vsel %vm5417_vm14, %v723_v63, 0.0  ;;  %v3328_v34 = vunpack.i.l.bf16 %v3327_v35  ;;  %v1158_v32 = vsel %vm5397_vm10, %v1142_v49, 0.0  ;;  %vm6654_vm9 = vmmov %vm6644_vm5 }
 0x27e   : > { %v740_v47 = vsel %vm5401_vm8, %v724_v48, 0.0  ;;  %v1454_v57 = vsel %vm6654_vm9, %v1439_v55, %v1453_v61  ;;  %v1551_v8 = vsel %vm6644_vm5, %v739_v18, %v1439_v55  ;;  %vm6655_vm6 = vcmask 777216   ;;  %vm6657_vm1 = vmmov %vm6644_vm5  ;;  %v1175_v7 = vpop.permute.xlu1 %1174 }
 0x27f   : > { %v1293_v26 = vsel %vm6655_vm6, %v3274_v11, %v3328_v34  ;;  %vm6656_vm0 = vmmov %vm6655_vm6  ;;  %v1552_v52 = vsel %vm6657_vm1, %v740_v47, %v1440_v4  ;;  %v2819_v14 = vpack.c.bf16 %v1454_v57, %v1551_v8  ;;  %v1159_v1 = vsel %vm5377_vm12, %v1143_v53, 0.0  ;;  %v1177_v6 = vpop.permute.xlu0 %1176 }
 0x280   : > { %v1294_v17 = vsel %vm6656_vm0, %v3328_v34, %v3329_v2  ;;  %vm6658_vm7 = vmmov %vm6657_vm1  ;;  %v2817_v54 = vpack.c.bf16 %v1456_v43, %v1552_v52  ;;  %vm6660_vm11 = vcmask 515072  }
 0x281   : > { %v1383_v44 = vsel %vm6658_vm7, %v1293_v26, %v1317_v15  ;;  %vm6659_vm15 = vmmov %vm6657_vm1  ;;  %v1351_v23 = vsel %vm6660_vm11, %v5352_v31, %v1342_v5  ;;  %vm6666_vm7 = vcmask 506880  }
 0x282   : > { %v1384_v28 = vsel %vm6659_vm15, %v1294_v17, %v1318_v59  ;;  %v1469_v42 = vrot.slane %v1383_v44, 4  ;;  %vm6661_vm9 = vmmov %vm6660_vm11  ;;  %2818 = vmatprep.subr.bf16.mxu1 %v2817_v54  ;;  %v1184_v40 = vsel %vm6666_vm7, %v5382_v39, %v1175_v7  ;;  %v1558_v49 = vpop.permute.xlu1 %1557 }
 0x283   : > { %v1471_v22 = vrot.slane %v1384_v28, 4  ;;  %v1352_v11 = vsel %vm6661_vm9, %v1342_v5, %v1344_v3  ;;  %vm6662_vm5 = vmmov %vm6657_vm1  ;;  %2820 = vmatpush1.bf16.msra.mxu1 %v2819_v14  ;;  %v1200_v12 = vsel %vm5417_vm14, %v1184_v40, 0.0 }
 0x284   : > { %v1391_v41 = vsel %vm6662_vm5, %v1158_v32, %v1351_v23  ;;  %vm6663_vm6 = vmmov %vm6657_vm1  ;;  %v1501_v15 = vrot.slane %v1200_v12, 4 }
 0x285   : > { %v1392_v56 = vsel %vm6663_vm6, %v1159_v1, %v1352_v11  ;;  %v1485_v27 = vrot.slane %v1391_v41, 4  ;;  %vm6664_vm0 = vmmov %vm6657_vm1 }
 0x286   : > { %v1487_v45 = vrot.slane %v1392_v56, 4  ;;  %v1472_v58 = vsel %vm6664_vm0, %v1455_v30, %v1471_v22  ;;  %vm6665_vm1 = vmmov %vm6664_vm0 }
 0x287   : > { %v1470_v21 = vsel %vm6665_vm1, %v1453_v61, %v1469_v42  ;;  %vm6667_vm15 = vmmov %vm6666_vm7  ;;  %vm6673_vm1 = vcmask 269312  }
 0x288   : > { %v1185_v31 = vsel %vm6667_vm15, %v1175_v7, %v1177_v6  ;;  %vm6668_vm11 = vmmov %vm6664_vm0 }
 0x289   : > { %v1488_v4 = vsel %vm6668_vm11, %v1471_v22, %v1487_v45  ;;  %vm6669_vm9 = vmmov %vm6664_vm0  ;;  %v1201_v55 = vsel %vm5401_vm8, %v1185_v31, 0.0  ;;  %vm6714_vm8 = vnez %v6359_v37 }
 0x28a   : > { %v1486_v60 = vsel %vm6669_vm9, %v1469_v42, %v1485_v27  ;;  %v2821_v10 = vpack.c.bf16 %v1488_v4, %v1472_v58  ;;  %v1503_v30 = vrot.slane %v1201_v55, 4  ;;  %vm6670_vm5 = vmmov %vm6664_vm0 }
 0x28b   : > { %v2823_v9 = vpack.c.bf16 %v1486_v60, %v1470_v21  ;;  %vm6671_vm6 = vmmov %vm6664_vm0  ;;  %vm6672_vm0 = vcmask 588800  }
 0x28c   : > { %2822 = vmatprep.subr.bf16.mxu1 %v2821_v10  ;;  %v1504_v39 = vsel %vm6670_vm5, %v1487_v45, %v1503_v30  ;;  %v1502_v61 = vsel %vm6671_vm6, %v1485_v27, %v1501_v15  ;;  %vm6674_vm7 = vmmov %vm6673_vm1  ;;  %v2221_v15 = vld [vmem:[#allocation11] sm:$0xff] }
 0x28d   : > { %2824 = vmatpush1.bf16.msra.mxu1 %v2823_v9  ;;  %vm6675_vm15 = vmmov %vm6673_vm1 }
 0x28e   : > { %1793 = vmatprep.subr.mxu1 %v1504_v39  ;;  %vm6676_vm11 = vmmov %vm6673_vm1 }
 0x28f   : > { %vm6677_vm9 = vmmov %vm6673_vm1 }
 0x290   : > { %vm6678_vm5 = vmmov %vm6673_vm1 }
 0x291   : > { %1794 = vmatpush1.msra.mxu1 %v1502_v61  ;;  %vm6679_vm6 = vmmov %vm6673_vm1 }
 0x292   : > { %2700 = vmatmul.mubr.msk.f32.vlgmr.msra.gmra.mrb[2].mxu1 %vm6672_vm0, %v5266_v24  ;;  %vm6680_vm0 = vmmov %vm6673_vm1 }
 0x293   : > { %2365 = vmatprep.mubr.f32.mxu1 %v6553_v16 }
 0x317   : > { %v1630_v59 = vpop.f32.mrb[0].mxu0 }
 0x318   : > { %v1632_v51 = vpop.f32.mrb[1].mxu0  ;;  %v1631_v63 = vadd.f32 %v1630_v59, %v1558_v49 }
 0x319   : > { %v1633_v48 = vadd.f32 %v1632_v51, %v1558_v49 }
 0x31a   : > { %v1848_v33 = vmax.f32 %v1631_v63, 0.0 }
 0x31b   : > { %v1849_v35 = vmax.f32 %v1633_v48, 0.0 }
 0x31c   : > { %1864 = vrot.lane.b32.xlu0 %v1848_v33, %s3742_s11 }
 0x31d   : > { %1866 = vrot.lane.b32.xlu1 %v1849_v35, %s3742_s11 }
 0x332   : > { %v1701_v43 = vpop.f32.mrb[0].mxu1 }
 0x333   : > { %v1702_v18 = vadd.f32 %v1701_v43, %v1558_v49  ;;  %v1703_v53 = vpop.f32.mrb[1].mxu1 }
 0x334   : > { %v1704_v2 = vadd.f32 %v1703_v53, %v1558_v49 }
 0x335   : > { %v1850_v34 = vmax.f32 %v1702_v18, 0.0 }
 0x336   : > { %v1851_v32 = vmax.f32 %v1704_v2, 0.0 }
 0x337   : > { %1868 = vrot.lane.b32.xlu0 %v1850_v34, %s3742_s11 }
 0x338   : > { %1870 = vrot.lane.b32.xlu1 %v1851_v32, %s3742_s11 }
 0x339   : > { %v1772_v24 = vpop.f32.mrb[2].mxu0 }
 0x33a   : > { %v1773_v47 = vadd.f32 %v1772_v24, %v1558_v49  ;;  %v1774_v57 = vpop.f32.mrb[3].mxu0 }
 0x33b   : > { %v1775_v8 = vadd.f32 %v1774_v57, %v1558_v49 }
 0x33c   : > { %v1852_v26 = vmax.f32 %v1773_v47, 0.0 }
 0x33d   : > { %v1853_v17 = vmax.f32 %v1775_v8, 0.0 }
 0x33e   : > { %1872 = vrot.lane.b32.xlu0 %v1852_v26, %s3742_s11 }
 0x33f   : > { %1874 = vrot.lane.b32.xlu1 %v1853_v17, %s3742_s11 }
 0x365   : > { %v1843_v52 = vpop.f32.mrb[2].mxu1 }
 0x366   : > { %v1844_v14 = vadd.f32 %v1843_v52, %v1558_v49  ;;  %v1845_v1 = vpop.f32.mrb[3].mxu1 }
 0x367   : > { %v1846_v44 = vadd.f32 %v1845_v1, %v1558_v49 }
 0x368   : > { %v1854_v28 = vmax.f32 %v1844_v14, 0.0 }
 0x369   : > { %v1855_v5 = vmax.f32 %v1846_v44, 0.0 }
 0x36a   : > { %1876 = vrot.lane.b32.xlu0 %v1854_v28, %s3742_s11 }
 0x36b   : > { %1878 = vrot.lane.b32.xlu1 %v1855_v5, %s3742_s11  ;;  %s3754_s11 = smov [#allocation13]  }
 0x38e   : > { %v1865_v3 = vpop.permute.xlu0 %1864 }
 0x38f   : > { %v5568_v54 = vsel %vm6673_vm1, 0.0, %v1865_v3  ;;  %v1867_v42 = vpop.permute.xlu1 %1866  ;;  %vm6681_vm1 = vmmov %vm6680_vm0 }
 0x390   : > { %2076 = vrot.lane.b32.xlu1 %v5568_v54, %s3744_s14  ;;  %2186 = vrot.lane.b32.xlu0 %v5568_v54, %s3749_s18  ;;  %v5575_v23 = vsel %vm6674_vm7, %v1865_v3, %v1867_v42  ;;  %vm6682_vm7 = vcmask 1039360  }
 0x3a9   : > { %v1869_v22 = vpop.permute.xlu0 %1868 }
 0x3aa   : > { %v5578_v11 = vsel %vm6675_vm15, %v1867_v42, %v1869_v22  ;;  %v1871_v27 = vpop.permute.xlu1 %1870  ;;  %vm6263_vm15 = vmmov 1  }
 0x3ab   : > { %v3336_v41 = vpack.i.bf16 %v5578_v11, %v5575_v23  ;;  %v5591_v7 = vsel %vm6677_vm9, %v1869_v22, %v1871_v27  ;;  %vm6689_vm9 = vcmask 785408  }
 0x3ad   : > { %3337 = vrot.lane.b32.xlu1 %v3336_v41, %s3746_s19  ;;  %3332 = vrot.lane.b32.xlu0 %v3336_v41, %s3750_s29 }
 0x3b0   : > { %v1873_v56 = vpop.permute.xlu0 %1872 }
 0x3b1   : > { %v5585_v45 = vsel %vm6676_vm11, %v1871_v27, %v1873_v56  ;;  %3342 = vrot.lane.b32.xlu1 %v3336_v41, %s3745_s15  ;;  %2080 = vrot.lane.b32.xlu0 %v5578_v11, %s3744_s14  ;;  %v1875_v58 = vpop.permute.xlu1 %1874  ;;  %vm5672_vm11 = vmpackc.low %vm6263_vm15, %vm4361_vm2 }
 0x3b2   : > { %v3371_v6 = vpack.i.bf16 %v5585_v45, %v5591_v7  ;;  %v5610_v21 = vsel %vm6678_vm5, %v1873_v56, %v1875_v58  ;;  %vm6690_vm5 = vcmask 1031168  }
 0x3b3   : > { %v3401_v40 = vpack.i.bf16 %v5610_v21, %v5568_v54 }
 0x3b5   : > { %3347 = vrot.lane.b32.xlu1 %v3336_v41, %s3747_s12  ;;  %3372 = vrot.lane.b32.xlu0 %v3371_v6, %s3746_s19 }
 0x3b9   : > { %3352 = vrot.lane.b32.xlu1 %v3336_v41, %s3748_s4  ;;  %3377 = vrot.lane.b32.xlu0 %v3371_v6, %s3745_s15 }
 0x3bd   : > { %3357 = vrot.lane.b32.xlu1 %v3336_v41, %s3743_s3  ;;  %3382 = vrot.lane.b32.xlu0 %v3371_v6, %s3747_s12 }
 0x3c1   : > { %3362 = vrot.lane.b32.xlu1 %v3336_v41, %s3749_s18  ;;  %3387 = vrot.lane.b32.xlu0 %v3371_v6, %s3748_s4 }
 0x3c5   : > { %2078 = vrot.lane.b32.xlu1 %v5575_v23, %s3744_s14  ;;  %3392 = vrot.lane.b32.xlu0 %v3371_v6, %s3743_s3 }
 0x3c9   : > { %2082 = vrot.lane.b32.xlu1 %v5591_v7, %s3744_s14  ;;  %3397 = vrot.lane.b32.xlu0 %v3371_v6, %s3749_s18 }
 0x3cd   : > { %2084 = vrot.lane.b32.xlu0 %v5585_v45, %s3744_s14  ;;  %3367 = vrot.lane.b32.xlu1 %v3371_v6, %s3750_s29 }
 0x3d1   : > { %3402 = vrot.lane.b32.xlu0 %v3401_v40, %s3750_s29  ;;  %3407 = vrot.lane.b32.xlu1 %v3401_v40, %s3746_s19 }
 0x3d5   : > { %3412 = vrot.lane.b32.xlu0 %v3401_v40, %s3745_s15  ;;  %3417 = vrot.lane.b32.xlu1 %v3401_v40, %s3747_s12 }
 0x3d9   : > { %3422 = vrot.lane.b32.xlu0 %v3401_v40, %s3748_s4  ;;  %3427 = vrot.lane.b32.xlu1 %v3401_v40, %s3743_s3 }
 0x3dc   : > { %v1877_v31 = vpop.permute.xlu0 %1876 }
 0x3dd   : > { %v1879_v4 = vpop.permute.xlu1 %1878  ;;  %v5622_v60 = vsel %vm6679_vm6, %v1875_v58, %v1877_v31  ;;  %vm6691_vm6 = vmmov %vm6689_vm9 }
 0x3de   : > { %v5625_v12 = vsel %vm6680_vm0, %v1877_v31, %v1879_v4  ;;  %v1897_v10 = vsel %vm6681_vm1, %v1879_v4, 0.0  ;;  %v3461_v9 = vpack.i.bf16 %v5622_v60, %v5610_v21  ;;  %vm6692_vm0 = vmmov %vm6691_vm6 }
 0x3df   : > { %v3431_v55 = vpack.i.bf16 %v5625_v12, %v5622_v60  ;;  %2134 = vrot.lane.b32.xlu0 %v1897_v10, %s3750_s29  ;;  %v3466_v30 = vpack.i.bf16 %v1897_v10, %v5625_v12  ;;  %vm6693_vm1 = vmmov %vm6682_vm7 }
 0x3e1   : > { %3432 = vrot.lane.b32.xlu1 %v3431_v55, %s3750_s29 }
 0x3e3   : > { %3437 = vrot.lane.b32.xlu0 %v3431_v55, %s3746_s19 }
 0x3e5   : > { %1924 = vrot.lane.b32.xlu1 %v1897_v10, %s3746_s19 }
 0x3e7   : > { %3442 = vrot.lane.b32.xlu0 %v3431_v55, %s3745_s15 }
 0x3e9   : > { %1966 = vrot.lane.b32.xlu1 %v1897_v10, %s3745_s15 }
 0x3eb   : > { %3447 = vrot.lane.b32.xlu0 %v3431_v55, %s3747_s12 }
 0x3ed   : > { %2008 = vrot.lane.b32.xlu1 %v1897_v10, %s3747_s12 }
 0x3ef   : > { %3452 = vrot.lane.b32.xlu0 %v3431_v55, %s3748_s4 }
 0x3f1   : > { %2168 = vrot.lane.b32.xlu1 %v1897_v10, %s3748_s4 }
 0x3f3   : > { %3457 = vrot.lane.b32.xlu0 %v3431_v55, %s3743_s3 }
 0x3f5   : > { %2050 = vrot.lane.b32.xlu1 %v1897_v10, %s3743_s3  ;;  %s3656_s3 = sshll.u32 %s3754_s11, 4  ;;  %s3657_s3 = int_to_ptr.vmem [resolvable:$false] %s3656_s3 }
 0x3f6   : > { %p3659_p5 = scmp.lt.s32.totalorder %s6118_s7, %s3657_s3 }
 0x3f7   : > { %3462 = vrot.lane.b32.xlu0 %v3461_v9, %s3749_s18 }
 0x3f9   : > { %3467 = vrot.lane.b32.xlu1 %v3466_v30, %s3749_s18 }
 0x3fb   : > { %2086 = vrot.lane.b32.xlu0 %v5610_v21, %s3744_s14 }
 0x3fd   : > { %2088 = vrot.lane.b32.xlu1 %v5622_v60, %s3744_s14 }
 0x3ff   : > { %2090 = vrot.lane.b32.xlu0 %v5625_v12, %s3744_s14 }
 0x401   : > { %2092 = vrot.lane.b32.xlu1 %v1897_v10, %s3744_s14  ;;  %s3658_s14 = scalar_lea.vmem %s3657_s3, 2048 }
 0x402   : > { %v5656_v39 = vpop.permute.xlu1 %2076  ;;  %v5658_v61 = vpop.permute.xlu0 %2186  ;;  %p3660_p7 = scmp.lt.s32.totalorder %s3658_s14, %s3652_s28 }
 0x403   : > { %2224 = vperm.xlu0 %3471, %v2221_v15  }
 0x404   : > { %p3661_p8 = por %p3660_p7, %p3659_p5 }
 0x406   : > { %p3662_p1 = pnand %p3661_p8, %p3655_p4 }
 0x41f   : > { %v5660_v49 = vpop.permute.xlu1 %3337  ;;  %v5662_v59 = vpop.permute.xlu0 %3332 }
 0x420   : > { %v3335_v51 = vunpack.i.h.bf16 %v5662_v59  ;;  %v3334_v63 = vunpack.i.l.bf16 %v5662_v59  ;;  %v3340_v44 = vunpack.i.h.bf16 %v5660_v49  ;;  %v6260_v28 = vunpack.i.l.bf16 %v5660_v49 }
 0x422   : > { %v2137_v48 = vsel %vm6682_vm7, %v3334_v63, %v3335_v51  ;;  %v5721_v41 = vsel %vm6690_vm5, %v6260_v28, %v3340_v44  ;;  %vm6694_vm7 = vmmov %vm6693_vm1 }
 0x423   : > { %v2825_v43 = vpack.c.bf16 %v2137_v48, %v5575_v23  ;;  %v5677_v18 = vpop.permute.xlu1 %3342  ;;  %v5679_v53 = vpop.permute.xlu0 %2080  ;;  %vm5763_vm5 = vmpackc.low %vm6263_vm15, %vm4367_vm3 }
 0x424   : > { %v3345_v14 = vunpack.i.h.bf16 %v5677_v18  ;;  %v6259_v1 = vunpack.i.l.bf16 %v5677_v18 }
 0x425   : > { %2827 = vmatprep.subr.msk.bf16.mxu0 %vm5672_vm11, %v2825_v43 }
 0x426   : > { %v5714_v42 = vsel %vm6689_vm9, %v6259_v1, %v3345_v14  ;;  %vm5748_vm9 = vmpackc.low %vm6263_vm15, %vm4373_vm4  ;;  %vm6702_vm15 = vcmask 777216  }
 0x427   : > { %v5683_v2 = vpop.permute.xlu1 %3347  ;;  %v5685_v34 = vpop.permute.xlu0 %3372  ;;  %v2831_v10 = vpack.c.bf16 %v5714_v42, %v5721_v41 }
 0x428   : > { %6686 = vst [vmem:[#allocation41_spill] sm:$0xff] %v5685_v34  ;;  %v6267_v56 = vunpack.i.h.bf16 %v5683_v2  ;;  %v6265_v27 = vunpack.i.l.bf16 %v5683_v2  ;;  %v6266_v40 = vunpack.i.h.bf16 %v5685_v34  ;;  %v3374_v31 = vunpack.i.l.bf16 %v5685_v34 }
 0x42b   : > { %v5687_v32 = vpop.permute.xlu1 %3352  ;;  %v5689_v24 = vpop.permute.xlu0 %3377 }
 0x42c   : > { %v6261_v22 = vunpack.i.h.bf16 %v5689_v24  ;;  %v3379_v23 = vunpack.i.l.bf16 %v5689_v24  ;;  %v3355_v9 = vunpack.i.h.bf16 %v5687_v32  ;;  %v6270_v30 = vunpack.i.l.bf16 %v5687_v32 }
 0x42e   : > { %v1970_v15 = vsel %vm6691_vm6, %v3345_v14, %v3379_v23  ;;  %v1971_v48 = vsel %vm6692_vm0, %v3379_v23, %v6261_v22  ;;  %vm6699_vm6 = vcmask 769024   ;;  %vm6700_vm0 = vcmask 1031168  }
 0x42f   : > { %v5691_v47 = vpop.permute.xlu1 %3357  ;;  %v5693_v57 = vpop.permute.xlu0 %3382 }
 0x430   : > { %6687 = vst [vmem:[#allocation22_spill] sm:$0xff] %v5693_v57 }
 0x433   : > { %v5695_v8 = vpop.permute.xlu1 %3362  ;;  %v5697_v26 = vpop.permute.xlu0 %3387 }
 0x434   : > { %6688 = vst [vmem:[#allocation36_spill] sm:$0xff] %v5697_v26  ;;  %v3389_v14 = vunpack.i.l.bf16 %v5697_v26 }
 0x437   : > { %v5699_v17 = vpop.permute.xlu1 %2078  ;;  %v5701_v52 = vpop.permute.xlu0 %3392 }
 0x43b   : > { %v5707_v5 = vpop.permute.xlu1 %2082  ;;  %v5709_v3 = vpop.permute.xlu0 %3397 }
 0x43c   : > { %v3399_v59 = vunpack.i.l.bf16 %v5709_v3 }
 0x43f   : > { %v5725_v6 = vpop.permute.xlu1 %3367  ;;  %v5727_v58 = vpop.permute.xlu0 %2084 }
 0x440   : > { %v6262_v4 = vunpack.i.h.bf16 %v5725_v6  ;;  %v3369_v55 = vunpack.i.l.bf16 %v5725_v6 }
 0x442   : > { %v2138_v43 = vsel %vm6693_vm1, %v3335_v51, %v3369_v55  ;;  %v2139_v1 = vsel %vm6694_vm7, %v3369_v55, %v6262_v4  ;;  %v5772_v4 = vsel %vm6699_vm6, %v6265_v27, %v6267_v56  ;;  %vm6701_vm1 = vmmov %vm6700_vm0  ;;  %v6280_v27 = vunpack.i.h.bf16 %v5693_v57 }
 0x443   : > { %v2849_v28 = vpack.c.bf16 %v2139_v1, %v5591_v7  ;;  %v2852_v23 = vpack.c.bf16 %v2138_v43, %v5578_v11  ;;  %v5756_v51 = vpop.permute.xlu1 %3407  ;;  %v5758_v22 = vpop.permute.xlu0 %3402  ;;  %v1928_v11 = vsel %vm6700_vm0, %v3340_v44, %v3374_v31  ;;  %v1929_v7 = vsel %vm6701_vm1, %v3374_v31, %v6266_v40  ;;  %vm6703_vm6 = vmmov %vm6694_vm7 }
 0x444   : > { %v3404_v1 = vunpack.i.l.bf16 %v5758_v22  ;;  %v2171_v43 = vsel %vm6702_vm15, %v6270_v30, %v3355_v9  ;;  %v2855_v41 = vpack.c.bf16 %v1971_v48, %v1929_v7  ;;  %v3384_v44 = vunpack.i.l.bf16 %v5693_v57  ;;  %v6704_v48 = vld [vmem:[#allocation34_spill] sm:$0xff] }
 0x445   : > { %2851 = vmatprep.subr.msk.bf16.mxu1 %vm5748_vm9, %v2849_v28  ;;  %v2858_v31 = vpack.c.bf16 %v1970_v15, %v1928_v11  ;;  %v3360_v40 = vunpack.i.h.bf16 %v5691_v47  ;;  %v3409_v56 = vunpack.i.l.bf16 %v5756_v51  ;;  %vm6705_vm15 = vnez %v6704_v48  ;;  %v6712_v30 = vld [vmem:[#allocation38_spill] sm:$0xff] }
 0x446   : > { %v2136_v29 = vsel %vm6703_vm6, %v3404_v1, %v3334_v63  ;;  %2854 = vmatpush1.bf16.msk.msra.mxu1 %vm5763_vm5, %v2852_v23  ;;  %vm6706_vm0 = vmmov 1   ;;  %v6707_v7 = vmov 0  ;;  %v6709_v28 = vunpack.i.h.bf16 %v5697_v26  ;;  %vm6711_vm6 = vmpackc.low %vm4373_vm4, %vm6464_vm13 }
 0x447   : > { %vm5800_vm1 = vmpackc.low %vm6706_vm0, %vm6705_vm15  ;;  %vm6710_vm7 = vcmask 777216   ;;  %v2828_v63 = vpack.c.bf16 %v2136_v29, %v5568_v54  ;;  %v5810_v1 = vpop.permute.xlu1 %3417  ;;  %v5812_v23 = vpop.permute.xlu0 %3412  ;;  %2857 = vmatprep.subr.msk.bf16.mxu1 %vm6711_vm6, %v2855_v41  ;;  %vm6713_vm14 = vnez %v6712_v30  ;;  %v3365_v11 = vunpack.i.h.bf16 %v5695_v8 }
 0x448   : > { %v6708_v7 = vsel %vm5800_vm1, 4294967295, %v6707_v7  ;;  %v2173_v15 = vsel %vm6710_vm7, %v3389_v14, %v6709_v28  ;;  %v3359_v28 = vunpack.i.l.bf16 %v5691_v47  ;;  %v3364_v29 = vunpack.i.l.bf16 %v5695_v8  ;;  %vm6716_vm6 = vmmov %vm6710_vm7 }
 0x449   : > { %v3414_v54 = vunpack.i.l.bf16 %v5812_v23  ;;  %vm6715_vm4 = vcmask 769024   ;;  %v2172_v41 = vsel %vm6716_vm6, %v3355_v9, %v3389_v14  ;;  %v3394_v47 = vunpack.i.l.bf16 %v5701_v52  ;;  %2830 = vmatpush1.bf16.msk.msra.mxu0 %vm5800_vm1, %v2828_v63  ;;  %vm5842_vm7 = vmpackc.low %vm6464_vm13, %vm6706_vm0  ;;  %v6724_v63 = vld [vmem:[#allocation39_spill] sm:$0xff] }
 0x44a   : > { %v2013_v13 = vsel %vm6715_vm4, %v3384_v44, %v6280_v27  ;;  %v6719_v57 = vunpack.i.l.bf16 %v5660_v49  ;;  %vm6720_vm4 = vcmask 1031168   ;;  %v3419_v9 = vunpack.i.l.bf16 %v5810_v1  ;;  %vm6723_vm10 = vmpackc.low %vm4361_vm2, %vm6713_vm14 }
 0x44b   : > { %v2861_v34 = vpack.c.bf16 %v2013_v13, %v2173_v15  ;;  %v6721_v14 = vunpack.i.l.bf16 %v5677_v18  ;;  %vm6722_vm6 = vcmask 785408   ;;  %2833 = vmatprep.subr.msk.bf16.mxu0 %vm6723_vm10, %v2831_v10  ;;  %vm6725_vm12 = vnez %v6724_v63  ;;  %v5871_v33 = vpop.permute.xlu1 %3427  ;;  %v5873_v10 = vpop.permute.xlu0 %3422  ;;  %vm2838_vm2 = vmpackc.low %vm6713_vm14, %vm6706_vm0 }
 0x44c   : > { %v1926_v27 = vsel %vm6720_vm4, %v3409_v56, %v6719_v57  ;;  %v2837_v49 = vpack.c.bf16 %v5772_v4, %v2171_v43  ;;  %v6726_v57 = vunpack.i.h.bf16 %v5709_v3  ;;  %vm6727_vm4 = vcmask 515072  }
 0x44d   : > { %v1968_v26 = vsel %vm6722_vm6, %v3414_v54, %v6721_v14  ;;  %vm6728_vm6 = vmpackc.low %vm4367_vm3, %vm6714_vm8  ;;  %v6729_v4 = vunpack.i.h.bf16 %v5683_v2  ;;  %vm6730_vm10 = vcmask 769024   ;;  %v3429_v62 = vunpack.i.l.bf16 %v5871_v33 }
 0x44e   : > { %v2207_v56 = vsel %vm6727_vm4, %v3399_v59, %v6726_v57  ;;  %v2834_v18 = vpack.c.bf16 %v1968_v26, %v1926_v27  ;;  %2860 = vmatpush1.bf16.msk.msra.mxu1 %vm6728_vm6, %v2858_v31  ;;  %v2205_v26 = vsel %vm6727_vm4, %v3364_v29, %v3365_v11  ;;  %v3424_v27 = vunpack.i.l.bf16 %v5873_v10  ;;  %vm2865_vm3 = vmpackc.low %vm6714_vm8, %vm6706_vm0 }
 0x44f   : > { %v2012_v43 = vsel %vm6730_vm10, %v6729_v4, %v3384_v44  ;;  %2863 = vmatprep.subr.msk.bf16.mxu1 %vm5842_vm7, %v2861_v34  ;;  %vm6731_vm6 = vcmask 523264   ;;  %v6732_v54 = vunpack.i.h.bf16 %v5701_v52  ;;  %vm6734_vm10 = vmpackc.low %vm6705_vm15, %vm6725_vm12  ;;  %v2206_v13 = vsel %vm6727_vm4, %v3365_v11, %v3399_v59 }
 0x450   : > { %v2053_v31 = vsel %vm6731_vm6, %v3359_v28, %v3360_v40  ;;  %v2864_v15 = vpack.c.bf16 %v2012_v43, %v2172_v41  ;;  %vm6733_vm1 = vmmov %vm6731_vm6  ;;  %2836 = vmatpush1.bf16.msk.msra.mxu0 %vm6734_vm10, %v2834_v18  ;;  %v6735_v8 = vunpack.i.l.bf16 %v5683_v2  ;;  %vm6736_vm7 = vcmask 769024  }
 0x451   : > { %v2055_v44 = vsel %vm6733_vm1, %v3394_v47, %v6732_v54  ;;  %v6737_v57 = vunpack.i.l.bf16 %v5687_v32  ;;  %vm6738_vm6 = vcmask 777216   ;;  %2839 = vmatprep.subr.msk.bf16.mxu0 %vm2838_vm2, %v2837_v49  ;;  %vm2841_vm1 = vmpackc.low %vm6725_vm12, %vm6706_vm0  ;;  %v2843_v48 = vpack.c.bf16 %v2205_v26, %v2053_v31  ;;  %v2135_v59 = vpop.permute.xlu0 %2134 }
 0x452   : > { %v2867_v34 = vpack.c.bf16 %v2207_v56, %v2055_v44  ;;  %v2010_v14 = vsel %vm6736_vm7, %v3419_v9, %v6735_v8  ;;  %vm6739_vm8 = vcmask 523264   ;;  %2866 = vmatpush1.bf16.msk.msra.mxu1 %vm2865_vm3, %v2864_v15  ;;  %v3405_v2 = vunpack.i.h.bf16 %v5758_v22  ;;  %vm6741_vm2 = vmmov %vm6727_vm4 }
 0x453   : > { %v2170_v41 = vsel %vm6738_vm6, %v3424_v27, %v6737_v57  ;;  %v2054_v4 = vsel %vm6739_vm8, %v3360_v40, %v3394_v47  ;;  %v3433_v11 = vpop.permute.xlu1 %3432  ;;  %vm6740_vm15 = vmmov %vm6739_vm8  ;;  %v2204_v43 = vsel %vm6741_vm2, %v5658_v61, %v3364_v29  ;;  %vm6742_vm8 = vcmask 506880  }
 0x454   : > { %v2840_v18 = vpack.c.bf16 %v2010_v14, %v2170_v41  ;;  %v2052_v9 = vsel %vm6740_vm15, %v3429_v62, %v3359_v28  ;;  %v3435_v56 = vunpack.i.h.bf16 %v3433_v11  ;;  %v3434_v32 = vunpack.i.l.bf16 %v3433_v11  ;;  %2869 = vmatprep.subr.msk.bf16.mxu1 %vm5748_vm9, %v2867_v34  ;;  %vm6757_vm2 = vmmov %vm6742_vm8  ;;  %v6778_v11 = vld [vmem:[#allocation41_spill] sm:$0xff] }
 0x455   : > { %v2870_v49 = vpack.c.bf16 %v2206_v13, %v2054_v4  ;;  %v2097_v40 = vsel %vm6742_vm8, %v5707_v5, %v5727_v58  ;;  %v2846_v22 = vpack.c.bf16 %v2204_v43, %v2052_v9  ;;  %vm6743_vm3 = vcmask 1039360   ;;  %v3438_v47 = vpop.permute.xlu0 %3437  ;;  %v6781_v9 = vld [vmem:[#allocation57_spill] sm:$0xff] }
 0x456   : > { %2842 = vmatpush1.bf16.msk.msra.mxu0 %vm2841_vm1, %v2840_v18  ;;  %v2143_v28 = vsel %vm6743_vm3, %v3435_v56, %v2135_v59  ;;  %v6744_v26 = vunpack.i.h.bf16 %v5725_v6  ;;  %vm6745_vm9 = vmmov %vm6743_vm3  ;;  %v3415_v61 = vunpack.i.h.bf16 %v5812_v23  ;;  %v3440_v27 = vunpack.i.h.bf16 %v3438_v47 }
 0x457   : > { %2845 = vmatprep.subr.msk.bf16.mxu0 %vm5672_vm11, %v2843_v48  ;;  %2872 = vmatpush1.bf16.msk.msra.mxu1 %vm5763_vm5, %v2870_v49  ;;  %v1925_v42 = vpop.permute.xlu1 %1924  ;;  %vm6746_vm10 = vmmov %vm6743_vm3  ;;  %v3439_v31 = vunpack.i.l.bf16 %v3438_v47  ;;  %vm6749_vm5 = vnez %v6708_v7  ;;  %vm6750_vm7 = vnez %v6581_v46  ;;  %v6751_v6 = vmov 0  ;;  %v6786_v46 = vld [vmem:[#allocation36_spill] sm:$0xff] }
 0x458   : > { %v2140_v62 = vsel %vm6745_vm9, %v6744_v26, %v3405_v2  ;;  %v2142_v35 = vsel %vm6746_vm10, %v3434_v32, %v3435_v56  ;;  %2724 = vmatprep.subr.msk.mxu1 %vm6464_vm13, %v2097_v40  ;;  %vm6747_vm11 = vmmov %vm6742_vm8  ;;  %v2897_v15 = vpack.c.bf16 %v2143_v28, %v5625_v12  ;;  %vm6754_vm1 = vnez %v6587_v38 }
 0x459   : > { %v2095_v29 = vsel %vm6747_vm11, %v5699_v17, %v5679_v53  ;;  %vm6748_vm4 = vmmov %vm6743_vm3  ;;  %v2094_v54 = vsel %vm6757_vm2, %v5656_v39, %v5699_v17  ;;  %v3410_v44 = vunpack.i.h.bf16 %v5756_v51  ;;  %v2900_v12 = vpack.c.bf16 %v2142_v35, %v5622_v60  ;;  %v3443_v30 = vpop.permute.xlu0 %3442 }
 0x45a   : > { %v2141_v55 = vsel %vm6748_vm4, %v3405_v2, %v3434_v32  ;;  %2848 = vmatpush1.bf16.msk.msra.mxu0 %vm6749_vm5, %v2846_v22  ;;  %vm5939_vm6 = vmpackc.low %vm6706_vm0, %vm6750_vm7  ;;  %v6762_v39 = vunpack.i.h.bf16 %v5689_v24  ;;  %vm6763_vm9 = vcmask 785408   ;;  %v3445_v51 = vunpack.i.h.bf16 %v3443_v30 }
 0x45b   : > { %v6752_v6 = vsel %vm5939_vm6, 4294967295, %v6751_v6  ;;  %vm6753_vm13 = vmmov %vm6742_vm8  ;;  %2711 = vmatprep.subr.msk.mxu0 %vm6713_vm14, %v2095_v29  ;;  %vm6758_vm8 = vnez %v6359_v37  ;;  %vm6759_vm14 = vnez %v6336_v19  ;;  %v3444_v60 = vunpack.i.l.bf16 %v3443_v30  ;;  %v6797_v29 = vld [vmem:[#allocation22_spill] sm:$0xff] }
 0x45c   : > { %v2096_v23 = vsel %vm6753_vm13, %v5679_v53, %v5707_v5  ;;  %vm5954_vm15 = vmpackc.low %vm6706_vm0, %vm6754_vm1  ;;  %v2876_v53 = vpack.c.bf16 %v2140_v62, %v5585_v45  ;;  %v1967_v5 = vpop.permute.xlu1 %1966  ;;  %v1972_v17 = vsel %vm6763_vm9, %v6762_v39, %v3415_v61  ;;  %v2873_v45 = vpack.c.bf16 %v2141_v55, %v5610_v21 }
 0x45d   : > { %2725 = vmatpush1.msk.msra.mxu1 %vm6758_vm8, %v2096_v23  ;;  %vm5969_vm3 = vmpackc.low %vm6706_vm0, %vm6759_vm14  ;;  %vm6764_vm10 = vcmask 588800   ;;  %vm6765_vm11 = vnez %v6338_v20  ;;  %vm6768_vm5 = vcmask 1031168   ;;  %vm6771_vm8 = vnez %v6384_v0  ;;  %v3448_v18 = vpop.permute.xlu0 %3447 }
 0x45e   : > { %2899 = vmatprep.subr.msk.bf16.mxu1 %vm5939_vm6, %v2897_v15  ;;  %2726 = vmatmul.mubr.msk.f32.vlgmr.msra.gmra.mrb[4].mxu1 %vm6764_vm10, %v5943_v50  ;;  %vm5984_vm4 = vmpackc.low %vm6706_vm0, %vm6765_vm11  ;;  %v1933_v24 = vsel %vm6768_vm5, %v3440_v27, %v1925_v42  ;;  %vm6772_vm10 = vcmask 785408   ;;  %v6779_v59 = vunpack.i.h.bf16 %v6778_v11  ;;  %v3425_v32 = vunpack.i.h.bf16 %v5873_v10 }
 0x45f   : > { %vm6769_vm13 = vmmov %vm6768_vm5  ;;  %2902 = vmatpush1.bf16.msk.msra.mxu1 %vm5954_vm15, %v2900_v12  ;;  %2712 = vmatpush1.msk.msra.mxu0 %vm6725_vm12, %v2094_v54  ;;  %v1975_v8 = vsel %vm6772_vm10, %v3445_v51, %v1967_v5  ;;  %v3450_v49 = vunpack.i.h.bf16 %v3448_v18  ;;  %v3449_v43 = vunpack.i.l.bf16 %v3448_v18  ;;  %v3420_v20 = vunpack.i.h.bf16 %v5810_v1 }
 0x460   : > { %v1931_v34 = vsel %vm6769_vm13, %v3410_v44, %v3439_v31  ;;  %vm6770_vm2 = vmmov %vm6768_vm5  ;;  %2875 = vmatprep.subr.msk.bf16.mxu0 %vm5969_vm3, %v2873_v45  ;;  %vm6775_vm13 = vcmask 588800   ;;  %v2903_v41 = vpack.c.bf16 %v1975_v8, %v1933_v24  ;;  %v2009_v4 = vpop.permute.xlu1 %2008  ;;  %2507 = vmatprep.mubr.f32.mxu1 %v6553_v16  ;;  %v6787_v22 = vunpack.i.h.bf16 %v6786_v46 }
 0x461   : > { %v1932_v21 = vsel %vm6770_vm2, %v3439_v31, %v3440_v27  ;;  %vm2880_vm9 = vmpackc.low %vm6759_vm14, %vm6771_vm8  ;;  %2713 = vmatmul.mubr.msk.f32.vlgmr.msra.gmra.mrb[4].mxu0 %vm6775_vm13, %v5943_v50  ;;  %vm6776_vm2 = vnez %v6589_v36  ;;  %vm6782_vm13 = vnez %v6781_v9  ;;  %v3453_v38 = vpop.permute.xlu0 %3452  ;;  %vm6788_vm14 = vcmask 777216  }
 0x462   : > { %vm6773_vm6 = vmmov %vm6772_vm10  ;;  %2878 = vmatpush1.bf16.msk.msra.mxu0 %vm5984_vm4, %v2876_v53  ;;  %2436 = vmatprep.mubr.f32.mxu0 %v6553_v16  ;;  %v3455_v10 = vunpack.i.h.bf16 %v3453_v38  ;;  %v3454_v40 = vunpack.i.l.bf16 %v3453_v38  ;;  %v2174_v28 = vsel %vm6788_vm14, %v6787_v22, %v3425_v32  ;;  %v6798_v55 = vunpack.i.h.bf16 %v6797_v29 }
 0x463   : > { %v1973_v14 = vsel %vm6773_vm6, %v3415_v61, %v3444_v60  ;;  %vm6774_vm5 = vmmov %vm6773_vm6  ;;  %vm6777_vm6 = vnez %v6597_v25  ;;  %v3430_v12 = vunpack.i.h.bf16 %v5871_v33 }
 0x464   : > { %v1974_v57 = vsel %vm6774_vm5, %v3444_v60, %v3445_v51  ;;  %v2879_v63 = vpack.c.bf16 %v1973_v14, %v1931_v34  ;;  %vm2907_vm10 = vmpackc.low %vm6754_vm1, %vm6777_vm6  ;;  %vm6780_vm5 = vcmask 1031168   ;;  %v2169_v16 = vpop.permute.xlu1 %2168  ;;  %v6799_v34 = vunpack.i.h.bf16 %v5701_v52 }
 0x465   : > { %v2906_v48 = vpack.c.bf16 %v1974_v57, %v1932_v21  ;;  %v1930_v2 = vsel %vm6780_vm5, %v6779_v59, %v3410_v44  ;;  %vm2883_vm12 = vmpackc.low %vm6765_vm11, %vm6782_vm13  ;;  %v3458_v44 = vpop.permute.xlu0 %3457 }
 0x466   : > { %v2882_v56 = vpack.c.bf16 %v1972_v17, %v1930_v2  ;;  %2881 = vmatprep.subr.msk.bf16.mxu0 %vm2880_vm9, %v2879_v63  ;;  %vm6783_vm1 = vmpackc.low %vm6750_vm7, %vm6776_vm2  ;;  %vm6789_vm7 = vcmask 769024   ;;  %v3460_v5 = vunpack.i.h.bf16 %v3458_v44  ;;  %v3459_v30 = vunpack.i.l.bf16 %v3458_v44 }
 0x467   : > { %2905 = vmatprep.subr.msk.bf16.mxu1 %vm6783_vm1, %v2903_v41  ;;  %vm6040_vm11 = vmpackc.low %vm6771_vm8, %vm6706_vm0  ;;  %v2017_v42 = vsel %vm6789_vm7, %v3450_v49, %v2009_v4  ;;  %v2014_v27 = vsel %vm6789_vm7, %v6798_v55, %v3420_v20  ;;  %v6806_v41 = vunpack.i.h.bf16 %v5709_v3 }
 0x468   : > { %2908 = vmatpush1.bf16.msk.msra.mxu1 %vm2907_vm10, %v2906_v48  ;;  %2884 = vmatpush1.bf16.msk.msra.mxu0 %vm2883_vm12, %v2882_v56  ;;  %vm6790_vm9 = vmmov %vm6789_vm7  ;;  %v2051_v54 = vpop.permute.xlu1 %2050  ;;  %v2888_v53 = vpack.c.bf16 %v2014_v27, %v2174_v28 }
 0x469   : > { %v2015_v1 = vsel %vm6790_vm9, %v3420_v20, %v3449_v43  ;;  %vm6052_vm12 = vmpackc.low %vm6776_vm2, %vm6706_vm0  ;;  %v3463_v17 = vpop.permute.xlu0 %3462 }
 0x46a   : > { %vm6793_vm10 = vmmov %vm6789_vm7  ;;  %v3465_v60 = vunpack.i.h.bf16 %v3463_v17  ;;  %v3464_v24 = vunpack.i.l.bf16 %v3463_v17  ;;  %vm6809_vm7 = vnez %v6752_v6 }
 0x46b   : > { %v2016_v26 = vsel %vm6793_vm10, %v3449_v43, %v3450_v49  ;;  %vm6794_vm5 = vmmov %vm6788_vm14 }
 0x46c   : > { %v2177_v62 = vsel %vm6794_vm5, %v3455_v10, %v2169_v16  ;;  %vm6795_vm1 = vmmov %vm6794_vm5  ;;  %v3468_v39 = vpop.permute.xlu1 %3467  ;;  %vm6804_vm5 = vcmask 515072  }
 0x46d   : > { %v2175_v61 = vsel %vm6795_vm1, %v3425_v32, %v3454_v40  ;;  %vm6796_vm8 = vmmov %vm6795_vm1  ;;  %v2909_v23 = vpack.c.bf16 %v2017_v42, %v2177_v62  ;;  %v3470_v45 = vunpack.i.h.bf16 %v3468_v39  ;;  %v3469_v51 = vunpack.i.l.bf16 %v3468_v39  ;;  %v2087_v56 = vpop.permute.xlu0 %2086 }
 0x46e   : > { %v2176_v35 = vsel %vm6796_vm8, %v3454_v40, %v3455_v10  ;;  %vm2889_vm14 = vmpackc.low %vm6782_vm13, %vm6706_vm0  ;;  %v2885_v31 = vpack.c.bf16 %v2015_v1, %v2175_v61 }
 0x46f   : > { %v2912_v15 = vpack.c.bf16 %v2016_v26, %v2176_v35  ;;  %vm2913_vm9 = vmpackc.low %vm6777_vm6, %vm6706_vm0  ;;  %2911 = vmatprep.subr.msk.bf16.mxu1 %vm6052_vm12, %v2909_v23  ;;  %vm6800_vm0 = vcmask 523264   ;;  %v2211_v57 = vsel %vm6804_vm5, %v3469_v51, %v3470_v45 }
 0x470   : > { %2887 = vmatprep.subr.msk.bf16.mxu0 %vm6040_vm11, %v2885_v31  ;;  %v2056_v33 = vsel %vm6800_vm0, %v6799_v34, %v3430_v12  ;;  %vm6801_vm8 = vmmov %vm6800_vm0  ;;  %v2089_v2 = vpop.permute.xlu1 %2088 }
 0x471   : > { %2890 = vmatpush1.bf16.msk.msra.mxu0 %vm2889_vm14, %v2888_v53  ;;  %2914 = vmatpush1.bf16.msk.msra.mxu1 %vm2913_vm9, %v2912_v15  ;;  %v2059_v21 = vsel %vm6801_vm8, %v3460_v5, %v2051_v54  ;;  %vm6802_vm10 = vmmov %vm6800_vm0  ;;  %vm6810_vm9 = vcmask 506880   ;;  %v2091_v49 = vpop.permute.xlu0 %2090 }
 0x472   : > { %v2057_v8 = vsel %vm6802_vm10, %v3430_v12, %v3459_v30  ;;  %vm6803_vm11 = vmmov %vm6800_vm0  ;;  %v2915_v18 = vpack.c.bf16 %v2211_v57, %v2059_v21  ;;  %v2099_v32 = vsel %vm6810_vm9, %v2087_v56, %v2089_v2  ;;  %vm6811_vm0 = vnez %v6384_v0 }
 0x473   : > { %v2058_v14 = vsel %vm6803_vm11, %v3459_v30, %v3460_v5  ;;  %vm6805_vm12 = vmmov %vm6804_vm5 }
 0x474   : > { %v2210_v63 = vsel %vm6805_vm12, %v3465_v60, %v3469_v51  ;;  %vm6807_vm1 = vmmov %vm6804_vm5  ;;  %2917 = vmatprep.subr.msk.bf16.mxu1 %vm6809_vm7, %v2915_v18  ;;  %v2093_v3 = vpop.permute.xlu1 %2092 }
 0x475   : > { %v2208_v48 = vsel %vm6807_vm1, %v6806_v41, %v3464_v24  ;;  %vm6808_vm14 = vmmov %vm6807_vm1  ;;  %v2918_v59 = vpack.c.bf16 %v2210_v63, %v2058_v14 }
 0x476   : > { %v2209_v4 = vsel %vm6808_vm14, %v3464_v24, %v3465_v60  ;;  %v2894_v11 = vpack.c.bf16 %v2208_v48, %v2056_v33  ;;  %vm6812_vm8 = vmmov %vm6810_vm9 }
 0x477   : > { %v2891_v52 = vpack.c.bf16 %v2209_v4, %v2057_v8  ;;  %2920 = vmatpush1.bf16.msk.msra.mxu1 %vm5954_vm15, %v2918_v59  ;;  %v2100_v13 = vsel %vm6812_vm8, %v2089_v2, %v2091_v49  ;;  %vm6815_vm15 = vcmask 588800  }
 0x479   : > { %2893 = vmatprep.subr.msk.bf16.mxu0 %vm5969_vm3, %v2891_v52  ;;  %vm6813_vm3 = vmmov %vm6812_vm8 }
 0x47a   : > { %2896 = vmatpush1.bf16.msk.msra.mxu0 %vm5984_vm4, %v2894_v11  ;;  %v2101_v43 = vsel %vm6813_vm3, %v2091_v49, %v2093_v3  ;;  %vm6814_vm10 = vmmov %vm6813_vm3 }
 0x47b   : > { %2737 = vmatprep.subr.msk.mxu0 %vm6811_vm0, %v2099_v32  ;;  %v2098_v6 = vsel %vm6814_vm10, %v5727_v58, %v2087_v56  ;;  %2750 = vmatprep.subr.msk.mxu1 %vm6776_vm2, %v2101_v43  ;;  %vm6816_vm4 = vmmov %vm6815_vm15 }
 0x47c   : > { %2751 = vmatpush1.msk.msra.mxu1 %vm6777_vm6, %v2100_v13 }
 0x47d   : > { %2752 = vmatmul.mubr.msk.f32.vlgmr.msra.gmra.mrb[6].mxu1 %vm6816_vm4, %v5943_v50 }
 0x47e   : > { %2738 = vmatpush1.msk.msra.mxu0 %vm6782_vm13, %v2098_v6 }
 0x47f   : > { %2739 = vmatmul.mubr.msk.f32.vlgmr.msra.gmra.mrb[6].mxu0 %vm6815_vm15, %v5943_v50 }
 0x482   : > { %v2225_v0 = vpop.permute.xlu0 %2224 }
 0x531   : > { %v2367_v7 = vpop.f32.mrb[4].mxu1 }
 0x532   : > { %v2368_v37 = vadd.f32 %v2367_v7, %v2225_v0  ;;  %v2369_v58 = vpop.f32.mrb[5].mxu1 }
 0x533   : > { %v2370_v36 = vadd.f32 %v2369_v58, %v2225_v0 }
 0x534   : > { %v2296_v20 = vpop.f32.mrb[4].mxu0  ;;  %v2516_v38 = vmax.f32 %v2368_v37, 0.0 }
 0x535   : > { %v2297_v16 = vadd.f32 %v2296_v20, %v2225_v0  ;;  %v2298_v9 = vpop.f32.mrb[5].mxu0  ;;  %v2517_v25 = vmax.f32 %v2370_v36, 0.0 }
 0x536   : > { %v2299_v10 = vadd.f32 %v2298_v9, %v2225_v0  ;;  %2524 = vst [vmem:[%s355_s20 + $0x10] sm:$0xff] %v2516_v38 }
 0x537   : > { %v2514_v40 = vmax.f32 %v2297_v16, 0.0  ;;  %2525 = vst [vmem:[%s355_s20 + $0x18] sm:$0xff] %v2517_v25 }
 0x538   : > { %v2515_v19 = vmax.f32 %v2299_v10, 0.0 }
 0x539   : > { %2522 = vst [vmem:[%s355_s20] sm:$0xff] %v2514_v40 }
 0x53a   : > { %2523 = vst [vmem:[%s355_s20 + $0x8] sm:$0xff] %v2515_v19 }
 0x550   : > { %v2509_v46 = vpop.f32.mrb[6].mxu1 }
 0x551   : > { %v2510_v28 = vadd.f32 %v2509_v46, %v2225_v0  ;;  %v2511_v1 = vpop.f32.mrb[7].mxu1 }
 0x552   : > { %v2438_v50 = vpop.f32.mrb[6].mxu0  ;;  %v2512_v26 = vadd.f32 %v2511_v1, %v2225_v0 }
 0x553   : > { %v2439_v22 = vadd.f32 %v2438_v50, %v2225_v0  ;;  %v2440_v42 = vpop.f32.mrb[7].mxu0  ;;  %v2520_v61 = vmax.f32 %v2510_v28, 0.0 }
 0x554   : > { %v2441_v47 = vadd.f32 %v2440_v42, %v2225_v0  ;;  %v2521_v29 = vmax.f32 %v2512_v26, 0.0 }
 0x555   : > { %v2518_v62 = vmax.f32 %v2439_v22, 0.0  ;;  %2528 = vst [vmem:[%s355_s20 + $0x30] sm:$0xff] %v2520_v61 }
 0x556   : > { %v2519_v35 = vmax.f32 %v2441_v47, 0.0  ;;  %2529 = vst [vmem:[%s355_s20 + $0x38] sm:$0xff] %v2521_v29 }
 0x557   : > { %2526 = vst [vmem:[%s355_s20 + $0x20] sm:$0xff] %v2518_v62 }
 0x558   : > { %2527 = vst [vmem:[%s355_s20 + $0x28] sm:$0xff] %v2519_v35 }
 0x559   : > { %3665 = shalt.err (!%p3662_p1)
}
 0x55a   : > { %s3666_s25 = scalar_lea.hbm %s6116_s13, 1024  ;;  %s3670_s12 = scalar_lea.hbm %s6166_s6, 2048 }
 0x55b   : > { %p3667_p6 = scmp.ne.s32.totalorder %s6116_s13, %s3666_s25  ;;  %p3671_p12 = scmp.lt.u32.totalorder %s6116_s13, %s6166_s6 }
 0x55c   : > { %p3672_p3 = scmp.lt.u32.totalorder %s3670_s12, %s3666_s25  ;;  %p3674_p0 = scmp.lt.u32.totalorder %s3666_s25, %s6116_s13 }
 0x55d   : > { %p3668_p11 = pnand %p3667_p6, %p6817_p2 }
 0x55e   : > { %p3673_p13 = por %p3672_p3, %p3671_p12 }
 0x55f   : > { %p3669_p9 = pneg %p3668_p11 }
 0x560   : > { %p3675_p10 = por %p3674_p0, %p3673_p13 }
 0x562   : > { %p3676_p4 = pnand %p3675_p10, %p3669_p9 }
 0x564   : > { %3679 = shalt.err (!%p3676_p4)
}
 0x565   : > { %2941 = dma.vmem_to_hbm [thread:$0]  (%p6817_p2), %s6118_s7, 1024, %s6116_s13, %s2531_s27  }
 0x566 PF: > { %s2557_s29 = sand.u32 1, %s3722_s21   ;;  %p6818_p5 = scmp.ne.s32.totalorder %s6300_s26, 0 }
 0x567   : > { %p6819_p7 = scmp.ge.s32.totalorder %s3734_s24, 2  ;;  %s2558_s8 = scalar_lea.sflag [#allocation4], %s2557_s29 }
 0x569   : > { %p2964_p8 = pnand %p6819_p7, %p6818_p5 }
 0x56b   : > { %3717 = dma.done.wait (!%p2964_p8), %s2558_s8, 1024  }
 0x56c   : > { %3719 = vsyncadd (!%p2964_p8), %s2558_s8, 4294966272  ;;  %p24_p1 = scmp.ge.s32.totalorder %s3933_s9, 4   ;;  %s6820_s21 = smov %s3726_s22 }
 0x56d   : > { %s6821_s22 = smov %s3730_s23  ;;  %s6822_s23 = smov %s3944_s30 }
 0x56e   : > { %s6823_s24 = smov %s3933_s9  ;;  %26 = sbr.rel (!%p24_p1) target bundleno = 13 (0xd), region = 118 }
 0x575   :  { %2563 = vsyncpa [#allocation3], 1 }
 0x576   :  { %2565 = vsyncpa [#allocation3 + $0x1], 1 }
 0x577   :  { %2566 = vsyncpa [#allocation6], 1 }
 0x578   :  { %2568 = vsyncpa [#allocation6 + $0x1], 1 }
 0x579   :  { %2569 = vsyncpa [#allocation9], 1 }
 0x57a   :  { %2570 = vsyncpa [#allocation12], 1 }
 0x57b   :  { %2571 = vsyncpa [#allocation4], 1 }
 0x57c   :  { %2573 = vsyncpa [#allocation4 + $0x1], 1 }

</bundles_post_ra>
